<compile_context>
chip_gen: v7x
topology: tpu7x:2x2x1
jax: 0.10.0
libtpu: 0.0.40
codegen_flags: <defaults>
</compile_context>

<pallas_src>
import functools
import math

import jax
import jax.numpy as jnp
from jax.experimental import pallas as pl
from jax.experimental.pallas import tpu as pltpu

F32 = jnp.float32
BF16 = jnp.bfloat16

IMG_CFG = {"n_layers": 2, "image_size": 32, "n_head": 4, "emb_dim": 128,
           "patch_size": 16}
TXT_CFG = {"n_layers": 2, "vocab_size": 100, "n_head": 4, "emb_dim": 128,
           "max_len": 8}
BATCH = 2


# ----------------------------------------------------------------------------
# Helpers
# ----------------------------------------------------------------------------
def _full_spec(shape):
    nd = len(shape)
    return pl.BlockSpec(tuple(shape), lambda i, _nd=nd: (0,) * _nd)


def _ln(x, g, b):
    mu = jnp.mean(x, axis=-1, keepdims=True)
    var = jnp.mean(jnp.square(x - mu), axis=-1, keepdims=True)
    return (x - mu) * jax.lax.rsqrt(var + 1e-5) * g + b


# ----------------------------------------------------------------------------
# Kernel: patch embedding (conv expressed as matmul) + CLS + positional embed.
# ----------------------------------------------------------------------------
def _image_embed_kernel(patch_ref, pw_ref, pb_ref, clsrow_ref, pospatch_ref,
                        o_ref):
    B, NP, CPP = patch_ref.shape
    D = pw_ref.shape[1]
    pe = (jnp.dot(patch_ref[...].reshape(B * NP, CPP).astype(BF16),
                  pw_ref[...], preferred_element_type=F32) + pb_ref[...])
    o_ref[:, 1:, :] = pe.reshape(B, NP, D) + pospatch_ref[...][None]
    o_ref[:, 0:1, :] = jnp.broadcast_to(clsrow_ref[...][None], (B, 1, D))


# ----------------------------------------------------------------------------
# Kernel: whole transformer encoder.  grid=(batch, layer); one sample per
# batch block, activation resident in the output VMEM block across layers,
# per-layer bf16 weights streamed via BlockSpec.
# ----------------------------------------------------------------------------
def _encoder_kernel(*refs, n_head, use_mask):
    if use_mask:
        (x0_ref, mask_ref, qkvw_ref, qkvb_ref, wo_ref, bo_ref,
         ln1g_ref, ln1b_ref, ln2g_ref, ln2b_ref,
         w1_ref, b1_ref, w2_ref, b2_ref, o_ref) = refs
    else:
        (x0_ref, qkvw_ref, qkvb_ref, wo_ref, bo_ref,
         ln1g_ref, ln1b_ref, ln2g_ref, ln2b_ref,
         w1_ref, b1_ref, w2_ref, b2_ref, o_ref) = refs
        mask_ref = None

    # Layer 0: seed the resident activation block from the embeddings.
    @pl.when(pl.program_id(1) == 0)
    def _():
        o_ref[...] = x0_ref[...]

    x = o_ref[0]                                 # [S, D] f32, resident
    S, D = x.shape
    Dh = D // n_head

    # ---- pre-LN attention with fused QKV matmul (bf16 in / f32 acc) --------
    h = _ln(x, ln1g_ref[0], ln1b_ref[0])
    qkv = (jnp.dot(h.astype(BF16), qkvw_ref[0], preferred_element_type=F32)
           + qkvb_ref[0])                        # [S, 3D]; slices 128-aligned
    qkv16 = qkv.astype(BF16)

    if use_mask:
        madd = (1.0 - mask_ref[0]) * -1e9        # [1, S] key-padding bias

    wo3 = wo_ref[0]                              # [n_head, Dh, D] bf16
    attn = jnp.zeros((S, D), F32)
    # 1/sqrt(Dh) folded into Wq at init; head merge folded into Wo (no concat).
    for hh in range(n_head):
        q_h = qkv16[:, hh * Dh:(hh + 1) * Dh]
        k_h = qkv16[:, D + hh * Dh:D + (hh + 1) * Dh]
        v_h = qkv16[:, 2 * D + hh * Dh:2 * D + (hh + 1) * Dh]
        s = jax.lax.dot_general(q_h, k_h, (((1,), (1,)), ((), ())),
                                preferred_element_type=F32)        # [S, S]
        if use_mask:
            s = s + madd
        s = s - jnp.max(s, axis=-1, keepdims=True)
        p = jnp.exp(s)
        p = p * pl.reciprocal(jnp.sum(p, axis=-1, keepdims=True), approx=True)
        ctx = jnp.dot(p.astype(BF16), v_h, preferred_element_type=F32)
        attn = attn + jnp.dot(ctx.astype(BF16), wo3[hh],
                              preferred_element_type=F32)
    x = x + attn + bo_ref[0]

    # ---- pre-LN MLP ---------------------------------------------------------
    h = _ln(x, ln2g_ref[0], ln2b_ref[0])
    h = (jnp.dot(h.astype(BF16), w1_ref[0], preferred_element_type=F32)
         + b1_ref[0])
    h = jax.nn.gelu(h, approximate=True)  # TODO(synk): reference encoder body unspecified; original CLIP uses QuickGELU.
    x = x + (jnp.dot(h.astype(BF16), w2_ref[0], preferred_element_type=F32)
             + b2_ref[0])

    o_ref[0] = x


def run_encoder(x0, blocks, n_head, mask=None):
    L = blocks["qkv_w"].shape[0]
    B, S, D = x0.shape

    def wspec(arr):
        nd = arr.ndim
        return pl.BlockSpec((1,) + tuple(arr.shape[1:]),
                            lambda b, l, _nd=nd: (l,) + (0,) * (_nd - 1))

    weight_names = ["qkv_w", "qkv_b", "wo", "bo", "ln1_g", "ln1_b",
                    "ln2_g", "ln2_b", "w1", "b1", "w2", "b2"]
    weights = [blocks[n] for n in weight_names]

    args = [x0]
    in_specs = [pl.BlockSpec((1, S, D), lambda b, l: (b, 0, 0))]
    if mask is not None:
        args.append(mask)
        in_specs.append(pl.BlockSpec((1, 1, S), lambda b, l: (b, 0, 0)))
    args += weights
    in_specs += [wspec(w) for w in weights]

    # Explicit VMEM budget: 2x double-buffered per-layer weight blocks +
    # resident activation + matmul temporaries, with headroom.
    per_layer_bytes = sum(math.prod(w.shape[1:]) * w.dtype.itemsize
                          for w in weights)
    act_bytes = S * D * 4
    vmem_limit = int(min(64 << 20,
                         max(8 << 20,
                             4 * per_layer_bytes + 16 * act_bytes + (2 << 20))))

    kern = functools.partial(_encoder_kernel, n_head=n_head,
                             use_mask=mask is not None)
    return pl.pallas_call(
        kern,
        grid=(B, L),
        in_specs=in_specs,
        out_specs=pl.BlockSpec((1, S, D), lambda b, l: (b, 0, 0)),
        out_shape=jax.ShapeDtypeStruct((B, S, D), F32),
        compiler_params=pltpu.CompilerParams(
            # batch axis may be split across TensorCores (v7x); the layer axis
            # carries the resident activation so it must stay "arbitrary".
            dimension_semantics=("parallel", "arbitrary"),
            vmem_limit_bytes=vmem_limit),
    )(*args)


# ----------------------------------------------------------------------------
# Kernel: final LN on CLS rows only + similarity + symmetric cross entropy.
# ----------------------------------------------------------------------------
def _clip_head_kernel(xi_ref, xt_ref, ig_ref, ib_ref, tg_ref, tb_ref,
                      temp_ref, o_ref):
    ie = _ln(xi_ref[...][:, 0, :], ig_ref[...], ib_ref[...])   # [B, D]
    te = _ln(xt_ref[...][:, 0, :], tg_ref[...], tb_ref[...])
    temp = jnp.exp(temp_ref[0, 0])
    # text @ image^T via dot_general contracting the feature dim (no transpose)
    sim = jax.lax.dot_general(te, ie, (((1,), (1,)), ((), ())),
                              preferred_element_type=F32) * temp
    b = sim.shape[0]
    r = jax.lax.broadcasted_iota(jnp.int32, (b, b), 0)
    c = jax.lax.broadcasted_iota(jnp.int32, (b, b), 1)
    eye = (r == c).astype(F32)

    def ce(logits):  # cross-entropy with labels = arange(b)
        m = jnp.max(logits, axis=-1, keepdims=True)
        lse = jnp.log(jnp.sum(jnp.exp(logits - m), axis=-1, keepdims=True)) + m
        diag = jnp.sum(logits * eye, axis=-1, keepdims=True)
        return jnp.mean(lse - diag)

    o_ref[...] = jnp.reshape((ce(sim) + ce(sim.T)) * 0.5, (1, 1))


# ----------------------------------------------------------------------------
# Forward glue
# ----------------------------------------------------------------------------
def image_encoder_forward(img, p, cfg):
    B, C, H, W = img.shape
    P, D, nh = cfg["patch_size"], cfg["emb_dim"], cfg["n_head"]
    Hn, Wn = H // P, W // P
    NP = Hn * Wn
    S = NP + 1
    # TODO(synk): patch unfold kept in XLA glue; fusing it into the embed
    # kernel via a BlockSpec index_map only matters at real image sizes.
    patches = img.reshape(B, C, Hn, P, Wn, P).transpose(0, 2, 4, 1, 3, 5)
    patches = patches.reshape(B, NP, C * P * P)
    cls_row = p["cls"] + p["pos"][0:1]                 # weight-level prep
    pos_patch = p["pos"][1:S]
    x0 = pl.pallas_call(
        _image_embed_kernel,
        grid=(1,),
        in_specs=[_full_spec(patches.shape), _full_spec(p["patch_w"].shape),
                  _full_spec(p["patch_b"].shape), _full_spec(cls_row.shape),
                  _full_spec(pos_patch.shape)],
        out_specs=_full_spec((B, S, D)),
        out_shape=jax.ShapeDtypeStruct((B, S, D), F32),
        compiler_params=pltpu.CompilerParams(
            dimension_semantics=("arbitrary",)),
    )(patches, p["patch_w"], p["patch_b"], cls_row, pos_patch)
    return run_encoder(x0, p["blocks"], nh)


def text_encoder_forward(tokens, attn_mask, p, cfg):
    B, L = tokens.shape
    nh = cfg["n_head"]
    # TODO(synk): token-embedding gather kept in JAX glue (no clean Pallas gather here).
    x0 = jnp.take(p["tok_emb"], tokens, axis=0) + p["pos"][None, :L, :]
    mask = attn_mask.astype(F32).reshape(B, 1, L)      # key-padding mask
    return run_encoder(x0, p["blocks"], nh, mask=mask)


def clip_forward(params, img, tokens, attn_mask):
    x_img = image_encoder_forward(img, params["image"], IMG_CFG)
    x_txt = text_encoder_forward(tokens, attn_mask, params["text"], TXT_CFG)
    pi, pt = params["image"], params["text"]
    loss = pl.pallas_call(
        _clip_head_kernel,
        grid=(1,),
        in_specs=[_full_spec(x_img.shape), _full_spec(x_txt.shape),
                  _full_spec(pi["lnf_g"].shape), _full_spec(pi["lnf_b"].shape),
                  _full_spec(pt["lnf_g"].shape), _full_spec(pt["lnf_b"].shape),
                  pl.BlockSpec(memory_space=pltpu.MemorySpace.SMEM)],
        out_specs=_full_spec((1, 1)),
        out_shape=jax.ShapeDtypeStruct((1, 1), F32),
        compiler_params=pltpu.CompilerParams(
            dimension_semantics=("arbitrary",)),
    )(x_img, x_txt, pi["lnf_g"], pi["lnf_b"], pt["lnf_g"], pt["lnf_b"],
      params["temperature"].reshape(1, 1))
    return loss[0, 0]


# ----------------------------------------------------------------------------
# Deterministic parameter initialization (per-layer weights stacked [L, ...],
# matmul weights stored bf16, attention scale folded into Wq, Wo stored as
# [n_head, Dh, D] so the head merge fuses into the out-projection).
# ----------------------------------------------------------------------------
def _nrm(key, shape, scale=0.02):
    return jax.random.normal(key, shape, F32) * scale


def _init_stacked_blocks(key, L, D, M, n_head):
    Dh = D // n_head
    qscale = 1.0 / float(Dh) ** 0.5

    def one(k):
        ks = jax.random.split(k, 6)
        wq = _nrm(ks[0], (D, D)) * qscale          # fold attention scale here
        wk = _nrm(ks[1], (D, D))
        wv = _nrm(ks[2], (D, D))
        wo = _nrm(ks[3], (D, D)).reshape(n_head, Dh, D)
        return {
            "qkv_w": jnp.concatenate([wq, wk, wv], axis=1).astype(BF16),
            # (the Q part of the bias would also carry the folded scale; zero)
            "qkv_b": jnp.zeros((1, 3 * D), F32),
            "wo": wo.astype(BF16), "bo": jnp.zeros((1, D), F32),
            "w1": _nrm(ks[4], (D, M)).astype(BF16), "b1": jnp.zeros((1, M), F32),
            "w2": _nrm(ks[5], (M, D)).astype(BF16), "b2": jnp.zeros((1, D), F32),
            "ln1_g": jnp.ones((1, D), F32), "ln1_b": jnp.zeros((1, D), F32),
            "ln2_g": jnp.ones((1, D), F32), "ln2_b": jnp.zeros((1, D), F32),
        }

    per = [one(k) for k in jax.random.split(key, L)]
    return {n: jnp.stack([p[n] for p in per], axis=0) for n in per[0]}


def init_params(key):
    D_i, P = IMG_CFG["emb_dim"], IMG_CFG["patch_size"]
    n_patch = (IMG_CFG["image_size"] // P) ** 2
    D_t = TXT_CFG["emb_dim"]
    k_img, k_txt = jax.random.split(key, 2)
    ki = jax.random.split(k_img, 4)
    kt = jax.random.split(k_txt, 3)
    image = {
        "patch_w": _nrm(ki[0], (3 * P * P, D_i)).astype(BF16),
        "patch_b": jnp.zeros((1, D_i), F32),
        "cls": _nrm(ki[1], (1, D_i)),
        "pos": _nrm(ki[2], (n_patch + 1, D_i)),
        "blocks": _init_stacked_blocks(ki[3], IMG_CFG["n_layers"], D_i,
                                       4 * D_i, IMG_CFG["n_head"]),
        "lnf_g": jnp.ones((1, D_i), F32), "lnf_b": jnp.zeros((1, D_i), F32),
    }
    text = {
        "tok_emb": _nrm(kt[0], (TXT_CFG["vocab_size"], D_t)),
        "pos": _nrm(kt[1], (TXT_CFG["max_len"], D_t)),
        "blocks": _init_stacked_blocks(kt[2], TXT_CFG["n_layers"], D_t,
                                       4 * D_t, TXT_CFG["n_head"]),
        "lnf_g": jnp.ones((1, D_t), F32), "lnf_b": jnp.zeros((1, D_t), F32),
    }
    return {"image": image, "text": text, "temperature": jnp.array(1.0, F32)}


if __name__ == "__main__":
    key = jax.random.PRNGKey(0)
    k_param, k_img, k_tok = jax.random.split(key, 3)
    params = init_params(k_param)

    img = jax.random.normal(
        k_img, (BATCH, 3, IMG_CFG["image_size"], IMG_CFG["image_size"]), F32)
    tokens = jax.random.randint(
        k_tok, (BATCH, TXT_CFG["max_len"]), 0, TXT_CFG["vocab_size"],
        dtype=jnp.int32)
    attn_mask = jnp.array([[1, 1, 1, 1, 1, 1, 1, 1],
                           [1, 1, 1, 1, 1, 0, 0, 0]], dtype=jnp.int32)

    loss = jax.jit(clip_forward)(params, img, tokens, attn_mask)
    jax.block_until_ready(loss)
    assert loss.shape == () and bool(jnp.isfinite(loss))
    print("KERNEL_OK")
</pallas_src>

<mosaic_0001>
module attributes {stable_mosaic.version = 11 : i64} {
  func.func @_image_embed_kernel(%arg0: i32, %arg1: memref<2x4x768xf32, #tpu.memory_space<vmem>>, %arg2: memref<768x128xbf16, #tpu.memory_space<vmem>>, %arg3: memref<1x128xf32, #tpu.memory_space<vmem>>, %arg4: memref<1x128xf32, #tpu.memory_space<vmem>>, %arg5: memref<4x128xf32, #tpu.memory_space<vmem>>, %arg6: memref<2x5x128xf32, #tpu.memory_space<vmem>>) attributes {dimension_semantics = [#tpu.dimension_semantics<arbitrary>], iteration_bounds = array<i64: 1>, scalar_prefetch = 0 : i64, scratch_operands = 0 : i64, tpu.core_type = #tpu.core_type<tc>, window_params = [{pipeline_mode = #tpu.pipeline_mode<synchronous>, transform_indices = @transform_0, window_bounds = array<i64: 2, 4, 768>}, {pipeline_mode = #tpu.pipeline_mode<synchronous>, transform_indices = @transform_1, window_bounds = array<i64: 768, 128>}, {pipeline_mode = #tpu.pipeline_mode<synchronous>, transform_indices = @transform_2, window_bounds = array<i64: 1, 128>}, {pipeline_mode = #tpu.pipeline_mode<synchronous>, transform_indices = @transform_3, window_bounds = array<i64: 1, 128>}, {pipeline_mode = #tpu.pipeline_mode<synchronous>, transform_indices = @transform_4, window_bounds = array<i64: 4, 128>}, {pipeline_mode = #tpu.pipeline_mode<synchronous>, transform_indices = @transform_5, window_bounds = array<i64: 2, 5, 128>}]} {
    %c0 = arith.constant 0 : index
    %c0_0 = arith.constant 0 : index
    %c0_1 = arith.constant 0 : index
    %0 = vector.load %arg1[%c0, %c0_0, %c0_1] : memref<2x4x768xf32, #tpu.memory_space<vmem>>, vector<2x4x768xf32>
    %1 = vector.shape_cast %0 : vector<2x4x768xf32> to vector<8x768xf32>
    %2 = arith.truncf %1 : vector<8x768xf32> to vector<8x768xbf16>
    %c0_2 = arith.constant 0 : index
    %c0_3 = arith.constant 0 : index
    %3 = vector.load %arg2[%c0_2, %c0_3] : memref<768x128xbf16, #tpu.memory_space<vmem>>, vector<768x128xbf16>
    %cst = arith.constant dense<0.000000e+00> : vector<8x128xf32>
    %4 = tpu.matmul %2, %3, %cst {dimension_numbers = #tpu.dot_dimension_numbers<[1], [0], [0], [1], [0, 0, 1, 1], [], []>} : vector<8x768xbf16>, vector<768x128xbf16>, vector<8x128xf32> -> vector<8x128xf32>
    %c0_4 = arith.constant 0 : index
    %c0_5 = arith.constant 0 : index
    %5 = vector.load %arg3[%c0_4, %c0_5] : memref<1x128xf32, #tpu.memory_space<vmem>>, vector<1x128xf32>
    %6 = vector.broadcast %5 : vector<1x128xf32> to vector<8x128xf32>
    %7 = arith.addf %4, %6 : vector<8x128xf32>
    %8 = vector.shape_cast %7 : vector<8x128xf32> to vector<2x4x128xf32>
    %c0_6 = arith.constant 0 : index
    %c0_7 = arith.constant 0 : index
    %9 = vector.load %arg5[%c0_6, %c0_7] : memref<4x128xf32, #tpu.memory_space<vmem>>, vector<4x128xf32>
    %10 = vector.shape_cast %9 : vector<4x128xf32> to vector<1x4x128xf32>
    %11 = vector.broadcast %10 : vector<1x4x128xf32> to vector<2x4x128xf32>
    %12 = arith.addf %8, %11 : vector<2x4x128xf32>
    %c0_8 = arith.constant 0 : index
    %c1 = arith.constant 1 : index
    %c0_9 = arith.constant 0 : index
    %13 = vector.load %arg6[%c0_8, %c1, %c0_9] : memref<2x5x128xf32, #tpu.memory_space<vmem>>, vector<2x4x128xf32>
    tpu.vector_store %arg6[%c0_8, %c1, %c0_9], %12 {strides = array<i32>} : memref<2x5x128xf32, #tpu.memory_space<vmem>>, vector<2x4x128xf32>,
    %c0_10 = arith.constant 0 : index
    %c0_11 = arith.constant 0 : index
    %14 = vector.load %arg4[%c0_10, %c0_11] : memref<1x128xf32, #tpu.memory_space<vmem>>, vector<1x128xf32>
    %15 = vector.shape_cast %14 : vector<1x128xf32> to vector<1x1x128xf32>
    %16 = vector.shape_cast %15 : vector<1x1x128xf32> to vector<1x1x128xf32>
    %17 = vector.broadcast %16 : vector<1x1x128xf32> to vector<2x1x128xf32>
    %c0_12 = arith.constant 0 : index
    %c0_13 = arith.constant 0 : index
    %c0_14 = arith.constant 0 : index
    %18 = vector.load %arg6[%c0_12, %c0_13, %c0_14] : memref<2x5x128xf32, #tpu.memory_space<vmem>>, vector<2x1x128xf32>
    tpu.vector_store %arg6[%c0_12, %c0_13, %c0_14], %17 {strides = array<i32>} : memref<2x5x128xf32, #tpu.memory_space<vmem>>, vector<2x1x128xf32>,
    return
  }
  func.func @transform_0(%arg0: i32) -> (i32, i32, i32) {
    %c0_i32 = arith.constant 0 : i32
    %c0_i32_0 = arith.constant 0 : i32
    %c0_i32_1 = arith.constant 0 : i32
    %c0_i32_2 = arith.constant 0 : i32
    return %c0_i32, %c0_i32_0, %c0_i32_1 : i32, i32, i32
  }
  func.func @transform_1(%arg0: i32) -> (i32, i32) {
    %c0_i32 = arith.constant 0 : i32
    %c0_i32_0 = arith.constant 0 : i32
    %c0_i32_1 = arith.constant 0 : i32
    return %c0_i32, %c0_i32_0 : i32, i32
  }
  func.func @transform_2(%arg0: i32) -> (i32, i32) {
    %c0_i32 = arith.constant 0 : i32
    %c0_i32_0 = arith.constant 0 : i32
    %c0_i32_1 = arith.constant 0 : i32
    return %c0_i32, %c0_i32_0 : i32, i32
  }
  func.func @transform_3(%arg0: i32) -> (i32, i32) {
    %c0_i32 = arith.constant 0 : i32
    %c0_i32_0 = arith.constant 0 : i32
    %c0_i32_1 = arith.constant 0 : i32
    return %c0_i32, %c0_i32_0 : i32, i32
  }
  func.func @transform_4(%arg0: i32) -> (i32, i32) {
    %c0_i32 = arith.constant 0 : i32
    %c0_i32_0 = arith.constant 0 : i32
    %c0_i32_1 = arith.constant 0 : i32
    return %c0_i32, %c0_i32_0 : i32, i32
  }
  func.func @transform_5(%arg0: i32) -> (i32, i32, i32) {
    %c0_i32 = arith.constant 0 : i32
    %c0_i32_0 = arith.constant 0 : i32
    %c0_i32_1 = arith.constant 0 : i32
    %c0_i32_2 = arith.constant 0 : i32
    return %c0_i32, %c0_i32_0, %c0_i32_1 : i32, i32, i32
  }
}

module attributes {stable_mosaic.version = 11 : i64} {
  func.func @_encoder_kernel(%arg0: i32, %arg1: i32, %arg2: memref<1x5x128xf32, #tpu.memory_space<vmem>>, %arg3: memref<1x128x384xbf16, #tpu.memory_space<vmem>>, %arg4: memref<1x1x384xf32, #tpu.memory_space<vmem>>, %arg5: memref<1x4x32x128xbf16, #tpu.memory_space<vmem>>, %arg6: memref<1x1x128xf32, #tpu.memory_space<vmem>>, %arg7: memref<1x1x128xf32, #tpu.memory_space<vmem>>, %arg8: memref<1x1x128xf32, #tpu.memory_space<vmem>>, %arg9: memref<1x1x128xf32, #tpu.memory_space<vmem>>, %arg10: memref<1x1x128xf32, #tpu.memory_space<vmem>>, %arg11: memref<1x128x512xbf16, #tpu.memory_space<vmem>>, %arg12: memref<1x1x512xf32, #tpu.memory_space<vmem>>, %arg13: memref<1x512x128xbf16, #tpu.memory_space<vmem>>, %arg14: memref<1x1x128xf32, #tpu.memory_space<vmem>>, %arg15: memref<1x5x128xf32, #tpu.memory_space<vmem>>) attributes {dimension_semantics = [#tpu.dimension_semantics<parallel>, #tpu.dimension_semantics<arbitrary>], iteration_bounds = array<i64: 2, 2>, scalar_prefetch = 0 : i64, scratch_operands = 0 : i64, tpu.core_type = #tpu.core_type<tc>, window_params = [{transform_indices = @transform_0, window_bounds = array<i64: 1, 5, 128>}, {transform_indices = @transform_1, window_bounds = array<i64: 1, 128, 384>}, {transform_indices = @transform_2, window_bounds = array<i64: 1, 1, 384>}, {transform_indices = @transform_3, window_bounds = array<i64: 1, 4, 32, 128>}, {transform_indices = @transform_4, window_bounds = array<i64: 1, 1, 128>}, {transform_indices = @transform_5, window_bounds = array<i64: 1, 1, 128>}, {transform_indices = @transform_6, window_bounds = array<i64: 1, 1, 128>}, {transform_indices = @transform_7, window_bounds = array<i64: 1, 1, 128>}, {transform_indices = @transform_8, window_bounds = array<i64: 1, 1, 128>}, {transform_indices = @transform_9, window_bounds = array<i64: 1, 128, 512>}, {transform_indices = @transform_10, window_bounds = array<i64: 1, 1, 512>}, {transform_indices = @transform_11, window_bounds = array<i64: 1, 512, 128>}, {transform_indices = @transform_12, window_bounds = array<i64: 1, 1, 128>}, {transform_indices = @transform_13, window_bounds = array<i64: 1, 5, 128>}]} {
    %c0_i32 = arith.constant 0 : i32
    %0 = arith.cmpi eq, %arg1, %c0_i32 : i32
    %1 = arith.extui %0 : i1 to i32
    %c0_i32_0 = arith.constant 0 : i32
    %2 = arith.cmpi ne, %1, %c0_i32_0 : i32
    scf.if %2 {
      %c0_80 = arith.constant 0 : index
      %c0_81 = arith.constant 0 : index
      %c0_82 = arith.constant 0 : index
      %191 = vector.load %arg2[%c0_80, %c0_81, %c0_82] : memref<1x5x128xf32, #tpu.memory_space<vmem>>, vector<1x5x128xf32>
      %c0_83 = arith.constant 0 : index
      %c0_84 = arith.constant 0 : index
      %c0_85 = arith.constant 0 : index
      %192 = vector.load %arg15[%c0_83, %c0_84, %c0_85] : memref<1x5x128xf32, #tpu.memory_space<vmem>>, vector<1x5x128xf32>
      tpu.vector_store %arg15[%c0_83, %c0_84, %c0_85], %191 {strides = array<i32>} : memref<1x5x128xf32, #tpu.memory_space<vmem>>, vector<1x5x128xf32>,
    } else {
    }
    %c0 = arith.constant 0 : index
    %c0_1 = arith.constant 0 : index
    %c0_2 = arith.constant 0 : index
    %3 = vector.load %arg15[%c0, %c0_1, %c0_2] : memref<1x5x128xf32, #tpu.memory_space<vmem>>, vector<1x5x128xf32>
    %4 = vector.shape_cast %3 : vector<1x5x128xf32> to vector<5x128xf32>
    %c0_3 = arith.constant 0 : index
    %c0_4 = arith.constant 0 : index
    %c0_5 = arith.constant 0 : index
    %5 = vector.load %arg7[%c0_3, %c0_4, %c0_5] : memref<1x1x128xf32, #tpu.memory_space<vmem>>, vector<1x1x128xf32>
    %6 = vector.shape_cast %5 : vector<1x1x128xf32> to vector<1x128xf32>
    %c0_6 = arith.constant 0 : index
    %c0_7 = arith.constant 0 : index
    %c0_8 = arith.constant 0 : index
    %7 = vector.load %arg8[%c0_6, %c0_7, %c0_8] : memref<1x1x128xf32, #tpu.memory_space<vmem>>, vector<1x1x128xf32>
    %8 = vector.shape_cast %7 : vector<1x1x128xf32> to vector<1x128xf32>
    %cst = arith.constant dense<0.000000e+00> : vector<5xf32>
    %9 = vector.multi_reduction <add>, %4, %cst [1] : vector<5x128xf32> to vector<5xf32>
    %10 = vector.shape_cast %9 : vector<5xf32> to vector<5x1xf32>
    %cst_9 = arith.constant 1.280000e+02 : f32
    %11 = vector.broadcast %cst_9 : f32 to vector<5x1xf32>
    %12 = arith.divf %10, %11 : vector<5x1xf32>
    %13 = vector.broadcast %12 : vector<5x1xf32> to vector<5x128xf32>
    %14 = arith.subf %4, %13 : vector<5x128xf32>
    %15 = arith.mulf %14, %14 : vector<5x128xf32>
    %cst_10 = arith.constant dense<0.000000e+00> : vector<5xf32>
    %16 = vector.multi_reduction <add>, %15, %cst_10 [1] : vector<5x128xf32> to vector<5xf32>
    %17 = vector.shape_cast %16 : vector<5xf32> to vector<5x1xf32>
    %cst_11 = arith.constant 1.280000e+02 : f32
    %18 = vector.broadcast %cst_11 : f32 to vector<5x1xf32>
    %19 = arith.divf %17, %18 : vector<5x1xf32>
    %20 = vector.broadcast %12 : vector<5x1xf32> to vector<5x128xf32>
    %21 = arith.subf %4, %20 : vector<5x128xf32>
    %cst_12 = arith.constant 9.99999974E-6 : f32
    %22 = vector.broadcast %cst_12 : f32 to vector<5x1xf32>
    %23 = arith.addf %19, %22 : vector<5x1xf32>
    %24 = math.rsqrt %23 : vector<5x1xf32>
    %25 = vector.broadcast %24 : vector<5x1xf32> to vector<5x128xf32>
    %26 = arith.mulf %21, %25 : vector<5x128xf32>
    %27 = vector.broadcast %6 : vector<1x128xf32> to vector<5x128xf32>
    %28 = arith.mulf %26, %27 : vector<5x128xf32>
    %29 = vector.broadcast %8 : vector<1x128xf32> to vector<5x128xf32>
    %30 = arith.addf %28, %29 : vector<5x128xf32>
    %31 = arith.truncf %30 : vector<5x128xf32> to vector<5x128xbf16>
    %c0_13 = arith.constant 0 : index
    %c0_14 = arith.constant 0 : index
    %c0_15 = arith.constant 0 : index
    %32 = vector.load %arg3[%c0_13, %c0_14, %c0_15] : memref<1x128x384xbf16, #tpu.memory_space<vmem>>, vector<1x128x384xbf16>
    %33 = vector.shape_cast %32 : vector<1x128x384xbf16> to vector<128x384xbf16>
    %cst_16 = arith.constant dense<0.000000e+00> : vector<5x384xf32>
    %34 = tpu.matmul %31, %33, %cst_16 {dimension_numbers = #tpu.dot_dimension_numbers<[1], [0], [0], [1], [0, 0, 1, 1], [], []>} : vector<5x128xbf16>, vector<128x384xbf16>, vector<5x384xf32> -> vector<5x384xf32>
    %c0_17 = arith.constant 0 : index
    %c0_18 = arith.constant 0 : index
    %c0_19 = arith.constant 0 : index
    %35 = vector.load %arg4[%c0_17, %c0_18, %c0_19] : memref<1x1x384xf32, #tpu.memory_space<vmem>>, vector<1x1x384xf32>
    %36 = vector.shape_cast %35 : vector<1x1x384xf32> to vector<1x384xf32>
    %37 = vector.broadcast %36 : vector<1x384xf32> to vector<5x384xf32>
    %38 = arith.addf %34, %37 : vector<5x384xf32>
    %39 = arith.truncf %38 : vector<5x384xf32> to vector<5x384xbf16>
    %c0_20 = arith.constant 0 : index
    %c0_21 = arith.constant 0 : index
    %c0_22 = arith.constant 0 : index
    %c0_23 = arith.constant 0 : index
    %40 = vector.load %arg5[%c0_20, %c0_21, %c0_22, %c0_23] : memref<1x4x32x128xbf16, #tpu.memory_space<vmem>>, vector<1x4x32x128xbf16>
    %41 = vector.shape_cast %40 : vector<1x4x32x128xbf16> to vector<4x32x128xbf16>
    %cst_24 = arith.constant 0.000000e+00 : f32
    %42 = vector.broadcast %cst_24 : f32 to vector<5x128xf32>
    %43 = vector.extract_strided_slice %39 {offsets = [0, 0], sizes = [5, 32], strides = [1, 1]} : vector<5x384xbf16> to vector<5x32xbf16>
    %44 = vector.extract_strided_slice %39 {offsets = [0, 128], sizes = [5, 32], strides = [1, 1]} : vector<5x384xbf16> to vector<5x32xbf16>
    %45 = vector.extract_strided_slice %39 {offsets = [0, 256], sizes = [5, 32], strides = [1, 1]} : vector<5x384xbf16> to vector<5x32xbf16>
    %cst_25 = arith.constant dense<0.000000e+00> : vector<5x5xf32>
    %46 = tpu.matmul %43, %44, %cst_25 {dimension_numbers = #tpu.dot_dimension_numbers<[1], [1], [0], [0], [0, 0, 1, 0], [], []>} : vector<5x32xbf16>, vector<5x32xbf16>, vector<5x5xf32> -> vector<5x5xf32>
    %cst_26 = arith.constant dense<0xFF800000> : vector<5xf32>
    %47 = vector.multi_reduction <maximumf>, %46, %cst_26 [1] : vector<5x5xf32> to vector<5xf32>
    %48 = vector.shape_cast %47 : vector<5xf32> to vector<5x1xf32>
    %49 = vector.broadcast %48 : vector<5x1xf32> to vector<5x5xf32>
    %50 = arith.subf %46, %49 : vector<5x5xf32>
    %51 = math.exp %50 : vector<5x5xf32>
    %cst_27 = arith.constant dense<0.000000e+00> : vector<5xf32>
    %52 = vector.multi_reduction <add>, %51, %cst_27 [1] : vector<5x5xf32> to vector<5xf32>
    %53 = vector.shape_cast %52 : vector<5xf32> to vector<5x1xf32>
    %54 = tpu.reciprocal %53 {approx = true} : vector<5x1xf32> -> vector<5x1xf32>
    %55 = vector.broadcast %54 : vector<5x1xf32> to vector<5x5xf32>
    %56 = arith.mulf %51, %55 : vector<5x5xf32>
    %57 = arith.truncf %56 : vector<5x5xf32> to vector<5x5xbf16>
    %cst_28 = arith.constant dense<0.000000e+00> : vector<5x32xf32>
    %58 = tpu.matmul %57, %45, %cst_28 {dimension_numbers = #tpu.dot_dimension_numbers<[1], [0], [0], [1], [0, 0, 1, 1], [], []>} : vector<5x5xbf16>, vector<5x32xbf16>, vector<5x32xf32> -> vector<5x32xf32>
    %59 = arith.truncf %58 : vector<5x32xf32> to vector<5x32xbf16>
    %60 = vector.extract_strided_slice %41 {offsets = [0, 0, 0], sizes = [1, 32, 128], strides = [1, 1, 1]} : vector<4x32x128xbf16> to vector<1x32x128xbf16>
    %61 = vector.shape_cast %60 : vector<1x32x128xbf16> to vector<32x128xbf16>
    %cst_29 = arith.constant dense<0.000000e+00> : vector<5x128xf32>
    %62 = tpu.matmul %59, %61, %cst_29 {dimension_numbers = #tpu.dot_dimension_numbers<[1], [0], [0], [1], [0, 0, 1, 1], [], []>} : vector<5x32xbf16>, vector<32x128xbf16>, vector<5x128xf32> -> vector<5x128xf32>
    %63 = arith.addf %42, %62 : vector<5x128xf32>
    %64 = vector.extract_strided_slice %39 {offsets = [0, 32], sizes = [5, 32], strides = [1, 1]} : vector<5x384xbf16> to vector<5x32xbf16>
    %65 = vector.extract_strided_slice %39 {offsets = [0, 160], sizes = [5, 32], strides = [1, 1]} : vector<5x384xbf16> to vector<5x32xbf16>
    %66 = vector.extract_strided_slice %39 {offsets = [0, 288], sizes = [5, 32], strides = [1, 1]} : vector<5x384xbf16> to vector<5x32xbf16>
    %cst_30 = arith.constant dense<0.000000e+00> : vector<5x5xf32>
    %67 = tpu.matmul %64, %65, %cst_30 {dimension_numbers = #tpu.dot_dimension_numbers<[1], [1], [0], [0], [0, 0, 1, 0], [], []>} : vector<5x32xbf16>, vector<5x32xbf16>, vector<5x5xf32> -> vector<5x5xf32>
    %cst_31 = arith.constant dense<0xFF800000> : vector<5xf32>
    %68 = vector.multi_reduction <maximumf>, %67, %cst_31 [1] : vector<5x5xf32> to vector<5xf32>
    %69 = vector.shape_cast %68 : vector<5xf32> to vector<5x1xf32>
    %70 = vector.broadcast %69 : vector<5x1xf32> to vector<5x5xf32>
    %71 = arith.subf %67, %70 : vector<5x5xf32>
    %72 = math.exp %71 : vector<5x5xf32>
    %cst_32 = arith.constant dense<0.000000e+00> : vector<5xf32>
    %73 = vector.multi_reduction <add>, %72, %cst_32 [1] : vector<5x5xf32> to vector<5xf32>
    %74 = vector.shape_cast %73 : vector<5xf32> to vector<5x1xf32>
    %75 = tpu.reciprocal %74 {approx = true} : vector<5x1xf32> -> vector<5x1xf32>
    %76 = vector.broadcast %75 : vector<5x1xf32> to vector<5x5xf32>
    %77 = arith.mulf %72, %76 : vector<5x5xf32>
    %78 = arith.truncf %77 : vector<5x5xf32> to vector<5x5xbf16>
    %cst_33 = arith.constant dense<0.000000e+00> : vector<5x32xf32>
    %79 = tpu.matmul %78, %66, %cst_33 {dimension_numbers = #tpu.dot_dimension_numbers<[1], [0], [0], [1], [0, 0, 1, 1], [], []>} : vector<5x5xbf16>, vector<5x32xbf16>, vector<5x32xf32> -> vector<5x32xf32>
    %80 = arith.truncf %79 : vector<5x32xf32> to vector<5x32xbf16>
    %81 = vector.extract_strided_slice %41 {offsets = [1, 0, 0], sizes = [1, 32, 128], strides = [1, 1, 1]} : vector<4x32x128xbf16> to vector<1x32x128xbf16>
    %82 = vector.shape_cast %81 : vector<1x32x128xbf16> to vector<32x128xbf16>
    %cst_34 = arith.constant dense<0.000000e+00> : vector<5x128xf32>
    %83 = tpu.matmul %80, %82, %cst_34 {dimension_numbers = #tpu.dot_dimension_numbers<[1], [0], [0], [1], [0, 0, 1, 1], [], []>} : vector<5x32xbf16>, vector<32x128xbf16>, vector<5x128xf32> -> vector<5x128xf32>
    %84 = arith.addf %63, %83 : vector<5x128xf32>
    %85 = vector.extract_strided_slice %39 {offsets = [0, 64], sizes = [5, 32], strides = [1, 1]} : vector<5x384xbf16> to vector<5x32xbf16>
    %86 = vector.extract_strided_slice %39 {offsets = [0, 192], sizes = [5, 32], strides = [1, 1]} : vector<5x384xbf16> to vector<5x32xbf16>
    %87 = vector.extract_strided_slice %39 {offsets = [0, 320], sizes = [5, 32], strides = [1, 1]} : vector<5x384xbf16> to vector<5x32xbf16>
    %cst_35 = arith.constant dense<0.000000e+00> : vector<5x5xf32>
    %88 = tpu.matmul %85, %86, %cst_35 {dimension_numbers = #tpu.dot_dimension_numbers<[1], [1], [0], [0], [0, 0, 1, 0], [], []>} : vector<5x32xbf16>, vector<5x32xbf16>, vector<5x5xf32> -> vector<5x5xf32>
    %cst_36 = arith.constant dense<0xFF800000> : vector<5xf32>
    %89 = vector.multi_reduction <maximumf>, %88, %cst_36 [1] : vector<5x5xf32> to vector<5xf32>
    %90 = vector.shape_cast %89 : vector<5xf32> to vector<5x1xf32>
    %91 = vector.broadcast %90 : vector<5x1xf32> to vector<5x5xf32>
    %92 = arith.subf %88, %91 : vector<5x5xf32>
    %93 = math.exp %92 : vector<5x5xf32>
    %cst_37 = arith.constant dense<0.000000e+00> : vector<5xf32>
    %94 = vector.multi_reduction <add>, %93, %cst_37 [1] : vector<5x5xf32> to vector<5xf32>
    %95 = vector.shape_cast %94 : vector<5xf32> to vector<5x1xf32>
    %96 = tpu.reciprocal %95 {approx = true} : vector<5x1xf32> -> vector<5x1xf32>
    %97 = vector.broadcast %96 : vector<5x1xf32> to vector<5x5xf32>
    %98 = arith.mulf %93, %97 : vector<5x5xf32>
    %99 = arith.truncf %98 : vector<5x5xf32> to vector<5x5xbf16>
    %cst_38 = arith.constant dense<0.000000e+00> : vector<5x32xf32>
    %100 = tpu.matmul %99, %87, %cst_38 {dimension_numbers = #tpu.dot_dimension_numbers<[1], [0], [0], [1], [0, 0, 1, 1], [], []>} : vector<5x5xbf16>, vector<5x32xbf16>, vector<5x32xf32> -> vector<5x32xf32>
    %101 = arith.truncf %100 : vector<5x32xf32> to vector<5x32xbf16>
    %102 = vector.extract_strided_slice %41 {offsets = [2, 0, 0], sizes = [1, 32, 128], strides = [1, 1, 1]} : vector<4x32x128xbf16> to vector<1x32x128xbf16>
    %103 = vector.shape_cast %102 : vector<1x32x128xbf16> to vector<32x128xbf16>
    %cst_39 = arith.constant dense<0.000000e+00> : vector<5x128xf32>
    %104 = tpu.matmul %101, %103, %cst_39 {dimension_numbers = #tpu.dot_dimension_numbers<[1], [0], [0], [1], [0, 0, 1, 1], [], []>} : vector<5x32xbf16>, vector<32x128xbf16>, vector<5x128xf32> -> vector<5x128xf32>
    %105 = arith.addf %84, %104 : vector<5x128xf32>
    %106 = vector.extract_strided_slice %39 {offsets = [0, 96], sizes = [5, 32], strides = [1, 1]} : vector<5x384xbf16> to vector<5x32xbf16>
    %107 = vector.extract_strided_slice %39 {offsets = [0, 224], sizes = [5, 32], strides = [1, 1]} : vector<5x384xbf16> to vector<5x32xbf16>
    %108 = vector.extract_strided_slice %39 {offsets = [0, 352], sizes = [5, 32], strides = [1, 1]} : vector<5x384xbf16> to vector<5x32xbf16>
    %cst_40 = arith.constant dense<0.000000e+00> : vector<5x5xf32>
    %109 = tpu.matmul %106, %107, %cst_40 {dimension_numbers = #tpu.dot_dimension_numbers<[1], [1], [0], [0], [0, 0, 1, 0], [], []>} : vector<5x32xbf16>, vector<5x32xbf16>, vector<5x5xf32> -> vector<5x5xf32>
    %cst_41 = arith.constant dense<0xFF800000> : vector<5xf32>
    %110 = vector.multi_reduction <maximumf>, %109, %cst_41 [1] : vector<5x5xf32> to vector<5xf32>
    %111 = vector.shape_cast %110 : vector<5xf32> to vector<5x1xf32>
    %112 = vector.broadcast %111 : vector<5x1xf32> to vector<5x5xf32>
    %113 = arith.subf %109, %112 : vector<5x5xf32>
    %114 = math.exp %113 : vector<5x5xf32>
    %cst_42 = arith.constant dense<0.000000e+00> : vector<5xf32>
    %115 = vector.multi_reduction <add>, %114, %cst_42 [1] : vector<5x5xf32> to vector<5xf32>
    %116 = vector.shape_cast %115 : vector<5xf32> to vector<5x1xf32>
    %117 = tpu.reciprocal %116 {approx = true} : vector<5x1xf32> -> vector<5x1xf32>
    %118 = vector.broadcast %117 : vector<5x1xf32> to vector<5x5xf32>
    %119 = arith.mulf %114, %118 : vector<5x5xf32>
    %120 = arith.truncf %119 : vector<5x5xf32> to vector<5x5xbf16>
    %cst_43 = arith.constant dense<0.000000e+00> : vector<5x32xf32>
    %121 = tpu.matmul %120, %108, %cst_43 {dimension_numbers = #tpu.dot_dimension_numbers<[1], [0], [0], [1], [0, 0, 1, 1], [], []>} : vector<5x5xbf16>, vector<5x32xbf16>, vector<5x32xf32> -> vector<5x32xf32>
    %122 = arith.truncf %121 : vector<5x32xf32> to vector<5x32xbf16>
    %123 = vector.extract_strided_slice %41 {offsets = [3, 0, 0], sizes = [1, 32, 128], strides = [1, 1, 1]} : vector<4x32x128xbf16> to vector<1x32x128xbf16>
    %124 = vector.shape_cast %123 : vector<1x32x128xbf16> to vector<32x128xbf16>
    %cst_44 = arith.constant dense<0.000000e+00> : vector<5x128xf32>
    %125 = tpu.matmul %122, %124, %cst_44 {dimension_numbers = #tpu.dot_dimension_numbers<[1], [0], [0], [1], [0, 0, 1, 1], [], []>} : vector<5x32xbf16>, vector<32x128xbf16>, vector<5x128xf32> -> vector<5x128xf32>
    %126 = arith.addf %105, %125 : vector<5x128xf32>
    %127 = arith.addf %4, %126 : vector<5x128xf32>
    %c0_45 = arith.constant 0 : index
    %c0_46 = arith.constant 0 : index
    %c0_47 = arith.constant 0 : index
    %128 = vector.load %arg6[%c0_45, %c0_46, %c0_47] : memref<1x1x128xf32, #tpu.memory_space<vmem>>, vector<1x1x128xf32>
    %129 = vector.shape_cast %128 : vector<1x1x128xf32> to vector<1x128xf32>
    %130 = vector.broadcast %129 : vector<1x128xf32> to vector<5x128xf32>
    %131 = arith.addf %127, %130 : vector<5x128xf32>
    %c0_48 = arith.constant 0 : index
    %c0_49 = arith.constant 0 : index
    %c0_50 = arith.constant 0 : index
    %132 = vector.load %arg9[%c0_48, %c0_49, %c0_50] : memref<1x1x128xf32, #tpu.memory_space<vmem>>, vector<1x1x128xf32>
    %133 = vector.shape_cast %132 : vector<1x1x128xf32> to vector<1x128xf32>
    %c0_51 = arith.constant 0 : index
    %c0_52 = arith.constant 0 : index
    %c0_53 = arith.constant 0 : index
    %134 = vector.load %arg10[%c0_51, %c0_52, %c0_53] : memref<1x1x128xf32, #tpu.memory_space<vmem>>, vector<1x1x128xf32>
    %135 = vector.shape_cast %134 : vector<1x1x128xf32> to vector<1x128xf32>
    %cst_54 = arith.constant dense<0.000000e+00> : vector<5xf32>
    %136 = vector.multi_reduction <add>, %131, %cst_54 [1] : vector<5x128xf32> to vector<5xf32>
    %137 = vector.shape_cast %136 : vector<5xf32> to vector<5x1xf32>
    %cst_55 = arith.constant 1.280000e+02 : f32
    %138 = vector.broadcast %cst_55 : f32 to vector<5x1xf32>
    %139 = arith.divf %137, %138 : vector<5x1xf32>
    %140 = vector.broadcast %139 : vector<5x1xf32> to vector<5x128xf32>
    %141 = arith.subf %131, %140 : vector<5x128xf32>
    %142 = arith.mulf %141, %141 : vector<5x128xf32>
    %cst_56 = arith.constant dense<0.000000e+00> : vector<5xf32>
    %143 = vector.multi_reduction <add>, %142, %cst_56 [1] : vector<5x128xf32> to vector<5xf32>
    %144 = vector.shape_cast %143 : vector<5xf32> to vector<5x1xf32>
    %cst_57 = arith.constant 1.280000e+02 : f32
    %145 = vector.broadcast %cst_57 : f32 to vector<5x1xf32>
    %146 = arith.divf %144, %145 : vector<5x1xf32>
    %147 = vector.broadcast %139 : vector<5x1xf32> to vector<5x128xf32>
    %148 = arith.subf %131, %147 : vector<5x128xf32>
    %cst_58 = arith.constant 9.99999974E-6 : f32
    %149 = vector.broadcast %cst_58 : f32 to vector<5x1xf32>
    %150 = arith.addf %146, %149 : vector<5x1xf32>
    %151 = math.rsqrt %150 : vector<5x1xf32>
    %152 = vector.broadcast %151 : vector<5x1xf32> to vector<5x128xf32>
    %153 = arith.mulf %148, %152 : vector<5x128xf32>
    %154 = vector.broadcast %133 : vector<1x128xf32> to vector<5x128xf32>
    %155 = arith.mulf %153, %154 : vector<5x128xf32>
    %156 = vector.broadcast %135 : vector<1x128xf32> to vector<5x128xf32>
    %157 = arith.addf %155, %156 : vector<5x128xf32>
    %158 = arith.truncf %157 : vector<5x128xf32> to vector<5x128xbf16>
    %c0_59 = arith.constant 0 : index
    %c0_60 = arith.constant 0 : index
    %c0_61 = arith.constant 0 : index
    %159 = vector.load %arg11[%c0_59, %c0_60, %c0_61] : memref<1x128x512xbf16, #tpu.memory_space<vmem>>, vector<1x128x512xbf16>
    %160 = vector.shape_cast %159 : vector<1x128x512xbf16> to vector<128x512xbf16>
    %cst_62 = arith.constant dense<0.000000e+00> : vector<5x512xf32>
    %161 = tpu.matmul %158, %160, %cst_62 {dimension_numbers = #tpu.dot_dimension_numbers<[1], [0], [0], [1], [0, 0, 1, 1], [], []>} : vector<5x128xbf16>, vector<128x512xbf16>, vector<5x512xf32> -> vector<5x512xf32>
    %c0_63 = arith.constant 0 : index
    %c0_64 = arith.constant 0 : index
    %c0_65 = arith.constant 0 : index
    %162 = vector.load %arg12[%c0_63, %c0_64, %c0_65] : memref<1x1x512xf32, #tpu.memory_space<vmem>>, vector<1x1x512xf32>
    %163 = vector.shape_cast %162 : vector<1x1x512xf32> to vector<1x512xf32>
    %164 = vector.broadcast %163 : vector<1x512xf32> to vector<5x512xf32>
    %165 = arith.addf %161, %164 : vector<5x512xf32>
    %166 = arith.mulf %165, %165 : vector<5x512xf32>
    %167 = arith.mulf %165, %166 : vector<5x512xf32>
    %cst_66 = arith.constant 4.471500e-02 : f32
    %168 = vector.broadcast %cst_66 : f32 to vector<5x512xf32>
    %169 = arith.mulf %168, %167 : vector<5x512xf32>
    %170 = arith.addf %165, %169 : vector<5x512xf32>
    %cst_67 = arith.constant 0.797884583 : f32
    %171 = vector.broadcast %cst_67 : f32 to vector<5x512xf32>
    %172 = arith.mulf %171, %170 : vector<5x512xf32>
    %173 = math.tanh %172 : vector<5x512xf32>
    %cst_68 = arith.constant 1.000000e+00 : f32
    %174 = vector.broadcast %cst_68 : f32 to vector<5x512xf32>
    %175 = arith.addf %174, %173 : vector<5x512xf32>
    %cst_69 = arith.constant 5.000000e-01 : f32
    %176 = vector.broadcast %cst_69 : f32 to vector<5x512xf32>
    %177 = arith.mulf %176, %175 : vector<5x512xf32>
    %178 = arith.mulf %165, %177 : vector<5x512xf32>
    %179 = arith.truncf %178 : vector<5x512xf32> to vector<5x512xbf16>
    %c0_70 = arith.constant 0 : index
    %c0_71 = arith.constant 0 : index
    %c0_72 = arith.constant 0 : index
    %180 = vector.load %arg13[%c0_70, %c0_71, %c0_72] : memref<1x512x128xbf16, #tpu.memory_space<vmem>>, vector<1x512x128xbf16>
    %181 = vector.shape_cast %180 : vector<1x512x128xbf16> to vector<512x128xbf16>
    %cst_73 = arith.constant dense<0.000000e+00> : vector<5x128xf32>
    %182 = tpu.matmul %179, %181, %cst_73 {dimension_numbers = #tpu.dot_dimension_numbers<[1], [0], [0], [1], [0, 0, 1, 1], [], []>} : vector<5x512xbf16>, vector<512x128xbf16>, vector<5x128xf32> -> vector<5x128xf32>
    %c0_74 = arith.constant 0 : index
    %c0_75 = arith.constant 0 : index
    %c0_76 = arith.constant 0 : index
    %183 = vector.load %arg14[%c0_74, %c0_75, %c0_76] : memref<1x1x128xf32, #tpu.memory_space<vmem>>, vector<1x1x128xf32>
    %184 = vector.shape_cast %183 : vector<1x1x128xf32> to vector<1x128xf32>
    %185 = vector.broadcast %184 : vector<1x128xf32> to vector<5x128xf32>
    %186 = arith.addf %182, %185 : vector<5x128xf32>
    %187 = arith.addf %131, %186 : vector<5x128xf32>
    %c0_77 = arith.constant 0 : index
    %c0_78 = arith.constant 0 : index
    %c0_79 = arith.constant 0 : index
    %188 = vector.load %arg15[%c0_77, %c0_78, %c0_79] : memref<1x5x128xf32, #tpu.memory_space<vmem>>, vector<1x5x128xf32>
    %189 = vector.shape_cast %188 : vector<1x5x128xf32> to vector<5x128xf32>
    %190 = vector.shape_cast %187 : vector<5x128xf32> to vector<1x5x128xf32>
    tpu.vector_store %arg15[%c0_77, %c0_78, %c0_79], %190 {strides = array<i32>} : memref<1x5x128xf32, #tpu.memory_space<vmem>>, vector<1x5x128xf32>,
    return
  }
  func.func @transform_0(%arg0: i32, %arg1: i32) -> (i32, i32, i32) {
    %c0_i32 = arith.constant 0 : i32
    %c0_i32_0 = arith.constant 0 : i32
    %c0_i32_1 = arith.constant 0 : i32
    return %arg0, %c0_i32, %c0_i32_0 : i32, i32, i32
  }
  func.func @transform_1(%arg0: i32, %arg1: i32) -> (i32, i32, i32) {
    %c0_i32 = arith.constant 0 : i32
    %c0_i32_0 = arith.constant 0 : i32
    %c0_i32_1 = arith.constant 0 : i32
    return %arg1, %c0_i32, %c0_i32_0 : i32, i32, i32
  }
  func.func @transform_2(%arg0: i32, %arg1: i32) -> (i32, i32, i32) {
    %c0_i32 = arith.constant 0 : i32
    %c0_i32_0 = arith.constant 0 : i32
    %c0_i32_1 = arith.constant 0 : i32
    return %arg1, %c0_i32, %c0_i32_0 : i32, i32, i32
  }
  func.func @transform_3(%arg0: i32, %arg1: i32) -> (i32, i32, i32, i32) {
    %c0_i32 = arith.constant 0 : i32
    %c0_i32_0 = arith.constant 0 : i32
    %c0_i32_1 = arith.constant 0 : i32
    %c0_i32_2 = arith.constant 0 : i32
    return %arg1, %c0_i32, %c0_i32_0, %c0_i32_1 : i32, i32, i32, i32
  }
  func.func @transform_4(%arg0: i32, %arg1: i32) -> (i32, i32, i32) {
    %c0_i32 = arith.constant 0 : i32
    %c0_i32_0 = arith.constant 0 : i32
    %c0_i32_1 = arith.constant 0 : i32
    return %arg1, %c0_i32, %c0_i32_0 : i32, i32, i32
  }
  func.func @transform_5(%arg0: i32, %arg1: i32) -> (i32, i32, i32) {
    %c0_i32 = arith.constant 0 : i32
    %c0_i32_0 = arith.constant 0 : i32
    %c0_i32_1 = arith.constant 0 : i32
    return %arg1, %c0_i32, %c0_i32_0 : i32, i32, i32
  }
  func.func @transform_6(%arg0: i32, %arg1: i32) -> (i32, i32, i32) {
    %c0_i32 = arith.constant 0 : i32
    %c0_i32_0 = arith.constant 0 : i32
    %c0_i32_1 = arith.constant 0 : i32
    return %arg1, %c0_i32, %c0_i32_0 : i32, i32, i32
  }
  func.func @transform_7(%arg0: i32, %arg1: i32) -> (i32, i32, i32) {
    %c0_i32 = arith.constant 0 : i32
    %c0_i32_0 = arith.constant 0 : i32
    %c0_i32_1 = arith.constant 0 : i32
    return %arg1, %c0_i32, %c0_i32_0 : i32, i32, i32
  }
  func.func @transform_8(%arg0: i32, %arg1: i32) -> (i32, i32, i32) {
    %c0_i32 = arith.constant 0 : i32
    %c0_i32_0 = arith.constant 0 : i32
    %c0_i32_1 = arith.constant 0 : i32
    return %arg1, %c0_i32, %c0_i32_0 : i32, i32, i32
  }
  func.func @transform_9(%arg0: i32, %arg1: i32) -> (i32, i32, i32) {
    %c0_i32 = arith.constant 0 : i32
    %c0_i32_0 = arith.constant 0 : i32
    %c0_i32_1 = arith.constant 0 : i32
    return %arg1, %c0_i32, %c0_i32_0 : i32, i32, i32
  }
  func.func @transform_10(%arg0: i32, %arg1: i32) -> (i32, i32, i32) {
    %c0_i32 = arith.constant 0 : i32
    %c0_i32_0 = arith.constant 0 : i32
    %c0_i32_1 = arith.constant 0 : i32
    return %arg1, %c0_i32, %c0_i32_0 : i32, i32, i32
  }
  func.func @transform_11(%arg0: i32, %arg1: i32) -> (i32, i32, i32) {
    %c0_i32 = arith.constant 0 : i32
    %c0_i32_0 = arith.constant 0 : i32
    %c0_i32_1 = arith.constant 0 : i32
    return %arg1, %c0_i32, %c0_i32_0 : i32, i32, i32
  }
  func.func @transform_12(%arg0: i32, %arg1: i32) -> (i32, i32, i32) {
    %c0_i32 = arith.constant 0 : i32
    %c0_i32_0 = arith.constant 0 : i32
    %c0_i32_1 = arith.constant 0 : i32
    return %arg1, %c0_i32, %c0_i32_0 : i32, i32, i32
  }
  func.func @transform_13(%arg0: i32, %arg1: i32) -> (i32, i32, i32) {
    %c0_i32 = arith.constant 0 : i32
    %c0_i32_0 = arith.constant 0 : i32
    %c0_i32_1 = arith.constant 0 : i32
    return %arg0, %c0_i32, %c0_i32_0 : i32, i32, i32
  }
}

module attributes {stable_mosaic.version = 11 : i64} {
  func.func @_clip_head_kernel(%arg0: i32, %arg1: memref<2x5x128xf32, #tpu.memory_space<vmem>>, %arg2: memref<2x8x128xf32, #tpu.memory_space<vmem>>, %arg3: memref<1x128xf32, #tpu.memory_space<vmem>>, %arg4: memref<1x128xf32, #tpu.memory_space<vmem>>, %arg5: memref<1x128xf32, #tpu.memory_space<vmem>>, %arg6: memref<1x128xf32, #tpu.memory_space<vmem>>, %arg7: memref<1x1xf32, #tpu.memory_space<smem>>, %arg8: memref<1x1xf32, #tpu.memory_space<vmem>>) attributes {dimension_semantics = [#tpu.dimension_semantics<arbitrary>], iteration_bounds = array<i64: 1>, scalar_prefetch = 0 : i64, scratch_operands = 0 : i64, tpu.core_type = #tpu.core_type<tc>, window_params = [{pipeline_mode = #tpu.pipeline_mode<synchronous>, transform_indices = @transform_0, window_bounds = array<i64: 2, 5, 128>}, {pipeline_mode = #tpu.pipeline_mode<synchronous>, transform_indices = @transform_1, window_bounds = array<i64: 2, 8, 128>}, {pipeline_mode = #tpu.pipeline_mode<synchronous>, transform_indices = @transform_2, window_bounds = array<i64: 1, 128>}, {pipeline_mode = #tpu.pipeline_mode<synchronous>, transform_indices = @transform_3, window_bounds = array<i64: 1, 128>}, {pipeline_mode = #tpu.pipeline_mode<synchronous>, transform_indices = @transform_4, window_bounds = array<i64: 1, 128>}, {pipeline_mode = #tpu.pipeline_mode<synchronous>, transform_indices = @transform_5, window_bounds = array<i64: 1, 128>}, {transform_indices = @transform_6, window_bounds = array<i64: 1, 1>}, {pipeline_mode = #tpu.pipeline_mode<synchronous>, transform_indices = @transform_7, window_bounds = array<i64: 1, 1>}]} {
    %c0 = arith.constant 0 : index
    %c0_0 = arith.constant 0 : index
    %c0_1 = arith.constant 0 : index
    %0 = vector.load %arg1[%c0, %c0_0, %c0_1] : memref<2x5x128xf32, #tpu.memory_space<vmem>>, vector<2x5x128xf32>
    %1 = vector.extract_strided_slice %0 {offsets = [0, 0, 0], sizes = [2, 1, 128], strides = [1, 1, 1]} : vector<2x5x128xf32> to vector<2x1x128xf32>
    %2 = vector.shape_cast %1 : vector<2x1x128xf32> to vector<2x128xf32>
    %c0_2 = arith.constant 0 : index
    %c0_3 = arith.constant 0 : index
    %3 = vector.load %arg3[%c0_2, %c0_3] : memref<1x128xf32, #tpu.memory_space<vmem>>, vector<1x128xf32>
    %c0_4 = arith.constant 0 : index
    %c0_5 = arith.constant 0 : index
    %4 = vector.load %arg4[%c0_4, %c0_5] : memref<1x128xf32, #tpu.memory_space<vmem>>, vector<1x128xf32>
    %cst = arith.constant dense<0.000000e+00> : vector<2xf32>
    %5 = vector.multi_reduction <add>, %2, %cst [1] : vector<2x128xf32> to vector<2xf32>
    %6 = vector.shape_cast %5 : vector<2xf32> to vector<2x1xf32>
    %cst_6 = arith.constant 1.280000e+02 : f32
    %7 = vector.broadcast %cst_6 : f32 to vector<2x1xf32>
    %8 = arith.divf %6, %7 : vector<2x1xf32>
    %9 = vector.broadcast %8 : vector<2x1xf32> to vector<2x128xf32>
    %10 = arith.subf %2, %9 : vector<2x128xf32>
    %11 = arith.mulf %10, %10 : vector<2x128xf32>
    %cst_7 = arith.constant dense<0.000000e+00> : vector<2xf32>
    %12 = vector.multi_reduction <add>, %11, %cst_7 [1] : vector<2x128xf32> to vector<2xf32>
    %13 = vector.shape_cast %12 : vector<2xf32> to vector<2x1xf32>
    %cst_8 = arith.constant 1.280000e+02 : f32
    %14 = vector.broadcast %cst_8 : f32 to vector<2x1xf32>
    %15 = arith.divf %13, %14 : vector<2x1xf32>
    %16 = vector.broadcast %8 : vector<2x1xf32> to vector<2x128xf32>
    %17 = arith.subf %2, %16 : vector<2x128xf32>
    %cst_9 = arith.constant 9.99999974E-6 : f32
    %18 = vector.broadcast %cst_9 : f32 to vector<2x1xf32>
    %19 = arith.addf %15, %18 : vector<2x1xf32>
    %20 = math.rsqrt %19 : vector<2x1xf32>
    %21 = vector.broadcast %20 : vector<2x1xf32> to vector<2x128xf32>
    %22 = arith.mulf %17, %21 : vector<2x128xf32>
    %23 = vector.broadcast %3 : vector<1x128xf32> to vector<2x128xf32>
    %24 = arith.mulf %22, %23 : vector<2x128xf32>
    %25 = vector.broadcast %4 : vector<1x128xf32> to vector<2x128xf32>
    %26 = arith.addf %24, %25 : vector<2x128xf32>
    %c0_10 = arith.constant 0 : index
    %c0_11 = arith.constant 0 : index
    %c0_12 = arith.constant 0 : index
    %27 = vector.load %arg2[%c0_10, %c0_11, %c0_12] : memref<2x8x128xf32, #tpu.memory_space<vmem>>, vector<2x8x128xf32>
    %28 = vector.extract_strided_slice %27 {offsets = [0, 0, 0], sizes = [2, 1, 128], strides = [1, 1, 1]} : vector<2x8x128xf32> to vector<2x1x128xf32>
    %29 = vector.shape_cast %28 : vector<2x1x128xf32> to vector<2x128xf32>
    %c0_13 = arith.constant 0 : index
    %c0_14 = arith.constant 0 : index
    %30 = vector.load %arg5[%c0_13, %c0_14] : memref<1x128xf32, #tpu.memory_space<vmem>>, vector<1x128xf32>
    %c0_15 = arith.constant 0 : index
    %c0_16 = arith.constant 0 : index
    %31 = vector.load %arg6[%c0_15, %c0_16] : memref<1x128xf32, #tpu.memory_space<vmem>>, vector<1x128xf32>
    %cst_17 = arith.constant dense<0.000000e+00> : vector<2xf32>
    %32 = vector.multi_reduction <add>, %29, %cst_17 [1] : vector<2x128xf32> to vector<2xf32>
    %33 = vector.shape_cast %32 : vector<2xf32> to vector<2x1xf32>
    %cst_18 = arith.constant 1.280000e+02 : f32
    %34 = vector.broadcast %cst_18 : f32 to vector<2x1xf32>
    %35 = arith.divf %33, %34 : vector<2x1xf32>
    %36 = vector.broadcast %35 : vector<2x1xf32> to vector<2x128xf32>
    %37 = arith.subf %29, %36 : vector<2x128xf32>
    %38 = arith.mulf %37, %37 : vector<2x128xf32>
    %cst_19 = arith.constant dense<0.000000e+00> : vector<2xf32>
    %39 = vector.multi_reduction <add>, %38, %cst_19 [1] : vector<2x128xf32> to vector<2xf32>
    %40 = vector.shape_cast %39 : vector<2xf32> to vector<2x1xf32>
    %cst_20 = arith.constant 1.280000e+02 : f32
    %41 = vector.broadcast %cst_20 : f32 to vector<2x1xf32>
    %42 = arith.divf %40, %41 : vector<2x1xf32>
    %43 = vector.broadcast %35 : vector<2x1xf32> to vector<2x128xf32>
    %44 = arith.subf %29, %43 : vector<2x128xf32>
    %cst_21 = arith.constant 9.99999974E-6 : f32
    %45 = vector.broadcast %cst_21 : f32 to vector<2x1xf32>
    %46 = arith.addf %42, %45 : vector<2x1xf32>
    %47 = math.rsqrt %46 : vector<2x1xf32>
    %48 = vector.broadcast %47 : vector<2x1xf32> to vector<2x128xf32>
    %49 = arith.mulf %44, %48 : vector<2x128xf32>
    %50 = vector.broadcast %30 : vector<1x128xf32> to vector<2x128xf32>
    %51 = arith.mulf %49, %50 : vector<2x128xf32>
    %52 = vector.broadcast %31 : vector<1x128xf32> to vector<2x128xf32>
    %53 = arith.addf %51, %52 : vector<2x128xf32>
    %c0_22 = arith.constant 0 : index
    %c0_23 = arith.constant 0 : index
    %54 = memref.load %arg7[%c0_22, %c0_23] : memref<1x1xf32, #tpu.memory_space<smem>>
    %55 = math.exp %54 : f32
    %cst_24 = arith.constant dense<0.000000e+00> : vector<2x2xf32>
    %56 = tpu.matmul %53, %26, %cst_24 {dimension_numbers = #tpu.dot_dimension_numbers<[1], [1], [0], [0], [0, 0, 1, 0], [], []>} : vector<2x128xf32>, vector<2x128xf32>, vector<2x2xf32> -> vector<2x2xf32>
    %57 = vector.broadcast %55 : f32 to vector<2x2xf32>
    %58 = arith.mulf %56, %57 : vector<2x2xf32>
    %59 = tpu.iota {dimensions = array<i32: 0>} : vector<2x2xi32>
    %60 = tpu.iota {dimensions = array<i32: 1>} : vector<2x2xi32>
    %61 = arith.cmpi eq, %59, %60 : vector<2x2xi32>
    %62 = arith.extui %61 : vector<2x2xi1> to vector<2x2xi32>
    %63 = arith.sitofp %62 : vector<2x2xi32> to vector<2x2xf32>
    %cst_25 = arith.constant dense<0xFF800000> : vector<2xf32>
    %64 = vector.multi_reduction <maximumf>, %58, %cst_25 [1] : vector<2x2xf32> to vector<2xf32>
    %65 = vector.shape_cast %64 : vector<2xf32> to vector<2x1xf32>
    %66 = vector.broadcast %65 : vector<2x1xf32> to vector<2x2xf32>
    %67 = arith.subf %58, %66 : vector<2x2xf32>
    %68 = math.exp %67 : vector<2x2xf32>
    %cst_26 = arith.constant dense<0.000000e+00> : vector<2xf32>
    %69 = vector.multi_reduction <add>, %68, %cst_26 [1] : vector<2x2xf32> to vector<2xf32>
    %70 = vector.shape_cast %69 : vector<2xf32> to vector<2x1xf32>
    %71 = math.log %70 : vector<2x1xf32>
    %72 = arith.addf %71, %65 : vector<2x1xf32>
    %73 = arith.mulf %58, %63 : vector<2x2xf32>
    %cst_27 = arith.constant dense<0.000000e+00> : vector<2xf32>
    %74 = vector.multi_reduction <add>, %73, %cst_27 [1] : vector<2x2xf32> to vector<2xf32>
    %75 = vector.shape_cast %74 : vector<2xf32> to vector<2x1xf32>
    %76 = arith.subf %72, %75 : vector<2x1xf32>
    %77 = vector.shape_cast %76 : vector<2x1xf32> to vector<1x2x1xf32>
    %cst_28 = arith.constant dense<0.000000e+00> : vector<1xf32>
    %78 = vector.multi_reduction <add>, %77, %cst_28 [1, 2] : vector<1x2x1xf32> to vector<1xf32>
    %79 = vector.shape_cast %78 : vector<1xf32> to vector<1x1x1xf32>
    %80 = vector.extract %79[0, 0, 0] : f32 from vector<1x1x1xf32>
    %cst_29 = arith.constant 2.000000e+00 : f32
    %81 = arith.divf %80, %cst_29 : f32
    %82 = tpu.transpose %58, [1, 0] : vector<2x2xf32> -> vector<2x2xf32>
    %cst_30 = arith.constant dense<0xFF800000> : vector<2xf32>
    %83 = vector.multi_reduction <maximumf>, %82, %cst_30 [1] : vector<2x2xf32> to vector<2xf32>
    %84 = vector.shape_cast %83 : vector<2xf32> to vector<2x1xf32>
    %85 = vector.broadcast %84 : vector<2x1xf32> to vector<2x2xf32>
    %86 = arith.subf %82, %85 : vector<2x2xf32>
    %87 = math.exp %86 : vector<2x2xf32>
    %cst_31 = arith.constant dense<0.000000e+00> : vector<2xf32>
    %88 = vector.multi_reduction <add>, %87, %cst_31 [1] : vector<2x2xf32> to vector<2xf32>
    %89 = vector.shape_cast %88 : vector<2xf32> to vector<2x1xf32>
    %90 = math.log %89 : vector<2x1xf32>
    %91 = arith.addf %90, %84 : vector<2x1xf32>
    %92 = arith.mulf %82, %63 : vector<2x2xf32>
    %cst_32 = arith.constant dense<0.000000e+00> : vector<2xf32>
    %93 = vector.multi_reduction <add>, %92, %cst_32 [1] : vector<2x2xf32> to vector<2xf32>
    %94 = vector.shape_cast %93 : vector<2xf32> to vector<2x1xf32>
    %95 = arith.subf %91, %94 : vector<2x1xf32>
    %96 = vector.shape_cast %95 : vector<2x1xf32> to vector<1x2x1xf32>
    %cst_33 = arith.constant dense<0.000000e+00> : vector<1xf32>
    %97 = vector.multi_reduction <add>, %96, %cst_33 [1, 2] : vector<1x2x1xf32> to vector<1xf32>
    %98 = vector.shape_cast %97 : vector<1xf32> to vector<1x1x1xf32>
    %99 = vector.extract %98[0, 0, 0] : f32 from vector<1x1x1xf32>
    %cst_34 = arith.constant 2.000000e+00 : f32
    %100 = arith.divf %99, %cst_34 : f32
    %101 = arith.addf %81, %100 : f32
    %cst_35 = arith.constant 5.000000e-01 : f32
    %102 = arith.mulf %101, %cst_35 : f32
    %103 = vector.broadcast %102 : f32 to vector<1x1xf32>
    %c0_36 = arith.constant 0 : index
    %c0_37 = arith.constant 0 : index
    %104 = vector.load %arg8[%c0_36, %c0_37] : memref<1x1xf32, #tpu.memory_space<vmem>>, vector<1x1xf32>
    tpu.vector_store %arg8[%c0_36, %c0_37], %103 {strides = array<i32>} : memref<1x1xf32, #tpu.memory_space<vmem>>, vector<1x1xf32>,
    return
  }
  func.func @transform_0(%arg0: i32) -> (i32, i32, i32) {
    %c0_i32 = arith.constant 0 : i32
    %c0_i32_0 = arith.constant 0 : i32
    %c0_i32_1 = arith.constant 0 : i32
    %c0_i32_2 = arith.constant 0 : i32
    return %c0_i32, %c0_i32_0, %c0_i32_1 : i32, i32, i32
  }
  func.func @transform_1(%arg0: i32) -> (i32, i32, i32) {
    %c0_i32 = arith.constant 0 : i32
    %c0_i32_0 = arith.constant 0 : i32
    %c0_i32_1 = arith.constant 0 : i32
    %c0_i32_2 = arith.constant 0 : i32
    return %c0_i32, %c0_i32_0, %c0_i32_1 : i32, i32, i32
  }
  func.func @transform_2(%arg0: i32) -> (i32, i32) {
    %c0_i32 = arith.constant 0 : i32
    %c0_i32_0 = arith.constant 0 : i32
    %c0_i32_1 = arith.constant 0 : i32
    return %c0_i32, %c0_i32_0 : i32, i32
  }
  func.func @transform_3(%arg0: i32) -> (i32, i32) {
    %c0_i32 = arith.constant 0 : i32
    %c0_i32_0 = arith.constant 0 : i32
    %c0_i32_1 = arith.constant 0 : i32
    return %c0_i32, %c0_i32_0 : i32, i32
  }
  func.func @transform_4(%arg0: i32) -> (i32, i32) {
    %c0_i32 = arith.constant 0 : i32
    %c0_i32_0 = arith.constant 0 : i32
    %c0_i32_1 = arith.constant 0 : i32
    return %c0_i32, %c0_i32_0 : i32, i32
  }
  func.func @transform_5(%arg0: i32) -> (i32, i32) {
    %c0_i32 = arith.constant 0 : i32
    %c0_i32_0 = arith.constant 0 : i32
    %c0_i32_1 = arith.constant 0 : i32
    return %c0_i32, %c0_i32_0 : i32, i32
  }
  func.func @transform_6(%arg0: i32) -> (i32, i32) {
    %c0_i32 = arith.constant 0 : i32
    %c0_i32_0 = arith.constant 0 : i32
    %c0_i32_1 = arith.constant 0 : i32
    return %c0_i32, %c0_i32_0 : i32, i32
  }
  func.func @transform_7(%arg0: i32) -> (i32, i32) {
    %c0_i32 = arith.constant 0 : i32
    %c0_i32_0 = arith.constant 0 : i32
    %c0_i32_1 = arith.constant 0 : i32
    return %c0_i32, %c0_i32_0 : i32, i32
  }
}

module attributes {stable_mosaic.version = 11 : i64} {
  func.func @_encoder_kernel(%arg0: i32, %arg1: i32, %arg2: memref<1x8x128xf32, #tpu.memory_space<vmem>>, %arg3: memref<1x1x8xf32, #tpu.memory_space<vmem>>, %arg4: memref<1x128x384xbf16, #tpu.memory_space<vmem>>, %arg5: memref<1x1x384xf32, #tpu.memory_space<vmem>>, %arg6: memref<1x4x32x128xbf16, #tpu.memory_space<vmem>>, %arg7: memref<1x1x128xf32, #tpu.memory_space<vmem>>, %arg8: memref<1x1x128xf32, #tpu.memory_space<vmem>>, %arg9: memref<1x1x128xf32, #tpu.memory_space<vmem>>, %arg10: memref<1x1x128xf32, #tpu.memory_space<vmem>>, %arg11: memref<1x1x128xf32, #tpu.memory_space<vmem>>, %arg12: memref<1x128x512xbf16, #tpu.memory_space<vmem>>, %arg13: memref<1x1x512xf32, #tpu.memory_space<vmem>>, %arg14: memref<1x512x128xbf16, #tpu.memory_space<vmem>>, %arg15: memref<1x1x128xf32, #tpu.memory_space<vmem>>, %arg16: memref<1x8x128xf32, #tpu.memory_space<vmem>>) attributes {dimension_semantics = [#tpu.dimension_semantics<parallel>, #tpu.dimension_semantics<arbitrary>], iteration_bounds = array<i64: 2, 2>, scalar_prefetch = 0 : i64, scratch_operands = 0 : i64, tpu.core_type = #tpu.core_type<tc>, window_params = [{transform_indices = @transform_0, window_bounds = array<i64: 1, 8, 128>}, {transform_indices = @transform_1, window_bounds = array<i64: 1, 1, 8>}, {transform_indices = @transform_2, window_bounds = array<i64: 1, 128, 384>}, {transform_indices = @transform_3, window_bounds = array<i64: 1, 1, 384>}, {transform_indices = @transform_4, window_bounds = array<i64: 1, 4, 32, 128>}, {transform_indices = @transform_5, window_bounds = array<i64: 1, 1, 128>}, {transform_indices = @transform_6, window_bounds = array<i64: 1, 1, 128>}, {transform_indices = @transform_7, window_bounds = array<i64: 1, 1, 128>}, {transform_indices = @transform_8, window_bounds = array<i64: 1, 1, 128>}, {transform_indices = @transform_9, window_bounds = array<i64: 1, 1, 128>}, {transform_indices = @transform_10, window_bounds = array<i64: 1, 128, 512>}, {transform_indices = @transform_11, window_bounds = array<i64: 1, 1, 512>}, {transform_indices = @transform_12, window_bounds = array<i64: 1, 512, 128>}, {transform_indices = @transform_13, window_bounds = array<i64: 1, 1, 128>}, {transform_indices = @transform_14, window_bounds = array<i64: 1, 8, 128>}]} {
    %c0_i32 = arith.constant 0 : i32
    %0 = arith.cmpi eq, %arg1, %c0_i32 : i32
    %1 = arith.extui %0 : i1 to i32
    %c0_i32_0 = arith.constant 0 : i32
    %2 = arith.cmpi ne, %1, %c0_i32_0 : i32
    scf.if %2 {
      %c0_85 = arith.constant 0 : index
      %c0_86 = arith.constant 0 : index
      %c0_87 = arith.constant 0 : index
      %205 = vector.load %arg2[%c0_85, %c0_86, %c0_87] : memref<1x8x128xf32, #tpu.memory_space<vmem>>, vector<1x8x128xf32>
      %c0_88 = arith.constant 0 : index
      %c0_89 = arith.constant 0 : index
      %c0_90 = arith.constant 0 : index
      %206 = vector.load %arg16[%c0_88, %c0_89, %c0_90] : memref<1x8x128xf32, #tpu.memory_space<vmem>>, vector<1x8x128xf32>
      tpu.vector_store %arg16[%c0_88, %c0_89, %c0_90], %205 {strides = array<i32>} : memref<1x8x128xf32, #tpu.memory_space<vmem>>, vector<1x8x128xf32>,
    } else {
    }
    %c0 = arith.constant 0 : index
    %c0_1 = arith.constant 0 : index
    %c0_2 = arith.constant 0 : index
    %3 = vector.load %arg16[%c0, %c0_1, %c0_2] : memref<1x8x128xf32, #tpu.memory_space<vmem>>, vector<1x8x128xf32>
    %4 = vector.shape_cast %3 : vector<1x8x128xf32> to vector<8x128xf32>
    %c0_3 = arith.constant 0 : index
    %c0_4 = arith.constant 0 : index
    %c0_5 = arith.constant 0 : index
    %5 = vector.load %arg8[%c0_3, %c0_4, %c0_5] : memref<1x1x128xf32, #tpu.memory_space<vmem>>, vector<1x1x128xf32>
    %6 = vector.shape_cast %5 : vector<1x1x128xf32> to vector<1x128xf32>
    %c0_6 = arith.constant 0 : index
    %c0_7 = arith.constant 0 : index
    %c0_8 = arith.constant 0 : index
    %7 = vector.load %arg9[%c0_6, %c0_7, %c0_8] : memref<1x1x128xf32, #tpu.memory_space<vmem>>, vector<1x1x128xf32>
    %8 = vector.shape_cast %7 : vector<1x1x128xf32> to vector<1x128xf32>
    %cst = arith.constant dense<0.000000e+00> : vector<8xf32>
    %9 = vector.multi_reduction <add>, %4, %cst [1] : vector<8x128xf32> to vector<8xf32>
    %10 = vector.shape_cast %9 : vector<8xf32> to vector<8x1xf32>
    %cst_9 = arith.constant 1.280000e+02 : f32
    %11 = vector.broadcast %cst_9 : f32 to vector<8x1xf32>
    %12 = arith.divf %10, %11 : vector<8x1xf32>
    %13 = vector.broadcast %12 : vector<8x1xf32> to vector<8x128xf32>
    %14 = arith.subf %4, %13 : vector<8x128xf32>
    %15 = arith.mulf %14, %14 : vector<8x128xf32>
    %cst_10 = arith.constant dense<0.000000e+00> : vector<8xf32>
    %16 = vector.multi_reduction <add>, %15, %cst_10 [1] : vector<8x128xf32> to vector<8xf32>
    %17 = vector.shape_cast %16 : vector<8xf32> to vector<8x1xf32>
    %cst_11 = arith.constant 1.280000e+02 : f32
    %18 = vector.broadcast %cst_11 : f32 to vector<8x1xf32>
    %19 = arith.divf %17, %18 : vector<8x1xf32>
    %20 = vector.broadcast %12 : vector<8x1xf32> to vector<8x128xf32>
    %21 = arith.subf %4, %20 : vector<8x128xf32>
    %cst_12 = arith.constant 9.99999974E-6 : f32
    %22 = vector.broadcast %cst_12 : f32 to vector<8x1xf32>
    %23 = arith.addf %19, %22 : vector<8x1xf32>
    %24 = math.rsqrt %23 : vector<8x1xf32>
    %25 = vector.broadcast %24 : vector<8x1xf32> to vector<8x128xf32>
    %26 = arith.mulf %21, %25 : vector<8x128xf32>
    %27 = vector.broadcast %6 : vector<1x128xf32> to vector<8x128xf32>
    %28 = arith.mulf %26, %27 : vector<8x128xf32>
    %29 = vector.broadcast %8 : vector<1x128xf32> to vector<8x128xf32>
    %30 = arith.addf %28, %29 : vector<8x128xf32>
    %31 = arith.truncf %30 : vector<8x128xf32> to vector<8x128xbf16>
    %c0_13 = arith.constant 0 : index
    %c0_14 = arith.constant 0 : index
    %c0_15 = arith.constant 0 : index
    %32 = vector.load %arg4[%c0_13, %c0_14, %c0_15] : memref<1x128x384xbf16, #tpu.memory_space<vmem>>, vector<1x128x384xbf16>
    %33 = vector.shape_cast %32 : vector<1x128x384xbf16> to vector<128x384xbf16>
    %cst_16 = arith.constant dense<0.000000e+00> : vector<8x384xf32>
    %34 = tpu.matmul %31, %33, %cst_16 {dimension_numbers = #tpu.dot_dimension_numbers<[1], [0], [0], [1], [0, 0, 1, 1], [], []>} : vector<8x128xbf16>, vector<128x384xbf16>, vector<8x384xf32> -> vector<8x384xf32>
    %c0_17 = arith.constant 0 : index
    %c0_18 = arith.constant 0 : index
    %c0_19 = arith.constant 0 : index
    %35 = vector.load %arg5[%c0_17, %c0_18, %c0_19] : memref<1x1x384xf32, #tpu.memory_space<vmem>>, vector<1x1x384xf32>
    %36 = vector.shape_cast %35 : vector<1x1x384xf32> to vector<1x384xf32>
    %37 = vector.broadcast %36 : vector<1x384xf32> to vector<8x384xf32>
    %38 = arith.addf %34, %37 : vector<8x384xf32>
    %39 = arith.truncf %38 : vector<8x384xf32> to vector<8x384xbf16>
    %c0_20 = arith.constant 0 : index
    %c0_21 = arith.constant 0 : index
    %c0_22 = arith.constant 0 : index
    %40 = vector.load %arg3[%c0_20, %c0_21, %c0_22] : memref<1x1x8xf32, #tpu.memory_space<vmem>>, vector<1x1x8xf32>
    %41 = vector.shape_cast %40 : vector<1x1x8xf32> to vector<1x8xf32>
    %cst_23 = arith.constant 1.000000e+00 : f32
    %42 = vector.broadcast %cst_23 : f32 to vector<1x8xf32>
    %43 = arith.subf %42, %41 : vector<1x8xf32>
    %cst_24 = arith.constant -1.000000e+09 : f32
    %44 = vector.broadcast %cst_24 : f32 to vector<1x8xf32>
    %45 = arith.mulf %43, %44 : vector<1x8xf32>
    %c0_25 = arith.constant 0 : index
    %c0_26 = arith.constant 0 : index
    %c0_27 = arith.constant 0 : index
    %c0_28 = arith.constant 0 : index
    %46 = vector.load %arg6[%c0_25, %c0_26, %c0_27, %c0_28] : memref<1x4x32x128xbf16, #tpu.memory_space<vmem>>, vector<1x4x32x128xbf16>
    %47 = vector.shape_cast %46 : vector<1x4x32x128xbf16> to vector<4x32x128xbf16>
    %cst_29 = arith.constant 0.000000e+00 : f32
    %48 = vector.broadcast %cst_29 : f32 to vector<8x128xf32>
    %49 = vector.extract_strided_slice %39 {offsets = [0, 0], sizes = [8, 32], strides = [1, 1]} : vector<8x384xbf16> to vector<8x32xbf16>
    %50 = vector.extract_strided_slice %39 {offsets = [0, 128], sizes = [8, 32], strides = [1, 1]} : vector<8x384xbf16> to vector<8x32xbf16>
    %51 = vector.extract_strided_slice %39 {offsets = [0, 256], sizes = [8, 32], strides = [1, 1]} : vector<8x384xbf16> to vector<8x32xbf16>
    %cst_30 = arith.constant dense<0.000000e+00> : vector<8x8xf32>
    %52 = tpu.matmul %49, %50, %cst_30 {dimension_numbers = #tpu.dot_dimension_numbers<[1], [1], [0], [0], [0, 0, 1, 0], [], []>} : vector<8x32xbf16>, vector<8x32xbf16>, vector<8x8xf32> -> vector<8x8xf32>
    %53 = vector.broadcast %45 : vector<1x8xf32> to vector<8x8xf32>
    %54 = arith.addf %52, %53 : vector<8x8xf32>
    %cst_31 = arith.constant dense<0xFF800000> : vector<8xf32>
    %55 = vector.multi_reduction <maximumf>, %54, %cst_31 [1] : vector<8x8xf32> to vector<8xf32>
    %56 = vector.shape_cast %55 : vector<8xf32> to vector<8x1xf32>
    %57 = vector.broadcast %56 : vector<8x1xf32> to vector<8x8xf32>
    %58 = arith.subf %54, %57 : vector<8x8xf32>
    %59 = math.exp %58 : vector<8x8xf32>
    %cst_32 = arith.constant dense<0.000000e+00> : vector<8xf32>
    %60 = vector.multi_reduction <add>, %59, %cst_32 [1] : vector<8x8xf32> to vector<8xf32>
    %61 = vector.shape_cast %60 : vector<8xf32> to vector<8x1xf32>
    %62 = tpu.reciprocal %61 {approx = true} : vector<8x1xf32> -> vector<8x1xf32>
    %63 = vector.broadcast %62 : vector<8x1xf32> to vector<8x8xf32>
    %64 = arith.mulf %59, %63 : vector<8x8xf32>
    %65 = arith.truncf %64 : vector<8x8xf32> to vector<8x8xbf16>
    %cst_33 = arith.constant dense<0.000000e+00> : vector<8x32xf32>
    %66 = tpu.matmul %65, %51, %cst_33 {dimension_numbers = #tpu.dot_dimension_numbers<[1], [0], [0], [1], [0, 0, 1, 1], [], []>} : vector<8x8xbf16>, vector<8x32xbf16>, vector<8x32xf32> -> vector<8x32xf32>
    %67 = arith.truncf %66 : vector<8x32xf32> to vector<8x32xbf16>
    %68 = vector.extract_strided_slice %47 {offsets = [0, 0, 0], sizes = [1, 32, 128], strides = [1, 1, 1]} : vector<4x32x128xbf16> to vector<1x32x128xbf16>
    %69 = vector.shape_cast %68 : vector<1x32x128xbf16> to vector<32x128xbf16>
    %cst_34 = arith.constant dense<0.000000e+00> : vector<8x128xf32>
    %70 = tpu.matmul %67, %69, %cst_34 {dimension_numbers = #tpu.dot_dimension_numbers<[1], [0], [0], [1], [0, 0, 1, 1], [], []>} : vector<8x32xbf16>, vector<32x128xbf16>, vector<8x128xf32> -> vector<8x128xf32>
    %71 = arith.addf %48, %70 : vector<8x128xf32>
    %72 = vector.extract_strided_slice %39 {offsets = [0, 32], sizes = [8, 32], strides = [1, 1]} : vector<8x384xbf16> to vector<8x32xbf16>
    %73 = vector.extract_strided_slice %39 {offsets = [0, 160], sizes = [8, 32], strides = [1, 1]} : vector<8x384xbf16> to vector<8x32xbf16>
    %74 = vector.extract_strided_slice %39 {offsets = [0, 288], sizes = [8, 32], strides = [1, 1]} : vector<8x384xbf16> to vector<8x32xbf16>
    %cst_35 = arith.constant dense<0.000000e+00> : vector<8x8xf32>
    %75 = tpu.matmul %72, %73, %cst_35 {dimension_numbers = #tpu.dot_dimension_numbers<[1], [1], [0], [0], [0, 0, 1, 0], [], []>} : vector<8x32xbf16>, vector<8x32xbf16>, vector<8x8xf32> -> vector<8x8xf32>
    %76 = vector.broadcast %45 : vector<1x8xf32> to vector<8x8xf32>
    %77 = arith.addf %75, %76 : vector<8x8xf32>
    %cst_36 = arith.constant dense<0xFF800000> : vector<8xf32>
    %78 = vector.multi_reduction <maximumf>, %77, %cst_36 [1] : vector<8x8xf32> to vector<8xf32>
    %79 = vector.shape_cast %78 : vector<8xf32> to vector<8x1xf32>
    %80 = vector.broadcast %79 : vector<8x1xf32> to vector<8x8xf32>
    %81 = arith.subf %77, %80 : vector<8x8xf32>
    %82 = math.exp %81 : vector<8x8xf32>
    %cst_37 = arith.constant dense<0.000000e+00> : vector<8xf32>
    %83 = vector.multi_reduction <add>, %82, %cst_37 [1] : vector<8x8xf32> to vector<8xf32>
    %84 = vector.shape_cast %83 : vector<8xf32> to vector<8x1xf32>
    %85 = tpu.reciprocal %84 {approx = true} : vector<8x1xf32> -> vector<8x1xf32>
    %86 = vector.broadcast %85 : vector<8x1xf32> to vector<8x8xf32>
    %87 = arith.mulf %82, %86 : vector<8x8xf32>
    %88 = arith.truncf %87 : vector<8x8xf32> to vector<8x8xbf16>
    %cst_38 = arith.constant dense<0.000000e+00> : vector<8x32xf32>
    %89 = tpu.matmul %88, %74, %cst_38 {dimension_numbers = #tpu.dot_dimension_numbers<[1], [0], [0], [1], [0, 0, 1, 1], [], []>} : vector<8x8xbf16>, vector<8x32xbf16>, vector<8x32xf32> -> vector<8x32xf32>
    %90 = arith.truncf %89 : vector<8x32xf32> to vector<8x32xbf16>
    %91 = vector.extract_strided_slice %47 {offsets = [1, 0, 0], sizes = [1, 32, 128], strides = [1, 1, 1]} : vector<4x32x128xbf16> to vector<1x32x128xbf16>
    %92 = vector.shape_cast %91 : vector<1x32x128xbf16> to vector<32x128xbf16>
    %cst_39 = arith.constant dense<0.000000e+00> : vector<8x128xf32>
    %93 = tpu.matmul %90, %92, %cst_39 {dimension_numbers = #tpu.dot_dimension_numbers<[1], [0], [0], [1], [0, 0, 1, 1], [], []>} : vector<8x32xbf16>, vector<32x128xbf16>, vector<8x128xf32> -> vector<8x128xf32>
    %94 = arith.addf %71, %93 : vector<8x128xf32>
    %95 = vector.extract_strided_slice %39 {offsets = [0, 64], sizes = [8, 32], strides = [1, 1]} : vector<8x384xbf16> to vector<8x32xbf16>
    %96 = vector.extract_strided_slice %39 {offsets = [0, 192], sizes = [8, 32], strides = [1, 1]} : vector<8x384xbf16> to vector<8x32xbf16>
    %97 = vector.extract_strided_slice %39 {offsets = [0, 320], sizes = [8, 32], strides = [1, 1]} : vector<8x384xbf16> to vector<8x32xbf16>
    %cst_40 = arith.constant dense<0.000000e+00> : vector<8x8xf32>
    %98 = tpu.matmul %95, %96, %cst_40 {dimension_numbers = #tpu.dot_dimension_numbers<[1], [1], [0], [0], [0, 0, 1, 0], [], []>} : vector<8x32xbf16>, vector<8x32xbf16>, vector<8x8xf32> -> vector<8x8xf32>
    %99 = vector.broadcast %45 : vector<1x8xf32> to vector<8x8xf32>
    %100 = arith.addf %98, %99 : vector<8x8xf32>
    %cst_41 = arith.constant dense<0xFF800000> : vector<8xf32>
    %101 = vector.multi_reduction <maximumf>, %100, %cst_41 [1] : vector<8x8xf32> to vector<8xf32>
    %102 = vector.shape_cast %101 : vector<8xf32> to vector<8x1xf32>
    %103 = vector.broadcast %102 : vector<8x1xf32> to vector<8x8xf32>
    %104 = arith.subf %100, %103 : vector<8x8xf32>
    %105 = math.exp %104 : vector<8x8xf32>
    %cst_42 = arith.constant dense<0.000000e+00> : vector<8xf32>
    %106 = vector.multi_reduction <add>, %105, %cst_42 [1] : vector<8x8xf32> to vector<8xf32>
    %107 = vector.shape_cast %106 : vector<8xf32> to vector<8x1xf32>
    %108 = tpu.reciprocal %107 {approx = true} : vector<8x1xf32> -> vector<8x1xf32>
    %109 = vector.broadcast %108 : vector<8x1xf32> to vector<8x8xf32>
    %110 = arith.mulf %105, %109 : vector<8x8xf32>
    %111 = arith.truncf %110 : vector<8x8xf32> to vector<8x8xbf16>
    %cst_43 = arith.constant dense<0.000000e+00> : vector<8x32xf32>
    %112 = tpu.matmul %111, %97, %cst_43 {dimension_numbers = #tpu.dot_dimension_numbers<[1], [0], [0], [1], [0, 0, 1, 1], [], []>} : vector<8x8xbf16>, vector<8x32xbf16>, vector<8x32xf32> -> vector<8x32xf32>
    %113 = arith.truncf %112 : vector<8x32xf32> to vector<8x32xbf16>
    %114 = vector.extract_strided_slice %47 {offsets = [2, 0, 0], sizes = [1, 32, 128], strides = [1, 1, 1]} : vector<4x32x128xbf16> to vector<1x32x128xbf16>
    %115 = vector.shape_cast %114 : vector<1x32x128xbf16> to vector<32x128xbf16>
    %cst_44 = arith.constant dense<0.000000e+00> : vector<8x128xf32>
    %116 = tpu.matmul %113, %115, %cst_44 {dimension_numbers = #tpu.dot_dimension_numbers<[1], [0], [0], [1], [0, 0, 1, 1], [], []>} : vector<8x32xbf16>, vector<32x128xbf16>, vector<8x128xf32> -> vector<8x128xf32>
    %117 = arith.addf %94, %116 : vector<8x128xf32>
    %118 = vector.extract_strided_slice %39 {offsets = [0, 96], sizes = [8, 32], strides = [1, 1]} : vector<8x384xbf16> to vector<8x32xbf16>
    %119 = vector.extract_strided_slice %39 {offsets = [0, 224], sizes = [8, 32], strides = [1, 1]} : vector<8x384xbf16> to vector<8x32xbf16>
    %120 = vector.extract_strided_slice %39 {offsets = [0, 352], sizes = [8, 32], strides = [1, 1]} : vector<8x384xbf16> to vector<8x32xbf16>
    %cst_45 = arith.constant dense<0.000000e+00> : vector<8x8xf32>
    %121 = tpu.matmul %118, %119, %cst_45 {dimension_numbers = #tpu.dot_dimension_numbers<[1], [1], [0], [0], [0, 0, 1, 0], [], []>} : vector<8x32xbf16>, vector<8x32xbf16>, vector<8x8xf32> -> vector<8x8xf32>
    %122 = vector.broadcast %45 : vector<1x8xf32> to vector<8x8xf32>
    %123 = arith.addf %121, %122 : vector<8x8xf32>
    %cst_46 = arith.constant dense<0xFF800000> : vector<8xf32>
    %124 = vector.multi_reduction <maximumf>, %123, %cst_46 [1] : vector<8x8xf32> to vector<8xf32>
    %125 = vector.shape_cast %124 : vector<8xf32> to vector<8x1xf32>
    %126 = vector.broadcast %125 : vector<8x1xf32> to vector<8x8xf32>
    %127 = arith.subf %123, %126 : vector<8x8xf32>
    %128 = math.exp %127 : vector<8x8xf32>
    %cst_47 = arith.constant dense<0.000000e+00> : vector<8xf32>
    %129 = vector.multi_reduction <add>, %128, %cst_47 [1] : vector<8x8xf32> to vector<8xf32>
    %130 = vector.shape_cast %129 : vector<8xf32> to vector<8x1xf32>
    %131 = tpu.reciprocal %130 {approx = true} : vector<8x1xf32> -> vector<8x1xf32>
    %132 = vector.broadcast %131 : vector<8x1xf32> to vector<8x8xf32>
    %133 = arith.mulf %128, %132 : vector<8x8xf32>
    %134 = arith.truncf %133 : vector<8x8xf32> to vector<8x8xbf16>
    %cst_48 = arith.constant dense<0.000000e+00> : vector<8x32xf32>
    %135 = tpu.matmul %134, %120, %cst_48 {dimension_numbers = #tpu.dot_dimension_numbers<[1], [0], [0], [1], [0, 0, 1, 1], [], []>} : vector<8x8xbf16>, vector<8x32xbf16>, vector<8x32xf32> -> vector<8x32xf32>
    %136 = arith.truncf %135 : vector<8x32xf32> to vector<8x32xbf16>
    %137 = vector.extract_strided_slice %47 {offsets = [3, 0, 0], sizes = [1, 32, 128], strides = [1, 1, 1]} : vector<4x32x128xbf16> to vector<1x32x128xbf16>
    %138 = vector.shape_cast %137 : vector<1x32x128xbf16> to vector<32x128xbf16>
    %cst_49 = arith.constant dense<0.000000e+00> : vector<8x128xf32>
    %139 = tpu.matmul %136, %138, %cst_49 {dimension_numbers = #tpu.dot_dimension_numbers<[1], [0], [0], [1], [0, 0, 1, 1], [], []>} : vector<8x32xbf16>, vector<32x128xbf16>, vector<8x128xf32> -> vector<8x128xf32>
    %140 = arith.addf %117, %139 : vector<8x128xf32>
    %141 = arith.addf %4, %140 : vector<8x128xf32>
    %c0_50 = arith.constant 0 : index
    %c0_51 = arith.constant 0 : index
    %c0_52 = arith.constant 0 : index
    %142 = vector.load %arg7[%c0_50, %c0_51, %c0_52] : memref<1x1x128xf32, #tpu.memory_space<vmem>>, vector<1x1x128xf32>
    %143 = vector.shape_cast %142 : vector<1x1x128xf32> to vector<1x128xf32>
    %144 = vector.broadcast %143 : vector<1x128xf32> to vector<8x128xf32>
    %145 = arith.addf %141, %144 : vector<8x128xf32>
    %c0_53 = arith.constant 0 : index
    %c0_54 = arith.constant 0 : index
    %c0_55 = arith.constant 0 : index
    %146 = vector.load %arg10[%c0_53, %c0_54, %c0_55] : memref<1x1x128xf32, #tpu.memory_space<vmem>>, vector<1x1x128xf32>
    %147 = vector.shape_cast %146 : vector<1x1x128xf32> to vector<1x128xf32>
    %c0_56 = arith.constant 0 : index
    %c0_57 = arith.constant 0 : index
    %c0_58 = arith.constant 0 : index
    %148 = vector.load %arg11[%c0_56, %c0_57, %c0_58] : memref<1x1x128xf32, #tpu.memory_space<vmem>>, vector<1x1x128xf32>
    %149 = vector.shape_cast %148 : vector<1x1x128xf32> to vector<1x128xf32>
    %cst_59 = arith.constant dense<0.000000e+00> : vector<8xf32>
    %150 = vector.multi_reduction <add>, %145, %cst_59 [1] : vector<8x128xf32> to vector<8xf32>
    %151 = vector.shape_cast %150 : vector<8xf32> to vector<8x1xf32>
    %cst_60 = arith.constant 1.280000e+02 : f32
    %152 = vector.broadcast %cst_60 : f32 to vector<8x1xf32>
    %153 = arith.divf %151, %152 : vector<8x1xf32>
    %154 = vector.broadcast %153 : vector<8x1xf32> to vector<8x128xf32>
    %155 = arith.subf %145, %154 : vector<8x128xf32>
    %156 = arith.mulf %155, %155 : vector<8x128xf32>
    %cst_61 = arith.constant dense<0.000000e+00> : vector<8xf32>
    %157 = vector.multi_reduction <add>, %156, %cst_61 [1] : vector<8x128xf32> to vector<8xf32>
    %158 = vector.shape_cast %157 : vector<8xf32> to vector<8x1xf32>
    %cst_62 = arith.constant 1.280000e+02 : f32
    %159 = vector.broadcast %cst_62 : f32 to vector<8x1xf32>
    %160 = arith.divf %158, %159 : vector<8x1xf32>
    %161 = vector.broadcast %153 : vector<8x1xf32> to vector<8x128xf32>
    %162 = arith.subf %145, %161 : vector<8x128xf32>
    %cst_63 = arith.constant 9.99999974E-6 : f32
    %163 = vector.broadcast %cst_63 : f32 to vector<8x1xf32>
    %164 = arith.addf %160, %163 : vector<8x1xf32>
    %165 = math.rsqrt %164 : vector<8x1xf32>
    %166 = vector.broadcast %165 : vector<8x1xf32> to vector<8x128xf32>
    %167 = arith.mulf %162, %166 : vector<8x128xf32>
    %168 = vector.broadcast %147 : vector<1x128xf32> to vector<8x128xf32>
    %169 = arith.mulf %167, %168 : vector<8x128xf32>
    %170 = vector.broadcast %149 : vector<1x128xf32> to vector<8x128xf32>
    %171 = arith.addf %169, %170 : vector<8x128xf32>
    %172 = arith.truncf %171 : vector<8x128xf32> to vector<8x128xbf16>
    %c0_64 = arith.constant 0 : index
    %c0_65 = arith.constant 0 : index
    %c0_66 = arith.constant 0 : index
    %173 = vector.load %arg12[%c0_64, %c0_65, %c0_66] : memref<1x128x512xbf16, #tpu.memory_space<vmem>>, vector<1x128x512xbf16>
    %174 = vector.shape_cast %173 : vector<1x128x512xbf16> to vector<128x512xbf16>
    %cst_67 = arith.constant dense<0.000000e+00> : vector<8x512xf32>
    %175 = tpu.matmul %172, %174, %cst_67 {dimension_numbers = #tpu.dot_dimension_numbers<[1], [0], [0], [1], [0, 0, 1, 1], [], []>} : vector<8x128xbf16>, vector<128x512xbf16>, vector<8x512xf32> -> vector<8x512xf32>
    %c0_68 = arith.constant 0 : index
    %c0_69 = arith.constant 0 : index
    %c0_70 = arith.constant 0 : index
    %176 = vector.load %arg13[%c0_68, %c0_69, %c0_70] : memref<1x1x512xf32, #tpu.memory_space<vmem>>, vector<1x1x512xf32>
    %177 = vector.shape_cast %176 : vector<1x1x512xf32> to vector<1x512xf32>
    %178 = vector.broadcast %177 : vector<1x512xf32> to vector<8x512xf32>
    %179 = arith.addf %175, %178 : vector<8x512xf32>
    %180 = arith.mulf %179, %179 : vector<8x512xf32>
    %181 = arith.mulf %179, %180 : vector<8x512xf32>
    %cst_71 = arith.constant 4.471500e-02 : f32
    %182 = vector.broadcast %cst_71 : f32 to vector<8x512xf32>
    %183 = arith.mulf %182, %181 : vector<8x512xf32>
    %184 = arith.addf %179, %183 : vector<8x512xf32>
    %cst_72 = arith.constant 0.797884583 : f32
    %185 = vector.broadcast %cst_72 : f32 to vector<8x512xf32>
    %186 = arith.mulf %185, %184 : vector<8x512xf32>
    %187 = math.tanh %186 : vector<8x512xf32>
    %cst_73 = arith.constant 1.000000e+00 : f32
    %188 = vector.broadcast %cst_73 : f32 to vector<8x512xf32>
    %189 = arith.addf %188, %187 : vector<8x512xf32>
    %cst_74 = arith.constant 5.000000e-01 : f32
    %190 = vector.broadcast %cst_74 : f32 to vector<8x512xf32>
    %191 = arith.mulf %190, %189 : vector<8x512xf32>
    %192 = arith.mulf %179, %191 : vector<8x512xf32>
    %193 = arith.truncf %192 : vector<8x512xf32> to vector<8x512xbf16>
    %c0_75 = arith.constant 0 : index
    %c0_76 = arith.constant 0 : index
    %c0_77 = arith.constant 0 : index
    %194 = vector.load %arg14[%c0_75, %c0_76, %c0_77] : memref<1x512x128xbf16, #tpu.memory_space<vmem>>, vector<1x512x128xbf16>
    %195 = vector.shape_cast %194 : vector<1x512x128xbf16> to vector<512x128xbf16>
    %cst_78 = arith.constant dense<0.000000e+00> : vector<8x128xf32>
    %196 = tpu.matmul %193, %195, %cst_78 {dimension_numbers = #tpu.dot_dimension_numbers<[1], [0], [0], [1], [0, 0, 1, 1], [], []>} : vector<8x512xbf16>, vector<512x128xbf16>, vector<8x128xf32> -> vector<8x128xf32>
    %c0_79 = arith.constant 0 : index
    %c0_80 = arith.constant 0 : index
    %c0_81 = arith.constant 0 : index
    %197 = vector.load %arg15[%c0_79, %c0_80, %c0_81] : memref<1x1x128xf32, #tpu.memory_space<vmem>>, vector<1x1x128xf32>
    %198 = vector.shape_cast %197 : vector<1x1x128xf32> to vector<1x128xf32>
    %199 = vector.broadcast %198 : vector<1x128xf32> to vector<8x128xf32>
    %200 = arith.addf %196, %199 : vector<8x128xf32>
    %201 = arith.addf %145, %200 : vector<8x128xf32>
    %c0_82 = arith.constant 0 : index
    %c0_83 = arith.constant 0 : index
    %c0_84 = arith.constant 0 : index
    %202 = vector.load %arg16[%c0_82, %c0_83, %c0_84] : memref<1x8x128xf32, #tpu.memory_space<vmem>>, vector<1x8x128xf32>
    %203 = vector.shape_cast %202 : vector<1x8x128xf32> to vector<8x128xf32>
    %204 = vector.shape_cast %201 : vector<8x128xf32> to vector<1x8x128xf32>
    tpu.vector_store %arg16[%c0_82, %c0_83, %c0_84], %204 {strides = array<i32>} : memref<1x8x128xf32, #tpu.memory_space<vmem>>, vector<1x8x128xf32>,
    return
  }
  func.func @transform_0(%arg0: i32, %arg1: i32) -> (i32, i32, i32) {
    %c0_i32 = arith.constant 0 : i32
    %c0_i32_0 = arith.constant 0 : i32
    %c0_i32_1 = arith.constant 0 : i32
    return %arg0, %c0_i32, %c0_i32_0 : i32, i32, i32
  }
  func.func @transform_1(%arg0: i32, %arg1: i32) -> (i32, i32, i32) {
    %c0_i32 = arith.constant 0 : i32
    %c0_i32_0 = arith.constant 0 : i32
    %c0_i32_1 = arith.constant 0 : i32
    return %arg0, %c0_i32, %c0_i32_0 : i32, i32, i32
  }
  func.func @transform_2(%arg0: i32, %arg1: i32) -> (i32, i32, i32) {
    %c0_i32 = arith.constant 0 : i32
    %c0_i32_0 = arith.constant 0 : i32
    %c0_i32_1 = arith.constant 0 : i32
    return %arg1, %c0_i32, %c0_i32_0 : i32, i32, i32
  }
  func.func @transform_3(%arg0: i32, %arg1: i32) -> (i32, i32, i32) {
    %c0_i32 = arith.constant 0 : i32
    %c0_i32_0 = arith.constant 0 : i32
    %c0_i32_1 = arith.constant 0 : i32
    return %arg1, %c0_i32, %c0_i32_0 : i32, i32, i32
  }
  func.func @transform_4(%arg0: i32, %arg1: i32) -> (i32, i32, i32, i32) {
    %c0_i32 = arith.constant 0 : i32
    %c0_i32_0 = arith.constant 0 : i32
    %c0_i32_1 = arith.constant 0 : i32
    %c0_i32_2 = arith.constant 0 : i32
    return %arg1, %c0_i32, %c0_i32_0, %c0_i32_1 : i32, i32, i32, i32
  }
  func.func @transform_5(%arg0: i32, %arg1: i32) -> (i32, i32, i32) {
    %c0_i32 = arith.constant 0 : i32
    %c0_i32_0 = arith.constant 0 : i32
    %c0_i32_1 = arith.constant 0 : i32
    return %arg1, %c0_i32, %c0_i32_0 : i32, i32, i32
  }
  func.func @transform_6(%arg0: i32, %arg1: i32) -> (i32, i32, i32) {
    %c0_i32 = arith.constant 0 : i32
    %c0_i32_0 = arith.constant 0 : i32
    %c0_i32_1 = arith.constant 0 : i32
    return %arg1, %c0_i32, %c0_i32_0 : i32, i32, i32
  }
  func.func @transform_7(%arg0: i32, %arg1: i32) -> (i32, i32, i32) {
    %c0_i32 = arith.constant 0 : i32
    %c0_i32_0 = arith.constant 0 : i32
    %c0_i32_1 = arith.constant 0 : i32
    return %arg1, %c0_i32, %c0_i32_0 : i32, i32, i32
  }
  func.func @transform_8(%arg0: i32, %arg1: i32) -> (i32, i32, i32) {
    %c0_i32 = arith.constant 0 : i32
    %c0_i32_0 = arith.constant 0 : i32
    %c0_i32_1 = arith.constant 0 : i32
    return %arg1, %c0_i32, %c0_i32_0 : i32, i32, i32
  }
  func.func @transform_9(%arg0: i32, %arg1: i32) -> (i32, i32, i32) {
    %c0_i32 = arith.constant 0 : i32
    %c0_i32_0 = arith.constant 0 : i32
    %c0_i32_1 = arith.constant 0 : i32
    return %arg1, %c0_i32, %c0_i32_0 : i32, i32, i32
  }
  func.func @transform_10(%arg0: i32, %arg1: i32) -> (i32, i32, i32) {
    %c0_i32 = arith.constant 0 : i32
    %c0_i32_0 = arith.constant 0 : i32
    %c0_i32_1 = arith.constant 0 : i32
    return %arg1, %c0_i32, %c0_i32_0 : i32, i32, i32
  }
  func.func @transform_11(%arg0: i32, %arg1: i32) -> (i32, i32, i32) {
    %c0_i32 = arith.constant 0 : i32
    %c0_i32_0 = arith.constant 0 : i32
    %c0_i32_1 = arith.constant 0 : i32
    return %arg1, %c0_i32, %c0_i32_0 : i32, i32, i32
  }
  func.func @transform_12(%arg0: i32, %arg1: i32) -> (i32, i32, i32) {
    %c0_i32 = arith.constant 0 : i32
    %c0_i32_0 = arith.constant 0 : i32
    %c0_i32_1 = arith.constant 0 : i32
    return %arg1, %c0_i32, %c0_i32_0 : i32, i32, i32
  }
  func.func @transform_13(%arg0: i32, %arg1: i32) -> (i32, i32, i32) {
    %c0_i32 = arith.constant 0 : i32
    %c0_i32_0 = arith.constant 0 : i32
    %c0_i32_1 = arith.constant 0 : i32
    return %arg1, %c0_i32, %c0_i32_0 : i32, i32, i32
  }
  func.func @transform_14(%arg0: i32, %arg1: i32) -> (i32, i32, i32) {
    %c0_i32 = arith.constant 0 : i32
    %c0_i32_0 = arith.constant 0 : i32
    %c0_i32_1 = arith.constant 0 : i32
    return %arg0, %c0_i32, %c0_i32_0 : i32, i32, i32
  }
}

</mosaic_0001>

<bundles_post_ra>
// kernel: clip_forward.7
= control target key start
LH: loop header
LB: loop body
LE: loop exit
PB: predicated region body
PF: predicated region fallthrough
CT: control target
= control target key end

     0   :  { %vm35_vm0 = vcmask 1041409   ;;  %vm38_vm1 = vcmask 1041408   ;;  %s506_s0 = inlined_call_operand.vmem [shape: f32[2,5,128], index: 0, kind: input, shape index: {}]   ;;  %s507_s1 = inlined_call_operand.vmem [shape: f32[2,8,128], index: 1, kind: input, shape index: {}]   ;;  %s508_s2 = inlined_call_operand.vmem [shape: f32[1,128], index: 2, kind: input, shape index: {}]   ;;  %s509_s3 = inlined_call_operand.vmem [shape: f32[1,128], index: 3, kind: input, shape index: {}]   ;;  %s510_s4 = inlined_call_operand.vmem [shape: f32[1,128], index: 4, kind: input, shape index: {}]   ;;  %s511_s5 = inlined_call_operand.vmem [shape: f32[1,128], index: 5, kind: input, shape index: {}]   ;;  %s512_s6 = inlined_call_operand.<no memory space> [shape: f32[1,1], index: 6, kind: input, shape index: {}]   ;;  %s513_s7 = inlined_call_operand.hbm [shape: f32[1,1], index: 7, kind: output, shape index: {}]  }
   0x1   :  { %v28_v0 = vld [vmem:[%s506_s0] sm:$0x1f]  ;;  %v29_v1 = vld [vmem:[%s506_s0 + $0x8] sm:$0x1f] }
   0x2   :  { %v34_v2 = vrot.slane %v29_v1, 7  ;;  %v85_v3 = vld [vmem:[%s507_s1] sm:$0xff]  ;;  %v86_v4 = vld [vmem:[%s507_s1 + $0x8] sm:$0xff] }
   0x3   :  { %13 = vsyncpa [#allocation4], 0  ;;  %v91_v5 = vrot.slane %v86_v4, 7  ;;  %v405_v30 = vmov 0.0   ;;  %vm406_vm2 = vmmov 0   ;;  %v140_v31 = vstv %s512_s6  ;;  %s407_s18 = smov [#allocation3]  }
   0x4   :  { %v36_v6 = vsel %vm35_vm0, %v34_v2, %v28_v0  ;;  %353 = vmatprep.subr.mxu0 %v405_v30  ;;  %355 = vmatprep.mubr.msk.f32.mxu0 %vm406_vm2, %v405_v30  ;;  %v141_v32 = vmul.f32 1.442695, %v140_v31  ;;  %v346_v43 = vld [vmem:[%s508_s2] ss:$0 sm:$0xff]  ;;  %vm233_vm3 = vcmask 9216   ;;  %vm251_vm5 = vcmask 1024  }
   0x5   :  { %v39_v7 = vsel %vm38_vm1, %v36_v6, 0.0  ;;  %v92_v8 = vsel %vm35_vm0, %v91_v5, %v85_v3  ;;  %v347_v50 = vld [vmem:[%s509_s3] ss:$0 sm:$0xff]  ;;  %s338_s19 = sshll.u32 %s407_s18, 4  ;;  %vm330_vm6 = vcmask 0   ;;  %s339_s19 = int_to_ptr.vmem [resolvable:$true] %s338_s19 }
   0x6   :  { %40 = vadd.xlane.f32.xlu0 %v39_v7  ;;  %v94_v9 = vsel %vm38_vm1, %v92_v8, 0.0  ;;  %367 = vpow2.f32 %v141_v32  ;;  %v348_v51 = vld [vmem:[%s510_s4] ss:$0 sm:$0xff]  ;;  %s381_s21 = scalar_lea.vmem %s339_s19, 16  ;;  %s385_s22 = scalar_lea.vmem %s339_s19, 32 }
   0x7   :  { %v349_v58 = vld [vmem:[%s511_s5] ss:$0 sm:$0xff]  ;;  %p382_p0 = scmp.ne.s32.totalorder %s339_s19, %s381_s21  ;;  %p386_p1 = scmp.lt.s32.totalorder %s339_s19, %s339_s19 }
   0x8   :  { %p387_p2 = scmp.lt.s32.totalorder %s385_s22, %s381_s21 }
   0xa   :  { %95 = vadd.xlane.f32.xlu0 %v94_v9  ;;  %p388_p3 = por %p387_p2, %p386_p1 }
   0xc   :  { %p389_p4 = pnand %p388_p3, %p382_p0 }
  0x10   :  { %v368_v33 = vpop.eup %367 }
  0x11   :  { %358 = vpush %v368_v33 }
  0x42   :  { %s359_s3 = spop %358 }
  0x93   :  { %v41_v10 = vpop.xlane.xlu0 %40 }
  0x94   :  { %v43_v11 = vmul.f32 0.0078125, %v41_v10 }
  0x96   :  { %v45_v12 = vrot.slane %v43_v11, 1  ;;  %v48_v14 = vsub.f32 %v28_v0, %v43_v11  ;;  %v224_v0 = vstv %s359_s3 }
  0x97   :  { %v96_v13 = vpop.xlane.xlu0 %95 }
  0x98   :  { %v49_v15 = vsub.f32 %v29_v1, %v45_v12  ;;  %v97_v16 = vmul.f32 0.0078125, %v96_v13  ;;  %v50_v19 = vmul.f32 %v48_v14, %v48_v14 }
  0x9a   :  { %v99_v17 = vrot.slane %v97_v16, 1  ;;  %v51_v18 = vmul.f32 %v49_v15, %v49_v15  ;;  %v102_v20 = vsub.f32 %v85_v3, %v97_v16 }
  0x9c   :  { %v103_v21 = vsub.f32 %v86_v4, %v99_v17  ;;  %v54_v22 = vrot.slane %v51_v18, 7  ;;  %v104_v26 = vmul.f32 %v102_v20, %v102_v20 }
  0x9e   :  { %v55_v23 = vsel %vm35_vm0, %v54_v22, %v50_v19  ;;  %v105_v24 = vmul.f32 %v103_v21, %v103_v21 }
  0x9f   :  { %v57_v25 = vsel %vm38_vm1, %v55_v23, 0.0 }
  0xa0   :  { %58 = vadd.xlane.f32.xlu1 %v57_v25  ;;  %v108_v27 = vrot.slane %v105_v24, 7 }
  0xa2   :  { %v109_v28 = vsel %vm35_vm0, %v108_v27, %v104_v26 }
  0xa3   :  { %v111_v29 = vsel %vm38_vm1, %v109_v28, 0.0 }
  0xa4   :  { %112 = vadd.xlane.f32.xlu1 %v111_v29 }
 0x12d   :  { %v59_v34 = vpop.xlane.xlu1 %58 }
 0x12e   :  { %v60_v35 = vmul.f32 0.0078125, %v59_v34 }
 0x130   :  { %v61_v36 = vadd.f32 1e-05, %v60_v35 }
 0x131   :  { %v113_v37 = vpop.xlane.xlu1 %112 }
 0x132   :  { %369 = vrsqrt.f32 %v61_v36  ;;  %v114_v38 = vmul.f32 0.0078125, %v113_v37 }
 0x134   :  { %v115_v39 = vadd.f32 1e-05, %v114_v38 }
 0x136   :  { %371 = vrsqrt.f32 %v115_v39 }
 0x13c   :  { %v370_v40 = vpop.eup %369 }
 0x13d   :  { %v64_v41 = vrot.slane %v370_v40, 1  ;;  %v67_v42 = vmul.f32 %v370_v40, %v48_v14  ;;  %v226_v14 = vlaneseq }
 0x13f   :  { %v68_v44 = vmul.f32 %v64_v41, %v49_v15  ;;  %v75_v47 = vmul.f32 %v346_v43, %v67_v42  ;;  %v227_v16 = vshrl.u32 %v226_v14, 7  ;;  %v229_v17 = vand.u32 127, %v226_v14 }
 0x140   :  { %v372_v45 = vpop.eup %371 }
 0x141   :  { %v118_v46 = vrot.slane %v372_v45, 1  ;;  %v76_v48 = vmul.f32 %v346_v43, %v68_v44  ;;  %v121_v49 = vmul.f32 %v372_v45, %v102_v20  ;;  %v83_v54 = vadd.f32 %v347_v50, %v75_v47 }
 0x142   :  { %vm230_vm4 = vcmp.eq.s32.totalorder %v227_v16, %v229_v17 }
 0x143   :  { %v84_v52 = vadd.f32 %v347_v50, %v76_v48  ;;  %v122_v53 = vmul.f32 %v118_v46, %v103_v21  ;;  %v129_v56 = vmul.f32 %v348_v51, %v121_v49  ;;  %v350_v18 = vsel %vm230_vm4, 1.0, %v405_v30 }
 0x145   :  { %v151_v55 = vrot.slane %v84_v52, 7  ;;  %v130_v57 = vmul.f32 %v348_v51, %v122_v53  ;;  %v137_v61 = vadd.f32 %v349_v58, %v129_v56 }
 0x147   :  { %v152_v59 = vsel %vm35_vm0, %v151_v55, %v83_v54  ;;  %v138_v60 = vadd.f32 %v349_v58, %v130_v57 }
 0x148   :  { %354 = vmatpush3.xpose.msra.mxu0 %v152_v59 }
 0x149   :  { %v146_v62 = vrot.slane %v138_v60, 7 }
 0x14b   :  { %v147_v63 = vsel %vm35_vm0, %v146_v62, %v137_v61 }
 0x14c   :  { %356 = vmatmul.mubr.f32.vlgmr.msra.gmra.mrb[0].mxu0 %v147_v63 }
 0x21f   :  { %v220_v1 = vpop.f32.mrb[0].mxu0 }
 0x220   :  { %v225_v2 = vmul.f32 %v224_v0, %v220_v1  ;;  %v357_v3 = vpop.f32.mrb[1].mxu0 }
 0x222   :  { %265 = vxpose.xlu0.b32.start.end [1/1] (short) (narrow) %v225_v2, 8  ;;  %v234_v4 = vsel %vm233_vm3, %v225_v2, -inf  ;;  %v246_v21 = vmul.f32 %v350_v18, %v225_v2 }
 0x223   :  { %235 = vmax.xlane.f32.xlu1 %v234_v4 }
 0x224   :  { %v247_v23 = vsel %vm233_vm3, %v246_v21, 0.0 }
 0x2a2   :  { %v281_v5 = vpop.trf.xlu0 }
 0x2a3   :  { %v297_v6 = vsel %vm233_vm3, %v281_v5, -inf  ;;  %v309_v22 = vmul.f32 %v350_v18, %v281_v5 }
 0x2a4   :  { %298 = vmax.xlane.f32.xlu1 %v297_v6 }
 0x2a5   :  { %v310_v24 = vsel %vm233_vm3, %v309_v22, 0.0 }
 0x2b0   :  { %v236_v7 = vpop.xlane.xlu1 %235 }
 0x2b1   :  { %v237_v8 = vsub.f32 %v225_v2, %v236_v7 }
 0x2b3   :  { %v238_v9 = vmul.f32 1.442695, %v237_v8 }
 0x2b5   :  { %373 = vpow2.f32 %v238_v9 }
 0x2bf   :  { %v374_v10 = vpop.eup %373 }
 0x2c0   :  { %v240_v11 = vsel %vm233_vm3, %v374_v10, 0.0 }
 0x2c1   :  { %241 = vadd.xlane.f32.xlu1 %v240_v11 }
 0x331   :  { %v299_v12 = vpop.xlane.xlu1 %298 }
 0x332   :  { %v300_v13 = vsub.f32 %v281_v5, %v299_v12 }
 0x334   :  { %v301_v15 = vmul.f32 1.442695, %v300_v13 }
 0x336   :  { %375 = vpow2.f32 %v301_v15 }
 0x340   :  { %v376_v19 = vpop.eup %375 }
 0x341   :  { %v303_v20 = vsel %vm233_vm3, %v376_v19, 0.0 }
 0x342   :  { %304 = vadd.xlane.f32.xlu1 %v303_v20 }
 0x346   :  { %248 = vadd.xlane.f32.xlu1 %v247_v23 }
 0x34a   :  { %311 = vadd.xlane.f32.xlu1 %v310_v24 }
 0x34e   :  { %v242_v25 = vpop.xlane.xlu1 %241 }
 0x34f   :  { %377 = vlog2.f32 %v242_v25 }
 0x359   :  { %v378_v26 = vpop.eup %377 }
 0x35a   :  { %v244_v27 = vmul.f32 0.6931472, %v378_v26 }
 0x35c   :  { %v245_v29 = vadd.f32 %v244_v27, %v236_v7 }
 0x3cf   :  { %v305_v28 = vpop.xlane.xlu1 %304 }
 0x3d0   :  { %379 = vlog2.f32 %v305_v28 }
 0x3d3   :  { %v249_v30 = vpop.xlane.xlu1 %248 }
 0x3d4   :  { %v250_v31 = vsub.f32 %v245_v29, %v249_v30 }
 0x3d6   :  { %v252_v32 = vsel %vm251_vm5, %v250_v31, 0.0 }
 0x3d7   :  { %253 = vadd.xlane.f32.xlu1 %v252_v32  ;;  %v312_v36 = vpop.xlane.xlu1 %311 }
 0x3da   :  { %v380_v33 = vpop.eup %379 }
 0x3db   :  { %v307_v34 = vmul.f32 0.6931472, %v380_v33 }
 0x3dd   :  { %v308_v35 = vadd.f32 %v307_v34, %v299_v12 }
 0x3df   :  { %v313_v37 = vsub.f32 %v308_v35, %v312_v36 }
 0x3e1   :  { %v314_v38 = vsel %vm251_vm5, %v313_v37, 0.0 }
 0x3e2   :  { %315 = vadd.xlane.f32.xlu1 %v314_v38 }
 0x464   :  { %v254_v39 = vpop.xlane.xlu1 %253 }
 0x465   :  { %v255_v40 = vrot.slane %v254_v39, 4 }
 0x467   :  { %v256_v41 = vadd.f32 %v255_v40, %v254_v39 }
 0x469   :  { %v257_v42 = vrot.slane %v256_v41, 2 }
 0x46b   :  { %v258_v43 = vadd.f32 %v257_v42, %v256_v41 }
 0x46d   :  { %v259_v44 = vrot.slane %v258_v43, 1 }
 0x46f   :  { %v316_v45 = vpop.xlane.xlu1 %315  ;;  %v260_v46 = vadd.f32 %v259_v44, %v258_v43 }
 0x470   :  { %v317_v47 = vrot.slane %v316_v45, 4 }
 0x471   :  { %360 = vpush %v260_v46 }
 0x472   :  { %v318_v48 = vadd.f32 %v317_v47, %v316_v45 }
 0x474   :  { %v319_v49 = vrot.slane %v318_v48, 2 }
 0x476   :  { %v320_v50 = vadd.f32 %v319_v49, %v318_v48 }
 0x478   :  { %v321_v51 = vrot.slane %v320_v50, 1 }
 0x47a   :  { %v322_v52 = vadd.f32 %v321_v51, %v320_v50 }
 0x47c   :  { %362 = vpush %v322_v52 }
 0x4a2   :  { %s361_s4 = spop %360 }
 0x4a3   :  { %s264_s5 = smul.f32 0.5, %s361_s4 }
 0x4ad   :  { %s363_s15 = spop %362 }
 0x4ae   :  { %s326_s16 = smul.f32 0.5, %s363_s15 }
 0x4b0   :  { %s327_s17 = sadd.f32 %s326_s16, %s264_s5 }
 0x4b2   :  { %s328_s20 = smul.f32 0.5, %s327_s17 }
 0x4b4   :  { %v329_v53 = vstv %s328_s20 }
 0x4b5   :  { %331 = vst.msk [vmem:[#allocation3] sm:$0x1] %vm330_vm6, %v329_v53 }
 0x4b6   :  { %392 = shalt.err (!%p389_p4)
}
 0x4b7   :  { %s393_s25 = scalar_lea.hbm %s513_s7, 16 }
 0x4b8   :  { %p394_p5 = scmp.ne.s32.totalorder %s513_s7, %s393_s25  ;;  %p397_p6 = scmp.lt.u32.totalorder %s393_s25, %s513_s7 }
 0x4ba   :  { %p399_p7 = pnand %p397_p6, %p394_p5 }
 0x4bc   :  { %402 = shalt.err (!%p399_p7)
}
 0x4bd   :  { %341 = dma.vmem_to_hbm [thread:$0]  %s339_s19, 16, %s513_s7, [#allocation4]  }
 0x4be   :  { %403 = dma.done.wait [#allocation4], 16  }
 0x4bf   :  { %404 = vsyncadd [#allocation4], 4294967280 }
 0x4c0   :  { %345 = vsyncpa [#allocation4], 1 }

// kernel: clip_forward.4
= control target key start
LH: loop header
LB: loop body
LE: loop exit
PB: predicated region body
PF: predicated region fallthrough
CT: control target
= control target key end

     0   :  { %s962_s1 = inlined_call_operand.vmem [shape: bf16[768,128], index: 1, kind: input, shape index: {}]   ;;  %s963_s0 = inlined_call_operand.vmem [shape: f32[2,4,768], index: 0, kind: input, shape index: {}]   ;;  %s964_s3 = inlined_call_operand.vmem [shape: f32[1,128], index: 3, kind: input, shape index: {}]   ;;  %s965_s5 = inlined_call_operand.vmem [shape: f32[2,5,128], index: 5, kind: output, shape index: {}]   ;;  %s966_s2 = inlined_call_operand.vmem [shape: f32[1,128], index: 2, kind: input, shape index: {}]   ;;  %s967_s4 = inlined_call_operand.vmem [shape: f32[4,128], index: 4, kind: input, shape index: {}]  }
   0x1   :  { %v692_v0 = vld [vmem:[%s962_s1 + $0x40] sm:$0xff]   ;;  %v696_v4 = vld [vmem:[%s962_s1 + $0x48] sm:$0xff]   ;;  %v700_v8 = vld [vmem:[%s962_s1 + $0x50] sm:$0xff]  }
   0x2   :  { %v693_v1 = vld [vmem:[%s962_s1] sm:$0xff]   ;;  %626 = vmatprep.subr.bf16.mxu0 %v692_v0  ;;  %v697_v5 = vld [vmem:[%s962_s1 + $0x8] sm:$0xff]   ;;  %v701_v9 = vld [vmem:[%s962_s1 + $0x10] sm:$0xff]  }
   0x3   :  { %v694_v2 = vld [vmem:[%s962_s1 + $0xc0] sm:$0xff]   ;;  %627 = vmatpush3.bf16.msra.mxu0 %v693_v1  ;;  %v698_v6 = vld [vmem:[%s962_s1 + $0xc8] sm:$0xff]   ;;  %v702_v10 = vld [vmem:[%s962_s1 + $0xd0] sm:$0xff]  }
   0x4   :  { %v695_v3 = vld [vmem:[%s962_s1 + $0x80] sm:$0xff]   ;;  %648 = vmatprep.subr.bf16.mxu1 %v694_v2  ;;  %628 = vmatprep.subr.bf16.mxu0 %v696_v4  ;;  %v699_v7 = vld [vmem:[%s962_s1 + $0x88] sm:$0xff]   ;;  %v703_v11 = vld [vmem:[%s962_s1 + $0x90] sm:$0xff]  }
   0x5   :  { %649 = vmatpush3.bf16.msra.mxu1 %v695_v3  ;;  %v704_v12 = vld [vmem:[%s962_s1 + $0x58] sm:$0xff]   ;;  %v708_v16 = vld [vmem:[%s962_s1 + $0x60] sm:$0xff]   ;;  %v712_v20 = vld [vmem:[%s962_s1 + $0x68] sm:$0xff]  }
   0x6   :  { %650 = vmatprep.subr.bf16.mxu1 %v698_v6  ;;  %v705_v13 = vld [vmem:[%s962_s1 + $0x18] sm:$0xff]   ;;  %v709_v17 = vld [vmem:[%s962_s1 + $0x20] sm:$0xff]   ;;  %v713_v21 = vld [vmem:[%s962_s1 + $0x28] sm:$0xff]  }
   0x7   :  { %629 = vmatpush3.bf16.msra.mxu0 %v697_v5  ;;  %v706_v14 = vld [vmem:[%s962_s1 + $0xd8] sm:$0xff]   ;;  %v710_v18 = vld [vmem:[%s962_s1 + $0xe0] sm:$0xff]   ;;  %v714_v22 = vld [vmem:[%s962_s1 + $0xe8] sm:$0xff]  }
   0x8   :  { %630 = vmatprep.subr.bf16.mxu0 %v700_v8  ;;  %v707_v15 = vld [vmem:[%s962_s1 + $0x98] sm:$0xff]   ;;  %v711_v19 = vld [vmem:[%s962_s1 + $0xa0] sm:$0xff]   ;;  %v715_v23 = vld [vmem:[%s962_s1 + $0xa8] sm:$0xff]  }
   0x9   :  { %651 = vmatpush3.bf16.msra.mxu1 %v699_v7  ;;  %v716_v24 = vld [vmem:[%s962_s1 + $0x70] sm:$0xff]   ;;  %v720_v28 = vld [vmem:[%s962_s1 + $0x78] sm:$0xff]   ;;  %v727_v36 = vld [vmem:[%s962_s1 + $0x140] sm:$0xff]  }
   0xa   :  { %652 = vmatprep.subr.bf16.mxu1 %v702_v10  ;;  %v717_v25 = vld [vmem:[%s962_s1 + $0x30] sm:$0xff]   ;;  %v721_v29 = vld [vmem:[%s962_s1 + $0x38] sm:$0xff]   ;;  %v728_v37 = vld [vmem:[%s963_s0 + $0x8] ss:$24 sps:$4 sm:$0xff]  }
   0xb   :  { %631 = vmatpush3.bf16.msra.mxu0 %v701_v9  ;;  %v718_v26 = vld [vmem:[%s962_s1 + $0xf0] sm:$0xff]   ;;  %v722_v30 = vld [vmem:[%s962_s1 + $0xf8] sm:$0xff]   ;;  %v730_v38 = vld [vmem:[%s963_s0 + $0xc] ss:$24 sps:$4 sm:$0xff]   ;;  %v47_v40 = vpack.c.bf16 %v728_v37, %v728_v37 }
   0xc   :  { %632 = vmatprep.subr.bf16.mxu0 %v704_v12  ;;  %v719_v27 = vld [vmem:[%s962_s1 + $0xb0] sm:$0xff]   ;;  %v723_v31 = vld [vmem:[%s963_s0] ss:$24 sps:$4 sm:$0xff]   ;;  %v725_v32 = vld [vmem:[%s963_s0 + $0x4] ss:$24 sps:$4 sm:$0xff]   ;;  %v48_v41 = vpack.c.bf16 %v730_v38, %v730_v38 }
   0xd   :  { %653 = vmatpush3.bf16.msra.mxu1 %v703_v11  ;;  %v45_v33 = vpack.c.bf16 %v723_v31, %v723_v31  ;;  %v726_v34 = vld [vmem:[%s962_s1 + $0xb8] sm:$0xff]   ;;  %v46_v35 = vpack.c.bf16 %v725_v32, %v725_v32  ;;  %v731_v39 = vld [vmem:[%s962_s1 + $0x100] sm:$0xff]   ;;  %v732_v42 = vld [vmem:[%s962_s1 + $0x148] sm:$0xff]  }
   0xe   :  { %654 = vmatprep.subr.bf16.mxu1 %v706_v14  ;;  %v733_v43 = vld [vmem:[%s962_s1 + $0x108] sm:$0xff]   ;;  %514 = vmatprep.mubr.bf16.mxu1 %v48_v41  ;;  %v734_v44 = vld [vmem:[%s962_s1 + $0x150] sm:$0xff]   ;;  %v736_v46 = vld [vmem:[%s962_s1 + $0x158] sm:$0xff]  }
   0xf   :  { %633 = vmatpush3.bf16.msra.mxu0 %v705_v13  ;;  %474 = vmatprep.mubr.bf16.mxu0 %v46_v35  ;;  %v735_v45 = vld [vmem:[%s962_s1 + $0x110] sm:$0xff]   ;;  %v737_v47 = vld [vmem:[%s962_s1 + $0x118] sm:$0xff]   ;;  %v738_v48 = vld [vmem:[%s962_s1 + $0x160] sm:$0xff]  }
  0x10   :  { %634 = vmatprep.subr.bf16.mxu0 %v708_v16  ;;  %v739_v49 = vld [vmem:[%s962_s1 + $0x120] sm:$0xff]   ;;  %v740_v50 = vld [vmem:[%s962_s1 + $0x168] sm:$0xff]   ;;  %v742_v54 = vld [vmem:[%s962_s1 + $0x170] sm:$0xff]  }
  0x11   :  { %655 = vmatpush3.bf16.msra.mxu1 %v707_v15  ;;  %v748_v51 = vld [vmem:[%s963_s0 + $0x14] ss:$24 sps:$4 sm:$0xff]   ;;  %v744_v56 = vld [vmem:[%s962_s1 + $0x178] sm:$0xff]   ;;  %v746_v57 = vld [vmem:[%s963_s0 + $0x10] ss:$24 sps:$4 sm:$0xff]  }
  0x12   :  { %656 = vmatprep.subr.bf16.mxu1 %v710_v18  ;;  %v50_v52 = vpack.c.bf16 %v748_v51, %v748_v51  ;;  %v741_v53 = vld [vmem:[%s962_s1 + $0x128] sm:$0xff]   ;;  %v743_v55 = vld [vmem:[%s962_s1 + $0x130] sm:$0xff]   ;;  %v745_v58 = vld [vmem:[%s962_s1 + $0x138] sm:$0xff]   ;;  %v49_v59 = vpack.c.bf16 %v746_v57, %v746_v57 }
  0x13   :  { %635 = vmatpush3.bf16.msra.mxu0 %v709_v17  ;;  %v570_v60 = vld [vmem:[%s964_s3] sm:$0x1] }
  0x14   :  { %636 = vmatprep.subr.bf16.mxu0 %v712_v20  ;;  %571 = vst [vmem:[%s965_s5] sm:$0x1] %v570_v60  ;;  %572 = vst [vmem:[%s965_s5 + $0x8] sm:$0x1] %v570_v60  ;;  %v577_v62 = vld [vmem:[%s966_s2] ss:$0 sm:$0xff] }
  0x15   :  { %657 = vmatpush3.bf16.msra.mxu1 %v711_v19  ;;  %v565_v14 = vld [vmem:[%s967_s4] sm:$0xf] }
  0x16   :  { %658 = vmatprep.subr.bf16.mxu1 %v714_v22 }
  0x17   :  { %637 = vmatpush3.bf16.msra.mxu0 %v713_v21 }
  0x18   :  { %638 = vmatprep.subr.bf16.mxu0 %v716_v24 }
  0x19   :  { %659 = vmatpush3.bf16.msra.mxu1 %v715_v23 }
  0x1a   :  { %660 = vmatprep.subr.bf16.mxu1 %v718_v26 }
  0x1b   :  { %639 = vmatpush3.bf16.msra.mxu0 %v717_v25 }
  0x1c   :  { %640 = vmatprep.subr.bf16.mxu0 %v720_v28 }
  0x1d   :  { %661 = vmatpush3.bf16.msra.mxu1 %v719_v27 }
  0x1e   :  { %662 = vmatprep.subr.bf16.mxu1 %v722_v30 }
  0x1f   :  { %641 = vmatpush3.bf16.msra.mxu0 %v721_v29 }
  0x20   :  { %670 = vmatprep.subr.bf16.mxu0 %v727_v36 }
  0x21   :  { %663 = vmatpush3.bf16.msra.mxu1 %v726_v34 }
  0x22   :  { %475 = vmatmul.mubr.bf16.vlgmr.msra.gmra.mrb[0].mxu0 %v45_v33 }
  0x23   :  { %671 = vmatpush3.bf16.msra.mxu0 %v731_v39  ;;  %554 = vmatprep.mubr.bf16.mxu0 %v50_v52 }
  0x24   :  { %672 = vmatprep.subr.bf16.mxu0 %v732_v42  ;;  %515 = vmatmul.mubr.bf16.vlgmr.msra.gmra.mrb[0].mxu1 %v47_v40 }
  0x27   :  { %673 = vmatpush3.bf16.msra.mxu0 %v733_v43 }
  0x28   :  { %674 = vmatprep.subr.bf16.mxu0 %v734_v44 }
  0x2b   :  { %675 = vmatpush3.bf16.msra.mxu0 %v735_v45 }
  0x2c   :  { %676 = vmatprep.subr.bf16.mxu0 %v736_v46 }
  0x2f   :  { %677 = vmatpush3.bf16.msra.mxu0 %v737_v47 }
  0x30   :  { %678 = vmatprep.subr.bf16.mxu0 %v738_v48 }
  0x33   :  { %679 = vmatpush3.bf16.msra.mxu0 %v739_v49 }
  0x34   :  { %680 = vmatprep.subr.bf16.mxu0 %v740_v50 }
  0x37   :  { %681 = vmatpush3.bf16.msra.mxu0 %v741_v53 }
  0x38   :  { %682 = vmatprep.subr.bf16.mxu0 %v742_v54 }
  0x3b   :  { %683 = vmatpush3.bf16.msra.mxu0 %v743_v55 }
  0x3c   :  { %684 = vmatprep.subr.bf16.mxu0 %v744_v56 }
  0x3f   :  { %685 = vmatpush3.bf16.msra.mxu0 %v745_v58 }
  0x42   :  { %555 = vmatmul.mubr.bf16.vlgmr.msra.gmra.mrb[4].mxu0 %v49_v59 }
  0xf5   :  { %v642_v61 = vpop.f32.mrb[0].mxu0 }
  0xf6   :  { %v643_v63 = vpop.f32.mrb[1].mxu0 }
  0xf7   :  { %v644_v0 = vadd.f32 %v643_v63, %v642_v61  ;;  %v645_v1 = vpop.f32.mrb[2].mxu0  ;;  %v664_v2 = vpop.f32.mrb[0].mxu1 }
  0xf8   :  { %v646_v3 = vpop.f32.mrb[3].mxu0  ;;  %v665_v5 = vpop.f32.mrb[1].mxu1 }
  0xf9   :  { %v477_v4 = vadd.f32 %v644_v0, %v577_v62  ;;  %v666_v6 = vadd.f32 %v665_v5, %v664_v2  ;;  %v667_v7 = vpop.f32.mrb[2].mxu1 }
  0xfa   :  { %v668_v8 = vpop.f32.mrb[3].mxu1 }
  0xfb   :  { %v517_v9 = vadd.f32 %v666_v6, %v477_v4 }
 0x115   :  { %v686_v10 = vpop.f32.mrb[4].mxu0 }
 0x116   :  { %v687_v11 = vpop.f32.mrb[5].mxu0 }
 0x117   :  { %v688_v12 = vadd.f32 %v687_v11, %v686_v10  ;;  %v689_v13 = vpop.f32.mrb[6].mxu0 }
 0x118   :  { %v690_v15 = vpop.f32.mrb[7].mxu0 }
 0x119   :  { %v557_v16 = vadd.f32 %v688_v12, %v517_v9 }
 0x11b   :  { %v563_v17 = vcombine.high %v557_v16, %v557_v16  ;;  %v566_v18 = vadd.f32 %v565_v14, %v557_v16 }
 0x11d   :  { %v567_v19 = vadd.f32 %v565_v14, %v563_v17  ;;  %568 = vst [vmem:[%s965_s5 + $0x1] sm:$0xf] %v566_v18 }
 0x11f   :  { %569 = vst [vmem:[%s965_s5 + $0x9] sm:$0xf] %v567_v19 }

// kernel: clip_forward.5
= control target key start
LH: loop header
LB: loop body
LE: loop exit
PB: predicated region body
PF: predicated region fallthrough
CT: control target
= control target key end

     0   :  { %s3173_s25 = smov 0   ;;  %s3175_s26 = smov 0   ;;  %s3568_s0 = inlined_call_operand.vmem [shape: f32[2,5,128], index: 0, kind: input, shape index: {}]   ;;  %s3569_s1 = inlined_call_operand.vmem [shape: bf16[2,128,384], index: 1, kind: input, shape index: {}]   ;;  %s3570_s2 = inlined_call_operand.vmem [shape: f32[2,1,384], index: 2, kind: input, shape index: {}]   ;;  %s3571_s3 = inlined_call_operand.vmem [shape: bf16[2,4,32,128], index: 3, kind: input, shape index: {}]   ;;  %s3572_s4 = inlined_call_operand.vmem [shape: f32[2,1,128], index: 4, kind: input, shape index: {}]   ;;  %s3573_s5 = inlined_call_operand.vmem [shape: f32[2,1,128], index: 5, kind: input, shape index: {}]   ;;  %s3574_s6 = inlined_call_operand.vmem [shape: f32[2,1,128], index: 6, kind: input, shape index: {}]   ;;  %s3575_s7 = inlined_call_operand.vmem [shape: f32[2,1,128], index: 7, kind: input, shape index: {}]   ;;  %s3576_s8 = inlined_call_operand.vmem [shape: f32[2,1,128], index: 8, kind: input, shape index: {}]   ;;  %s3577_s9 = inlined_call_operand.vmem [shape: bf16[2,128,512], index: 9, kind: input, shape index: {}]   ;;  %s3578_s10 = inlined_call_operand.vmem [shape: f32[2,1,512], index: 10, kind: input, shape index: {}]   ;;  %s3579_s11 = inlined_call_operand.vmem [shape: bf16[2,512,128], index: 11, kind: input, shape index: {}]   ;;  %s3580_s12 = inlined_call_operand.vmem [shape: f32[2,1,128], index: 12, kind: input, shape index: {}]   ;;  %s3581_s13 = inlined_call_operand.vmem [shape: f32[2,5,128], index: 13, kind: output, shape index: {}]  }
   0x1   :  { %3586 = sst [smem:[#allocation8_spill]] %s3568_s0  ;;  %s3177_s27 = smov 0  }
   0x2   :  { %3587 = sst [smem:[#allocation9_spill]] %s3569_s1  ;;  %s3179_s28 = smov 0  }
   0x3   :  { %3588 = sst [smem:[#allocation10_spill]] %s3570_s2  ;;  %s3181_s29 = smov 0  }
   0x4   :  { %3589 = sst [smem:[#allocation11_spill]] %s3571_s3 }
   0x5   :  { %3590 = sst [smem:[#allocation12_spill]] %s3576_s8 }
   0x6   :  { %3591 = sst [smem:[#allocation13_spill]] %s3580_s12 }
   0x7   :  { %3592 = sst [smem:[#allocation14_spill]] %s3581_s13 }
   0x8 LB: > { %3593 = sst [smem:[#allocation2_spill]] %s3078_s25  ;;  %s32_s30 = sadd.s32 1, %s3086_s27  ;;  %s3094_s29 = sphi %s3181_s29, %s23_s29   ;;  %s3090_s28 = sphi %s3179_s28, %s3618_s28   ;;  %s3086_s27 = sphi %s3177_s27, %s3617_s27   ;;  %s3082_s26 = sphi %s3175_s26, %s3616_s26   ;;  %s3078_s25 = sphi %s3173_s25, %s3615_s25  }
   0x9   : > { %3594 = sst [smem:[#allocation3_spill]] %s3086_s27  ;;  %s35_s14 = sadd.s32 1, %s3090_s28 }
   0xa   : > { %3595 = sst [smem:[#allocation4_spill]] %s3090_s28  ;;  %p33_p0 = scmp.ge.s32.totalorder %s32_s30, 2 }
   0xb   : > { %3596 = sst [smem:[#allocation5_spill]] %s3094_s29  ;;  %p2547_p1 = scmp.ge.s32.totalorder %s3094_s29, 1 }
   0xc   : > { %p504_p2 = scmp.lt.s32.totalorder %s3094_s29, 5  ;;  %s3620_s30 = smov (%p33_p0, %s32_s30), 0 }
   0xd   : > { %3597 = sst [smem:[#allocation6_spill]] %s3620_s30  ;;  %s3622_s14 = smov (!%p33_p0, %s35_s14), %s3090_s28 }
   0xe   : > { %p505_p3 = pnand %p2547_p1, %p504_p2  ;;  %p37_p4 = scmp.ge.s32.totalorder %s3622_s14, 2 }
   0xf   : > { %p592_p5 = scmp.lt.s32.totalorder (!%p505_p3), %s3082_s26, 1  ;;  %p596_p6 = scmp.lt.s32.totalorder (!%p505_p3), %s3078_s25, 1 }
  0x10   : > { %s3624_s14 = smov (%p37_p4, %s3622_s14), 0  ;;  %508 = sbr.rel (%p505_p3) target bundleno = 3727 (0xe8f), region = 72 }
  0x11   : > { %3598 = sst [smem:[#allocation7_spill]] %s3624_s14  ;;  %s3599_s0 = sld [smem:[#allocation8_spill]] (!%p505_p3) }
  0x12   : > { %s3600_s1 = sld [smem:[#allocation9_spill]] (!%p505_p3)  ;;  %s3601_s3 = sld [smem:[#allocation11_spill]] (!%p505_p3) }
  0x13   : > { %s3602_s2 = sld [smem:[#allocation10_spill]] (!%p505_p3)  ;;  %s3604_s29 = sld [smem:[#allocation13_spill]] (!%p505_p3) }
  0x14   : > { %s3605_s8 = sld [smem:[#allocation14_spill]] (!%p505_p3)  ;;  %s3606_s18 = sld [smem:[#allocation2_spill]] (!%p505_p3) }
  0x17   : > { %s3626_s26 = smov (!%p592_p5, %s3082_s26), 1 }
  0x18   : > { %s3207_s15 = scalar_select %p596_p6, %s3078_s25, 1 }
  0x19   : > { %s2548_s16 = sshll.u32 %s3626_s26, 3 }
  0x1a   : > { %s595_s19 = scalar_lea.vmem %s3599_s0, %s2548_s16  ;;  %s2859_s20 = smul.u32 192, %s3207_s15 }
  0x1b   : > { %s2860_s21 = smul.u32 3, %s3207_s15  ;;  %s2675_s22 = sshll.u32 %s3207_s15, 6 }
  0x1c   : > { %s3218_s14 = scalar_lea.vmem %s3600_s1, %s2859_s20  ;;  %s3223_s27 = scalar_lea.vmem %s3601_s3, %s2675_s22 }
  0x1d   : > { %s3228_s25 = scalar_lea.vmem %s3602_s2, %s2860_s21  ;;  %s2676_s26 = sshll.u32 %s3207_s15, 8 }
  0x1e   : > { %s2554_s2 = sshll.u32 %s3207_s15, 2  ;;  %s3255_s0 = scalar_lea.vmem %s3577_s9, %s2676_s26 }
  0x1f   : > { %s3260_s20 = scalar_lea.vmem %s3578_s10, %s2554_s2  ;;  %s3265_s28 = scalar_lea.vmem %s3579_s11, %s2676_s26 }
  0x20   : > { %s641_s21 = scalar_lea.vmem %s3604_s29, %s3207_s15  ;;  %s3274_s17 = scalar_lea.vmem %s3605_s8, %s2548_s16 }
  0x21   : > { %p2558_p7 = scmp.ne.s32.totalorder %s3606_s18, 0 }
  0x22   : > { %v651_v0 = vld [vmem:[%s595_s19] sm:$0x1f] (!%p2558_p7) }
  0x23   : > { %650 = sbr.rel (%p2558_p7) target bundleno = 42 (0x2a), region = 76  ;;  %652 = vst [vmem:[%s3274_s17] sm:$0x1f] (!%p2558_p7), %v651_v0 }
  0x2a PF: > { %v3279_v1 = vld [vmem:[%s3274_s17] sm:$0x1f]  ;;  %vm656_vm0 = vcmask 1044480   ;;  %v3096_v5 = vmov 0.0   ;;  %v2911_v6 = vld [vmem:[%s3218_s14 + $0x8] ss:$12 sps:$4 sm:$0xff]   ;;  %s3607_s8 = scalar_lea.vmem %s3573_s5, %s3207_s15  ;;  %s3608_s19 = scalar_lea.vmem %s3574_s6, %s3207_s15  ;;  %v720_v44 = vlaneseq }
  0x2b   : > { %v657_v2 = vsel %vm656_vm0, %v3279_v1, 0.0  ;;  %v2908_v3 = vld [vmem:[%s3218_s14 + $0x4] ss:$12 sps:$4 sm:$0xff]   ;;  %v2910_v4 = vld [vmem:[%s3218_s14] ss:$12 sps:$4 sm:$0xff]   ;;  %2759 = vmatprep.subr.bf16.mxu1 %v3096_v5  ;;  %v3097_v28 = vmov 0   ;;  %s3609_s12 = scalar_lea.vmem %s3572_s4, %s3207_s15  ;;  %s3610_s30 = scalar_lea.vmem %s3575_s7, %s3207_s15 }
  0x2c   : > { %658 = vadd.xlane.f32.xlu0 %v657_v2  ;;  %v2912_v7 = vld [vmem:[%s3218_s14 + $0x1c] ss:$12 sps:$4 sm:$0xff]   ;;  %v2914_v8 = vld [vmem:[%s3218_s14 + $0x18] ss:$12 sps:$4 sm:$0xff]   ;;  %863 = vmatprep.subr.bf16.mxu0 %v2908_v3  ;;  %v2915_v9 = vld [vmem:[%s3218_s14 + $0x20] ss:$12 sps:$4 sm:$0xff]  }
  0x2d   : > { %v2916_v10 = vld [vmem:[%s3218_s14 + $0x34] ss:$12 sps:$4 sm:$0xff]   ;;  %864 = vmatpush1.bf16.msra.mxu0 %v2910_v4  ;;  %2760 = vmatpush3.bf16.msra.mxu1 %v2911_v6  ;;  %v2918_v16 = vld [vmem:[%s3218_s14 + $0x30] ss:$12 sps:$4 sm:$0xff]   ;;  %v2919_v17 = vld [vmem:[%s3218_s14 + $0x38] ss:$12 sps:$4 sm:$0xff]  }
  0x2e   : > { %865 = vmatprep.subr.bf16.mxu0 %v2912_v7  ;;  %2761 = vmatprep.subr.bf16.mxu1 %v3096_v5  ;;  %v2920_v18 = vld [vmem:[%s3218_s14 + $0x4c] ss:$12 sps:$4 sm:$0xff]   ;;  %v2922_v19 = vld [vmem:[%s3218_s14 + $0x48] ss:$12 sps:$4 sm:$0xff]   ;;  %v2923_v20 = vld [vmem:[%s3218_s14 + $0x50] ss:$12 sps:$4 sm:$0xff]  }
  0x2f   : > { %v2924_v21 = vld [vmem:[%s3218_s14 + $0x64] ss:$12 sps:$4 sm:$0xff]   ;;  %v2926_v22 = vld [vmem:[%s3218_s14 + $0x60] ss:$12 sps:$4 sm:$0xff]   ;;  %v2927_v23 = vld [vmem:[%s3218_s14 + $0x68] ss:$12 sps:$4 sm:$0xff]   ;;  %895 = vmatprep.mubr.bf16.mxu0 %v3097_v28 }
  0x30   : > { %v2928_v24 = vld [vmem:[%s3218_s14 + $0x7c] ss:$12 sps:$4 sm:$0xff]   ;;  %v2930_v25 = vld [vmem:[%s3218_s14 + $0x78] ss:$12 sps:$4 sm:$0xff]   ;;  %v2931_v26 = vld [vmem:[%s3218_s14 + $0x80] ss:$12 sps:$4 sm:$0xff]  }
  0x31   : > { %866 = vmatpush1.bf16.msra.mxu0 %v2914_v8  ;;  %2762 = vmatpush3.bf16.msra.mxu1 %v2915_v9  ;;  %v2932_v27 = vld [vmem:[%s3218_s14 + $0x94] ss:$12 sps:$4 sm:$0xff]   ;;  %vm3098_vm1 = vmmov 0   ;;  %v2934_v29 = vld [vmem:[%s3218_s14 + $0x90] ss:$12 sps:$4 sm:$0xff]   ;;  %v3336_v45 = vshrl.u32 %v720_v44, 7 }
  0x32   : > { %867 = vmatprep.subr.bf16.mxu0 %v2916_v10  ;;  %2763 = vmatprep.subr.bf16.mxu1 %v3096_v5  ;;  %v2935_v30 = vld [vmem:[%s3218_s14 + $0x98] ss:$12 sps:$4 sm:$0xff]   ;;  %v2938_v32 = vld [vmem:[%s3218_s14 + $0xa8] ss:$12 sps:$4 sm:$0xff]   ;;  %v2939_v33 = vld [vmem:[%s3218_s14 + $0xb0] ss:$12 sps:$4 sm:$0xff]  }
  0x33   : > { %2775 = vmatprep.mubr.msk.bf16.mxu1 %vm3098_vm1, %v3096_v5  ;;  %v2936_v31 = vld [vmem:[%s3218_s14 + $0xac] ss:$12 sps:$4 sm:$0xff]   ;;  %v2559_v38 = vld [vmem:[%s3607_s8] ss:$0 sm:$0xff]  ;;  %v730_v46 = vsub.s32 2, %v3336_v45  ;;  %v726_v48 = vsub.s32 1, %v3336_v45 }
  0x34   : > { %v2560_v40 = vld [vmem:[%s3608_s19] ss:$0 sm:$0xff]  ;;  %v722_v49 = vsub.s32 0, %v3336_v45  ;;  %vm1027_vm2 = vcmask 1041408   ;;  %vm1028_vm3 = vcmask 1042432   ;;  %v3099_v52 = vmov 65535  }
  0x35   : > { %868 = vmatpush1.bf16.msra.mxu0 %v2918_v16  ;;  %2764 = vmatpush3.bf16.msra.mxu1 %v2919_v17  ;;  %v718_v47 = vld [vmem:[%s3228_s25] sm:$0x7]  ;;  %v1029_v53 = vsel %vm1027_vm2, 4294967295, %v3099_v52  ;;  %vm963_vm4 = vcmask 261120   ;;  %s3100_s25 = smov 96   ;;  %vm1010_vm5 = vcmask 36864  }
  0x36   : > { %2765 = vmatprep.subr.bf16.mxu1 %v3096_v5  ;;  %869 = vmatprep.subr.bf16.mxu0 %v2920_v18  ;;  %v731_v50 = vrot.slane %v718_v47, %v730_v46  ;;  %v727_v51 = vrot.slane %v718_v47, %v726_v48  ;;  %v723_v54 = vrot.slane %v718_v47, %v722_v49  ;;  %v3348_v63 = vsel %vm1028_vm3, %v1029_v53, 0  ;;  %s3101_s23 = smov 64   ;;  %v2940_v47 = vld [vmem:[%s3223_s27] sm:$0xff]   ;;  %s3102_s22 = smov 32  }
  0x37   : > { %vm1023_vm6 = vcmask 39936   ;;  %s3611_s29 = sld [smem:[#allocation12_spill]] }
  0x39   : > { %870 = vmatpush1.bf16.msra.mxu0 %v2922_v19  ;;  %2766 = vmatpush3.bf16.msra.mxu1 %v2923_v20 }
  0x3a   : > { %2767 = vmatprep.subr.bf16.mxu1 %v3096_v5  ;;  %871 = vmatprep.subr.bf16.mxu0 %v2924_v21 }
  0x3d   : > { %872 = vmatpush1.bf16.msra.mxu0 %v2926_v22  ;;  %2768 = vmatpush3.bf16.msra.mxu1 %v2927_v23  ;;  %s3612_s18 = scalar_lea.vmem %s3611_s29, %s3207_s15 }
  0x3e   : > { %873 = vmatprep.subr.bf16.mxu0 %v2928_v24  ;;  %2769 = vmatprep.subr.bf16.mxu1 %v3096_v5 }
  0x41   : > { %874 = vmatpush1.bf16.msra.mxu0 %v2930_v25  ;;  %2770 = vmatpush3.bf16.msra.mxu1 %v2931_v26 }
  0x42   : > { %875 = vmatprep.subr.bf16.mxu0 %v2932_v27  ;;  %2771 = vmatprep.subr.bf16.mxu1 %v3096_v5 }
  0x45   : > { %876 = vmatpush1.bf16.msra.mxu0 %v2934_v29  ;;  %2772 = vmatpush3.bf16.msra.mxu1 %v2935_v30 }
  0x46   : > { %877 = vmatprep.subr.bf16.mxu0 %v2936_v31  ;;  %2773 = vmatprep.subr.bf16.mxu1 %v3096_v5 }
  0x49   : > { %878 = vmatpush1.bf16.msra.mxu0 %v2938_v32  ;;  %2774 = vmatpush3.bf16.msra.mxu1 %v2939_v33 }
  0x4a   : > { %2779 = vmatprep.subr.bf16.mxu0 %v3096_v5  ;;  %2785 = vmatprep.subr.bf16.mxu1 %v3096_v5 }
  0xb9   : > { %v659_v11 = vpop.xlane.xlu0 %658 }
  0xba   : > { %v661_v12 = vmul.f32 0.0078125, %v659_v11 }
  0xbc   : > { %v662_v13 = vsub.f32 %v3279_v1, %v661_v12 }
  0xbe   : > { %v663_v14 = vmul.f32 %v662_v13, %v662_v13 }
  0xc0   : > { %v664_v15 = vsel %vm656_vm0, %v663_v14, 0.0 }
  0xc1   : > { %665 = vadd.xlane.f32.xlu0 %v664_v15 }
 0x14e   : > { %v666_v34 = vpop.xlane.xlu0 %665 }
 0x14f   : > { %v667_v35 = vmul.f32 0.0078125, %v666_v34 }
 0x151   : > { %v668_v36 = vadd.f32 1e-05, %v667_v35 }
 0x153   : > { %3028 = vrsqrt.f32 %v668_v36 }
 0x15d   : > { %v3029_v37 = vpop.eup %3028 }
 0x15e   : > { %v670_v39 = vmul.f32 %v3029_v37, %v662_v13 }
 0x160   : > { %v677_v41 = vmul.f32 %v2559_v38, %v670_v39  ;;  %v2942_v38 = vld [vmem:[%s3223_s27 + $0x10] sm:$0xff]   ;;  %v2943_v39 = vld [vmem:[%s3223_s27 + $0x18] sm:$0xff]  }
 0x162   : > { %v684_v42 = vadd.f32 %v2560_v40, %v677_v41 }
 0x164   : > { %v685_v43 = vpack.c.bf16 %v684_v42, %v684_v42 }
 0x166   : > { %896 = vmatmul.mubr.bf16.vlgmr.msra.gmra.mrb[0].mxu0 %v685_v43  ;;  %2776 = vmatmul.mubr.bf16.vlgmr.msra.gmra.mrb[0].mxu1 %v685_v43 }
 0x167   : > { %2781 = vmatprep.mubr.msk.bf16.mxu0 %vm3098_vm1, %v3096_v5  ;;  %2787 = vmatprep.mubr.msk.bf16.mxu1 %vm3098_vm1, %v3096_v5 }
 0x239   : > { %v897_v55 = vpop.f32.mrb[0].mxu0  ;;  %v938_v56 = vpop.f32.mrb[0].mxu1 }
 0x23a   : > { %v939_v57 = vadd.f32 %v938_v56, %v731_v50  ;;  %v899_v58 = vpop.f32.mrb[1].mxu0  ;;  %v2777_v59 = vpop.f32.mrb[1].mxu1  ;;  %v898_v4 = vadd.f32 %v897_v55, %v723_v54 }
 0x23b   : > { %v900_v60 = vadd.f32 %v899_v58, %v727_v51  ;;  %v901_v61 = vpop.f32.mrb[2].mxu0  ;;  %v941_v62 = vpop.f32.mrb[2].mxu1  ;;  %v2941_v51 = vld [vmem:[%s3223_s27 + $0x8] sm:$0xff]  }
 0x23c   : > { %v3350_v0 = vpack.c.bf16 %v939_v57, %v939_v57  ;;  %v902_v2 = vpop.f32.mrb[3].mxu0  ;;  %v2778_v3 = vpop.f32.mrb[3].mxu1  ;;  %v3360_v9 = vpack.c.bf16 %v898_v4, %v898_v4 }
 0x23d   : > { %v3352_v6 = vpack.c.bf16 %v900_v60, %v900_v60 }
 0x23e   : > { %v1032_v7 = vand.u32 %v3348_v63, %v3350_v0 }
 0x23f   : > { %1079 = vrot.lane.b32.xlu1 %v3352_v6, %s3100_s25  ;;  %v968_v8 = vsel %vm963_vm4, %v3352_v6, 0 }
 0x240   : > { %2780 = vmatpush3.bf16.xpose.msra.mxu0 %v968_v8  ;;  %2786 = vmatpush3.bf16.msra.mxu1 %v1032_v7 }
 0x241   : > { %2791 = vmatprep.subr.bf16.mxu0 %v3096_v5  ;;  %2797 = vmatprep.subr.bf16.mxu1 %v3096_v5 }
 0x243   : > { %1076 = vrot.lane.b32.xlu1 %v3360_v9, %s3100_s25 }
 0x247   : > { %2782 = vmatmul.mubr.msk.bf16.vlgmr.msra.gmra.mrb[4].mxu0 %vm963_vm4, %v3360_v9 }
 0x248   : > { %2793 = vmatprep.mubr.msk.bf16.mxu0 %vm3098_vm1, %v3096_v5 }
 0x2b1   : > { %v1080_v10 = vpop.permute.xlu1 %1079 }
 0x2b2   : > { %v1085_v11 = vsel %vm963_vm4, %v1080_v10, 0 }
 0x2b3   : > { %2792 = vmatpush3.bf16.xpose.msra.mxu0 %v1085_v11 }
 0x2b4   : > { %2803 = vmatprep.subr.bf16.mxu0 %v3096_v5 }
 0x2b5   : > { %v1077_v12 = vpop.permute.xlu1 %1076 }
 0x2ba   : > { %2794 = vmatmul.mubr.msk.bf16.vlgmr.msra.gmra.mrb[8].mxu0 %vm963_vm4, %v1077_v12 }
 0x2bb   : > { %2807 = vmatprep.mubr.msk.bf16.mxu0 %vm3098_vm1, %v3096_v5  ;;  %2804 = vmatpush3.bf16.msra.mxu0 %v2942_v38 }
 0x2bc   : > { %2805 = vmatprep.subr.bf16.mxu0 %v3096_v5 }
 0x2bf   : > { %2806 = vmatpush3.bf16.msra.mxu0 %v2943_v39 }
 0x2c0   : > { %2819 = vmatprep.subr.bf16.mxu0 %v3096_v5 }
 0x31a   : > { %v1004_v13 = vpop.f32.mrb[4].mxu0 }
 0x31b   : > { %v2783_v14 = vpop.f32.mrb[5].mxu0  ;;  %v1011_v15 = vsel %vm1010_vm5, %v1004_v13, -inf }
 0x31c   : > { %1012 = vmax.xlane.f32.xlu0 %v1011_v15  ;;  %v1007_v16 = vpop.f32.mrb[6].mxu0 }
 0x31d   : > { %v2784_v17 = vpop.f32.mrb[7].mxu0 }
 0x38d   : > { %v1121_v18 = vpop.f32.mrb[8].mxu0 }
 0x38e   : > { %v2795_v19 = vpop.f32.mrb[9].mxu0  ;;  %v1127_v20 = vsel %vm1010_vm5, %v1121_v18, -inf }
 0x38f   : > { %1128 = vmax.xlane.f32.xlu1 %v1127_v20  ;;  %v1124_v21 = vpop.f32.mrb[10].mxu0 }
 0x390   : > { %v2796_v22 = vpop.f32.mrb[11].mxu0 }
 0x3a0   : > { %1299 = vrot.lane.b32.xlu1 %v3360_v9, %s3101_s23 }
 0x3a9   : > { %v1013_v23 = vpop.xlane.xlu0 %1012 }
 0x3aa   : > { %v1014_v24 = vsub.f32 %v1004_v13, %v1013_v23 }
 0x3ac   : > { %v1015_v25 = vmul.f32 1.442695, %v1014_v24 }
 0x3ae   : > { %3030 = vpow2.f32 %v1015_v25 }
 0x3b8   : > { %v3031_v26 = vpop.eup %3030 }
 0x3b9   : > { %v1017_v27 = vsel %vm1010_vm5, %v3031_v26, 0.0 }
 0x3ba   : > { %1018 = vadd.xlane.f32.xlu0 %v1017_v27 }
 0x41c   : > { %v1129_v29 = vpop.xlane.xlu1 %1128 }
 0x41d   : > { %v1130_v30 = vsub.f32 %v1121_v18, %v1129_v29  ;;  %v2944_v29 = vld [vmem:[%s3223_s27 + $0x20] sm:$0xff]  }
 0x41f   : > { %v1131_v31 = vmul.f32 1.442695, %v1130_v30 }
 0x420   : > { %v1300_v3 = vpop.permute.xlu1 %1299 }
 0x421   : > { %3032 = vpow2.f32 %v1131_v31 }
 0x42b   : > { %v3033_v32 = vpop.eup %3032 }
 0x42c   : > { %v1133_v33 = vsel %vm1010_vm5, %v3033_v32, 0.0 }
 0x42d   : > { %1134 = vadd.xlane.f32.xlu0 %v1133_v33 }
 0x443   : > { %1140 = vrot.lane.b32.xlu0 %v3350_v0, %s3100_s25 }
 0x447   : > { %v1019_v34 = vpop.xlane.xlu0 %1018  ;;  %1301 = vrot.lane.b32.xlu0 %v3352_v6, %s3101_s23 }
 0x448   : > { %3034 = vrcp.f32 %v1019_v34 }
 0x452   : > { %v3035_v35 = vpop.eup %3034 }
 0x453   : > { %v1021_v36 = vmul.f32 %v3035_v35, %v3031_v26  ;;  %v2945_v35 = vld [vmem:[%s3223_s27 + $0x28] sm:$0xff]  }
 0x455   : > { %v1022_v37 = vpack.c.bf16 %v1021_v36, %v1021_v36 }
 0x457   : > { %2788 = vmatmul.mubr.msk.bf16.vlgmr.msra.gmra.mrb[4].mxu1 %vm1023_vm6, %v1022_v37 }
 0x458   : > { %2799 = vmatprep.mubr.msk.bf16.mxu1 %vm3098_vm1, %v3096_v5 }
 0x4ba   : > { %v1135_v40 = vpop.xlane.xlu0 %1134 }
 0x4bb   : > { %3036 = vrcp.f32 %v1135_v40 }
 0x4be   : > { %v1141_v41 = vpop.permute.xlu0 %1140 }
 0x4bf   : > { %v1146_v42 = vand.u32 %v1141_v41, %v3348_v63 }
 0x4c1   : > { %2798 = vmatpush3.bf16.msra.mxu1 %v1146_v42 }
 0x4c2   : > { %2811 = vmatprep.subr.bf16.mxu1 %v3096_v5  ;;  %v1302_v57 = vpop.permute.xlu0 %1301 }
 0x4c3   : > { %v1307_v62 = vsel %vm963_vm4, %v1302_v57, 0  ;;  %v2946_v57 = vld [vmem:[%s3223_s27 + $0x30] sm:$0xff]  }
 0x4c5   : > { %v3037_v43 = vpop.eup %3036 }
 0x4c6   : > { %v1137_v44 = vmul.f32 %v3037_v43, %v3033_v32 }
 0x4c8   : > { %v1138_v50 = vpack.c.bf16 %v1137_v44, %v1137_v44 }
 0x4ca   : > { %2800 = vmatmul.mubr.msk.bf16.vlgmr.msra.gmra.mrb[8].mxu1 %vm1023_vm6, %v1138_v50 }
 0x4cb   : > { %2812 = vmatpush3.bf16.msra.mxu1 %v2940_v47  ;;  %2815 = vmatprep.mubr.msk.bf16.mxu1 %vm3098_vm1, %v3096_v5 }
 0x4cc   : > { %2813 = vmatprep.subr.bf16.mxu1 %v3096_v5 }
 0x4cf   : > { %2814 = vmatpush3.bf16.msra.mxu1 %v2941_v51 }
 0x4d0   : > { %2825 = vmatprep.subr.bf16.mxu1 %v3096_v5 }
 0x52a   : > { %v1068_v52 = vpop.f32.mrb[4].mxu1 }
 0x52b   : > { %v1074_v53 = vpack.c.bf16 %v1068_v52, %v1068_v52  ;;  %v2789_v54 = vpop.f32.mrb[5].mxu1 }
 0x52c   : > { %v1071_v55 = vpop.f32.mrb[6].mxu1 }
 0x52d   : > { %v2790_v56 = vpop.f32.mrb[7].mxu1  ;;  %2816 = vmatmul.mubr.msk.bf16.vlgmr.msra.gmra.mrb[12].mxu1 %vm963_vm4, %v1074_v53 }
 0x52e   : > { %2827 = vmatprep.mubr.msk.bf16.mxu1 %vm3098_vm1, %v3096_v5 }
 0x59d   : > { %v1182_v58 = vpop.f32.mrb[8].mxu1 }
 0x59e   : > { %v1188_v59 = vpack.c.bf16 %v1182_v58, %v1182_v58  ;;  %v2801_v60 = vpop.f32.mrb[9].mxu1 }
 0x59f   : > { %v1185_v61 = vpop.f32.mrb[10].mxu1 }
 0x5a0   : > { %v2802_v2 = vpop.f32.mrb[11].mxu1  ;;  %2808 = vmatmul.mubr.msk.bf16.vlgmr.msra.gmra.mrb[12].mxu0 %vm963_vm4, %v1188_v59 }
 0x5a1   : > { %2820 = vmatpush3.bf16.xpose.msra.mxu0 %v1307_v62  ;;  %2821 = vmatprep.mubr.msk.bf16.mxu0 %vm3098_vm1, %v3096_v5 }
 0x5a2   : > { %2831 = vmatprep.subr.bf16.mxu0 %v3096_v5 }
 0x5a8   : > { %2822 = vmatmul.mubr.msk.bf16.vlgmr.msra.gmra.mrb[16].mxu0 %vm963_vm4, %v1300_v3 }
 0x5a9   : > { %2835 = vmatprep.mubr.msk.bf16.mxu0 %vm3098_vm1, %v3096_v5  ;;  %2832 = vmatpush3.bf16.msra.mxu0 %v2944_v29  ;;  %v2965_v29 = vld [vmem:[%s3255_s0 + $0x4c] ss:$16 sps:$4 sm:$0xff]  }
 0x5aa   : > { %2833 = vmatprep.subr.bf16.mxu0 %v3096_v5 }
 0x5ad   : > { %2834 = vmatpush3.bf16.msra.mxu0 %v2945_v35  ;;  %v2968_v35 = vld [vmem:[%s3255_s0 + $0x64] ss:$16 sps:$4 sm:$0xff]  }
 0x5ae   : > { %2845 = vmatprep.subr.bf16.mxu0 %v3096_v5 }
 0x600   : > { %v1293_v4 = vpop.f32.mrb[12].mxu1 }
 0x601   : > { %v2817_v7 = vpop.f32.mrb[13].mxu1 }
 0x602   : > { %v1296_v8 = vpop.f32.mrb[14].mxu1 }
 0x603   : > { %v2818_v10 = vpop.f32.mrb[15].mxu1 }
 0x673   : > { %v1238_v11 = vpop.f32.mrb[12].mxu0 }
 0x674   : > { %v3412_v12 = vadd.f32 %v1293_v4, %v1238_v11  ;;  %v2809_v13 = vpop.f32.mrb[13].mxu0  ;;  %v2947_v4 = vld [vmem:[%s3223_s27 + $0x38] sm:$0xff]  }
 0x675   : > { %v1241_v14 = vpop.f32.mrb[14].mxu0 }
 0x676   : > { %v2810_v15 = vpop.f32.mrb[15].mxu0 }
 0x677   : > { %v2605_v15 = vld [vmem:[%s3609_s12] ss:$0 sm:$0xff] }
 0x67b   : > { %v1343_v16 = vpop.f32.mrb[16].mxu0 }
 0x67c   : > { %v2823_v17 = vpop.f32.mrb[17].mxu0  ;;  %v1349_v18 = vsel %vm1010_vm5, %v1343_v16, -inf }
 0x67d   : > { %1350 = vmax.xlane.f32.xlu0 %v1349_v18  ;;  %v1346_v19 = vpop.f32.mrb[18].mxu0 }
 0x67e   : > { %v2824_v20 = vpop.f32.mrb[19].mxu0 }
 0x67f   : > { %v2948_v20 = vld [vmem:[%s3255_s0] ss:$16 sps:$4 sm:$0xff]  }
 0x693   : > { %1361 = vrot.lane.b32.xlu0 %v3350_v0, %s3101_s23 }
 0x697   : > { %1466 = vrot.lane.b32.xlu0 %v3360_v9, %s3102_s22 }
 0x70a   : > { %v1351_v21 = vpop.xlane.xlu0 %1350 }
 0x70b   : > { %v1352_v22 = vsub.f32 %v1343_v16, %v1351_v21  ;;  %v2950_v21 = vld [vmem:[%s3255_s0 + $0x4] ss:$16 sps:$4 sm:$0xff]  }
 0x70d   : > { %v1353_v23 = vmul.f32 1.442695, %v1352_v22  ;;  %v2951_v22 = vld [vmem:[%s3255_s0 + $0x8] ss:$16 sps:$4 sm:$0xff]  }
 0x70e   : > { %v1362_v24 = vpop.permute.xlu0 %1361 }
 0x70f   : > { %3038 = vpow2.f32 %v1353_v23  ;;  %v1367_v25 = vand.u32 %v1362_v24, %v3348_v63  ;;  %v2953_v23 = vld [vmem:[%s3255_s0 + $0xc] ss:$16 sps:$4 sm:$0xff]   ;;  %v2956_v24 = vld [vmem:[%s3255_s0 + $0x24] ss:$16 sps:$4 sm:$0xff]  }
 0x711   : > { %2826 = vmatpush3.bf16.msra.mxu1 %v1367_v25  ;;  %v2959_v25 = vld [vmem:[%s3255_s0 + $0x2c] ss:$16 sps:$4 sm:$0xff]  }
 0x712   : > { %2839 = vmatprep.subr.bf16.mxu1 %v3096_v5 }
 0x719   : > { %v3039_v26 = vpop.eup %3038 }
 0x71a   : > { %v1355_v27 = vsel %vm1010_vm5, %v3039_v26, 0.0 }
 0x71b   : > { %1356 = vadd.xlane.f32.xlu1 %v1355_v27  ;;  %v2962_v27 = vld [vmem:[%s3255_s0 + $0x44] ss:$16 sps:$4 sm:$0xff]  }
 0x72c   : > { %1468 = vrot.lane.b32.xlu1 %v3352_v6, %s3102_s22  ;;  %v1467_v6 = vpop.permute.xlu0 %1466 }
 0x7a8   : > { %v1357_v9 = vpop.xlane.xlu1 %1356 }
 0x7a9   : > { %3040 = vrcp.f32 %v1357_v9  ;;  %v2960_v9 = vld [vmem:[%s3255_s0 + $0x40] ss:$16 sps:$4 sm:$0xff]  }
 0x7ac   : > { %v1469_v32 = vpop.permute.xlu1 %1468 }
 0x7ad   : > { %v1474_v34 = vsel %vm963_vm4, %v1469_v32, 0 }
 0x7b3   : > { %v3041_v30 = vpop.eup %3040 }
 0x7b4   : > { %v1359_v31 = vmul.f32 %v3041_v30, %v3039_v26  ;;  %v2957_v26 = vld [vmem:[%s3255_s0 + $0x28] ss:$16 sps:$4 sm:$0xff]  }
 0x7b5   : > { %v2963_v30 = vld [vmem:[%s3255_s0 + $0x48] ss:$16 sps:$4 sm:$0xff]  }
 0x7b6   : > { %v1360_v33 = vpack.c.bf16 %v1359_v31, %v1359_v31 }
 0x7b8   : > { %2828 = vmatmul.mubr.msk.bf16.vlgmr.msra.gmra.mrb[16].mxu1 %vm1023_vm6, %v1360_v33 }
 0x7b9   : > { %2840 = vmatpush3.bf16.xpose.msra.mxu1 %v1474_v34  ;;  %2841 = vmatprep.mubr.msk.bf16.mxu1 %vm3098_vm1, %v3096_v5 }
 0x7ba   : > { %2851 = vmatprep.subr.bf16.mxu1 %v3096_v5 }
 0x7c0   : > { %2842 = vmatmul.mubr.msk.bf16.vlgmr.msra.gmra.mrb[20].mxu1 %vm963_vm4, %v1467_v6 }
 0x7c1   : > { %2855 = vmatprep.mubr.msk.bf16.mxu1 %vm3098_vm1, %v3096_v5  ;;  %2852 = vmatpush3.bf16.msra.mxu1 %v2946_v57  ;;  %v2990_v57 = vld [vmem:[%s3255_s0 + $0xe0] ss:$16 sps:$4 sm:$0xff]  }
 0x7c2   : > { %2853 = vmatprep.subr.bf16.mxu1 %v3096_v5 }
 0x7c5   : > { %2854 = vmatpush3.bf16.msra.mxu1 %v2947_v4 }
 0x7c6   : > { %1927 = vmatprep.subr.bf16.mxu1 %v2953_v23  ;;  %v3011_v23 = vld [vmem:[%s3265_s28 + $0x98] sm:$0xff]  }
 0x88b   : > { %v1403_v36 = vpop.f32.mrb[16].mxu1 }
 0x88c   : > { %v1409_v37 = vpack.c.bf16 %v1403_v36, %v1403_v36  ;;  %v2829_v38 = vpop.f32.mrb[17].mxu1  ;;  %v2971_v36 = vld [vmem:[%s3255_s0 + $0x6c] ss:$16 sps:$4 sm:$0xff]  }
 0x88d   : > { %v1406_v39 = vpop.f32.mrb[18].mxu1  ;;  %v2969_v38 = vld [vmem:[%s3255_s0 + $0x68] ss:$16 sps:$4 sm:$0xff]  }
 0x88e   : > { %v2830_v40 = vpop.f32.mrb[19].mxu1  ;;  %2836 = vmatmul.mubr.msk.bf16.vlgmr.msra.gmra.mrb[20].mxu0 %vm963_vm4, %v1409_v37  ;;  %v2966_v37 = vld [vmem:[%s3255_s0 + $0x60] ss:$16 sps:$4 sm:$0xff]   ;;  %v2974_v39 = vld [vmem:[%s3255_s0 + $0x84] ss:$16 sps:$4 sm:$0xff]  }
 0x88f   : > { %2847 = vmatprep.mubr.msk.bf16.mxu0 %vm3098_vm1, %v3096_v5  ;;  %v2977_v40 = vld [vmem:[%s3255_s0 + $0x8c] ss:$16 sps:$4 sm:$0xff]  }
 0x893   : > { %v1510_v41 = vpop.f32.mrb[20].mxu1 }
 0x894   : > { %v2843_v42 = vpop.f32.mrb[21].mxu1  ;;  %v1516_v43 = vsel %vm1010_vm5, %v1510_v41, -inf }
 0x895   : > { %1517 = vmax.xlane.f32.xlu0 %v1516_v43  ;;  %v1513_v44 = vpop.f32.mrb[22].mxu1  ;;  %v2975_v42 = vld [vmem:[%s3255_s0 + $0x88] ss:$16 sps:$4 sm:$0xff]   ;;  %v2980_v43 = vld [vmem:[%s3255_s0 + $0xa4] ss:$16 sps:$4 sm:$0xff]  }
 0x896   : > { %v2844_v47 = vpop.f32.mrb[23].mxu1  ;;  %v2983_v44 = vld [vmem:[%s3255_s0 + $0xac] ss:$16 sps:$4 sm:$0xff]  }
 0x897   : > { %v2978_v47 = vld [vmem:[%s3255_s0 + $0xa0] ss:$16 sps:$4 sm:$0xff]  }
 0x8ab   : > { %1528 = vrot.lane.b32.xlu0 %v3350_v0, %s3102_s22 }
 0x922   : > { %v1518_v50 = vpop.xlane.xlu0 %1517 }
 0x923   : > { %v1519_v51 = vsub.f32 %v1510_v41, %v1518_v50  ;;  %v2972_v41 = vld [vmem:[%s3255_s0 + $0x80] ss:$16 sps:$4 sm:$0xff]   ;;  %v2981_v50 = vld [vmem:[%s3255_s0 + $0xa8] ss:$16 sps:$4 sm:$0xff]  }
 0x925   : > { %v1520_v52 = vmul.f32 1.442695, %v1519_v51  ;;  %v2986_v51 = vld [vmem:[%s3255_s0 + $0xc4] ss:$16 sps:$4 sm:$0xff]  }
 0x926   : > { %v1529_v53 = vpop.permute.xlu0 %1528 }
 0x927   : > { %3042 = vpow2.f32 %v1520_v52  ;;  %v1534_v54 = vand.u32 %v1529_v53, %v3348_v63  ;;  %v2989_v52 = vld [vmem:[%s3255_s0 + $0xcc] ss:$16 sps:$4 sm:$0xff]   ;;  %v2984_v53 = vld [vmem:[%s3255_s0 + $0xc0] ss:$16 sps:$4 sm:$0xff]  }
 0x929   : > { %2846 = vmatpush3.bf16.msra.mxu0 %v1534_v54  ;;  %v2987_v54 = vld [vmem:[%s3255_s0 + $0xc8] ss:$16 sps:$4 sm:$0xff]  }
 0x92a   : > { %1886 = vmatprep.subr.bf16.mxu0 %v2950_v21  ;;  %v3009_v21 = vld [vmem:[%s3265_s28 + $0xd8] sm:$0xff]  }
 0x931   : > { %v3043_v55 = vpop.eup %3042 }
 0x932   : > { %v1522_v56 = vsel %vm1010_vm5, %v3043_v55, 0.0 }
 0x933   : > { %1523 = vadd.xlane.f32.xlu1 %v1522_v56  ;;  %v2995_v56 = vld [vmem:[%s3255_s0 + $0xec] ss:$16 sps:$4 sm:$0xff]  }
 0x961   : > { %v1459_v58 = vpop.f32.mrb[20].mxu0 }
 0x962   : > { %v1465_v0 = vadd.f32 %v1459_v58, %v3412_v12  ;;  %v2837_v59 = vpop.f32.mrb[21].mxu0  ;;  %v2993_v58 = vld [vmem:[%s3255_s0 + $0xe8] ss:$16 sps:$4 sm:$0xff]  }
 0x963   : > { %v1462_v60 = vpop.f32.mrb[22].mxu0 }
 0x964   : > { %v2838_v61 = vpop.f32.mrb[23].mxu0 }
 0x9c0   : > { %v1524_v62 = vpop.xlane.xlu1 %1523 }
 0x9c1   : > { %3044 = vrcp.f32 %v1524_v62  ;;  %v2606_v62 = vld [vmem:[%s3610_s30] ss:$0 sm:$0xff] }
 0x9cb   : > { %v3045_v2 = vpop.eup %3044 }
 0x9cc   : > { %v1526_v63 = vmul.f32 %v3045_v2, %v3043_v55  ;;  %v2992_v55 = vld [vmem:[%s3255_s0 + $0xe4] ss:$16 sps:$4 sm:$0xff]  }
 0x9ce   : > { %v1527_v3 = vpack.c.bf16 %v1526_v63, %v1526_v63  ;;  %v2607_v63 = vld [vmem:[%s3612_s18] ss:$0 sm:$0xff] }
 0x9d0   : > { %2848 = vmatmul.mubr.msk.bf16.vlgmr.msra.gmra.mrb[24].mxu0 %vm1023_vm6, %v1527_v3 }
 0x9d1   : > { %1918 = vmatprep.mubr.bf16.mxu0 %v3097_v28  ;;  %1887 = vmatpush1.bf16.msra.mxu0 %v2948_v20  ;;  %v3008_v20 = vld [vmem:[%s3265_s28 + $0x58] sm:$0xff]  }
 0x9d2   : > { %1888 = vmatprep.subr.bf16.mxu0 %v2956_v24  ;;  %v3012_v24 = vld [vmem:[%s3265_s28 + $0x60] sm:$0xff]  }
 0xaa3   : > { %v1570_v7 = vpop.f32.mrb[24].mxu0 }
 0xaa4   : > { %v1576_v5 = vpack.c.bf16 %v1570_v7, %v1570_v7  ;;  %v2849_v8 = vpop.f32.mrb[25].mxu0 }
 0xaa5   : > { %v1573_v10 = vpop.f32.mrb[26].mxu0  ;;  %v2997_v8 = vld [vmem:[%s3265_s28 + $0xc0] sm:$0xff]  }
 0xaa6   : > { %v2850_v11 = vpop.f32.mrb[27].mxu0  ;;  %2856 = vmatmul.mubr.msk.bf16.vlgmr.msra.gmra.mrb[24].mxu1 %vm963_vm4, %v1576_v5  ;;  %v2996_v5 = vld [vmem:[%s3265_s28 + $0x40] sm:$0xff]  }
 0xaa7   : > { %1959 = vmatprep.mubr.bf16.mxu1 %v3097_v28  ;;  %1928 = vmatpush1.bf16.msra.mxu1 %v2951_v22  ;;  %v2998_v10 = vld [vmem:[%s3265_s28] sm:$0xff]   ;;  %v3010_v22 = vld [vmem:[%s3265_s28 + $0x18] sm:$0xff]  }
 0xaa8   : > { %1929 = vmatprep.subr.bf16.mxu1 %v2959_v25  ;;  %v2999_v11 = vld [vmem:[%s3265_s28 + $0x80] sm:$0xff]  }
 0xaa9   : > { %v3013_v25 = vld [vmem:[%s3265_s28 + $0xe0] sm:$0xff]  }
 0xaab   : > { %1930 = vmatpush1.bf16.msra.mxu1 %v2957_v26  ;;  %v3015_v26 = vld [vmem:[%s3265_s28 + $0xa0] sm:$0xff]  }
 0xaac   : > { %1931 = vmatprep.subr.bf16.mxu1 %v2965_v29  ;;  %v3017_v29 = vld [vmem:[%s3265_s28 + $0xe8] sm:$0xff]  }
 0xaaf   : > { %1932 = vmatpush1.bf16.msra.mxu1 %v2963_v30  ;;  %v3019_v30 = vld [vmem:[%s3265_s28 + $0xa8] sm:$0xff]  }
 0xab0   : > { %1933 = vmatprep.subr.bf16.mxu1 %v2971_v36  ;;  %v3026_v36 = vld [vmem:[%s3265_s28 + $0x38] sm:$0xff]  }
 0xab3   : > { %1934 = vmatpush1.bf16.msra.mxu1 %v2969_v38  ;;  %v1704_v38 = vld [vmem:[%s3260_s20] sm:$0xf] }
 0xab4   : > { %1935 = vmatprep.subr.bf16.mxu1 %v2977_v40  ;;  %v1709_v40 = vrot.slane %v1704_v38, %v722_v49 }
 0xab7   : > { %1936 = vmatpush1.bf16.msra.mxu1 %v2975_v42  ;;  %v1713_v42 = vrot.slane %v1704_v38, %v726_v48 }
 0xab8   : > { %1937 = vmatprep.subr.bf16.mxu1 %v2983_v44 }
 0xabb   : > { %1938 = vmatpush1.bf16.msra.mxu1 %v2981_v50 }
 0xabc   : > { %1939 = vmatprep.subr.bf16.mxu1 %v2989_v52 }
 0xabf   : > { %1940 = vmatpush1.bf16.msra.mxu1 %v2987_v54 }
 0xac0   : > { %1941 = vmatprep.subr.bf16.mxu1 %v2995_v56 }
 0xac3   : > { %1942 = vmatpush1.bf16.msra.mxu1 %v2993_v58 }
 0xac4   : > { %2737 = vmatprep.subr.bf16.mxu1 %v2997_v8 }
 0xb79   : > { %v1626_v12 = vpop.f32.mrb[24].mxu1 }
 0xb7a   : > { %v1632_v13 = vadd.f32 %v1626_v12, %v1465_v0  ;;  %v2857_v14 = vpop.f32.mrb[25].mxu1  ;;  %v3000_v12 = vld [vmem:[%s3265_s28 + $0x48] sm:$0xff]  }
 0xb7b   : > { %v1629_v16 = vpop.f32.mrb[26].mxu1  ;;  %v3002_v14 = vld [vmem:[%s3265_s28 + $0x8] sm:$0xff]  }
 0xb7c   : > { %v1633_v17 = vadd.f32 %v1632_v13, %v3279_v1  ;;  %v2858_v18 = vpop.f32.mrb[27].mxu1  ;;  %v2954_v1 = vld [vmem:[%s3255_s0 + $0x20] ss:$16 sps:$4 sm:$0xff]   ;;  %v3001_v13 = vld [vmem:[%s3265_s28 + $0xc8] sm:$0xff]  }
 0xb7d   : > { %1889 = vmatpush1.bf16.msra.mxu0 %v2954_v1  ;;  %v3004_v16 = vld [vmem:[%s3265_s28 + $0x50] sm:$0xff]   ;;  %v3014_v1 = vld [vmem:[%s3265_s28 + $0x20] sm:$0xff]  }
 0xb7e   : > { %v3458_v19 = vadd.f32 %v2605_v15, %v1633_v17  ;;  %1890 = vmatprep.subr.bf16.mxu0 %v2962_v27  ;;  %v3003_v15 = vld [vmem:[%s3265_s28 + $0x88] sm:$0xff]   ;;  %v3005_v17 = vld [vmem:[%s3265_s28 + $0xd0] sm:$0xff]  }
 0xb7f   : > { %v3006_v18 = vld [vmem:[%s3265_s28 + $0x10] sm:$0xff]   ;;  %v3016_v27 = vld [vmem:[%s3265_s28 + $0x68] sm:$0xff]  }
 0xb80   : > { %v1644_v28 = vsel %vm656_vm0, %v3458_v19, 0.0 }
 0xb81   : > { %1645 = vadd.xlane.f32.xlu1 %v1644_v28  ;;  %1891 = vmatpush1.bf16.msra.mxu0 %v2960_v9  ;;  %v3007_v28 = vld [vmem:[%s3265_s28 + $0x90] sm:$0xff]   ;;  %v3018_v9 = vld [vmem:[%s3265_s28 + $0x28] sm:$0xff]  }
 0xb82   : > { %1892 = vmatprep.subr.bf16.mxu0 %v2968_v35  ;;  %v3025_v35 = vld [vmem:[%s3265_s28 + $0xf8] sm:$0xff]  }
 0xb85   : > { %1893 = vmatpush1.bf16.msra.mxu0 %v2966_v37  ;;  %v3027_v37 = vld [vmem:[%s3265_s28 + $0xb8] sm:$0xff]  }
 0xb86   : > { %1894 = vmatprep.subr.bf16.mxu0 %v2974_v39  ;;  %v1720_v39 = vsub.s32 3, %v3336_v45 }
 0xb89   : > { %1895 = vmatpush1.bf16.msra.mxu0 %v2972_v41  ;;  %v1717_v41 = vrot.slane %v1704_v38, %v730_v46 }
 0xb8a   : > { %1896 = vmatprep.subr.bf16.mxu0 %v2980_v43  ;;  %v1721_v43 = vrot.slane %v1704_v38, %v1720_v39 }
 0xb8d   : > { %1897 = vmatpush1.bf16.msra.mxu0 %v2978_v47 }
 0xb8e   : > { %1898 = vmatprep.subr.bf16.mxu0 %v2986_v51 }
 0xb91   : > { %1899 = vmatpush1.bf16.msra.mxu0 %v2984_v53 }
 0xb92   : > { %1900 = vmatprep.subr.bf16.mxu0 %v2992_v55 }
 0xb95   : > { %1901 = vmatpush1.bf16.msra.mxu0 %v2990_v57 }
 0xb96   : > { %2715 = vmatprep.subr.bf16.mxu0 %v2996_v5 }
 0xc0e   : > { %v1646_v31 = vpop.xlane.xlu1 %1645 }
 0xc0f   : > { %v1647_v32 = vmul.f32 0.0078125, %v1646_v31  ;;  %v3020_v31 = vld [vmem:[%s3265_s28 + $0x70] sm:$0xff]  }
 0xc11   : > { %v1648_v33 = vsub.f32 %v3458_v19, %v1647_v32  ;;  %v3021_v32 = vld [vmem:[%s3265_s28 + $0xf0] sm:$0xff]  }
 0xc13   : > { %v1649_v34 = vmul.f32 %v1648_v33, %v1648_v33 }
 0xc15   : > { %v1650_v6 = vsel %vm656_vm0, %v1649_v34, 0.0  ;;  %v3023_v34 = vld [vmem:[%s3265_s28 + $0xb0] sm:$0xff]  }
 0xc16   : > { %1651 = vadd.xlane.f32.xlu1 %v1650_v6  ;;  %v3024_v6 = vld [vmem:[%s3265_s28 + $0x78] sm:$0xff]  }
 0xca3   : > { %v1652_v0 = vpop.xlane.xlu1 %1651 }
 0xca4   : > { %v1653_v59 = vmul.f32 0.0078125, %v1652_v0 }
 0xca6   : > { %v1654_v60 = vadd.f32 1e-05, %v1653_v59 }
 0xca8   : > { %3046 = vrsqrt.f32 %v1654_v60 }
 0xcb2   : > { %v3047_v61 = vpop.eup %3046 }
 0xcb3   : > { %v1656_v2 = vmul.f32 %v3047_v61, %v1648_v33  ;;  %v3022_v33 = vld [vmem:[%s3265_s28 + $0x30] sm:$0xff]  }
 0xcb5   : > { %v1663_v3 = vmul.f32 %v2606_v62, %v1656_v2 }
 0xcb7   : > { %v1670_v4 = vadd.f32 %v2607_v63, %v1663_v3 }
 0xcb9   : > { %v1671_v7 = vpack.c.bf16 %v1670_v4, %v1670_v4 }
 0xcbb   : > { %1919 = vmatmul.mubr.bf16.vlgmr.msra.gmra.mrb[28].mxu0 %v1671_v7  ;;  %1960 = vmatmul.mubr.bf16.vlgmr.msra.gmra.mrb[28].mxu1 %v1671_v7 }
 0xcbc   : > { %2716 = vmatpush3.bf16.msra.mxu0 %v2998_v10  ;;  %2738 = vmatpush3.bf16.msra.mxu1 %v2999_v11 }
 0xcbd   : > { %2717 = vmatprep.subr.bf16.mxu0 %v3000_v12  ;;  %2739 = vmatprep.subr.bf16.mxu1 %v3001_v13 }
 0xcc0   : > { %2718 = vmatpush3.bf16.msra.mxu0 %v3002_v14  ;;  %2740 = vmatpush3.bf16.msra.mxu1 %v3003_v15 }
 0xcc1   : > { %2719 = vmatprep.subr.bf16.mxu0 %v3004_v16  ;;  %2741 = vmatprep.subr.bf16.mxu1 %v3005_v17 }
 0xcc4   : > { %2720 = vmatpush3.bf16.msra.mxu0 %v3006_v18  ;;  %2742 = vmatpush3.bf16.msra.mxu1 %v3007_v28 }
 0xcc5   : > { %2721 = vmatprep.subr.bf16.mxu0 %v3008_v20  ;;  %2743 = vmatprep.subr.bf16.mxu1 %v3009_v21 }
 0xcc8   : > { %2722 = vmatpush3.bf16.msra.mxu0 %v3010_v22  ;;  %2744 = vmatpush3.bf16.msra.mxu1 %v3011_v23 }
 0xcc9   : > { %2723 = vmatprep.subr.bf16.mxu0 %v3012_v24  ;;  %2745 = vmatprep.subr.bf16.mxu1 %v3013_v25 }
 0xccc   : > { %2724 = vmatpush3.bf16.msra.mxu0 %v3014_v1  ;;  %2746 = vmatpush3.bf16.msra.mxu1 %v3015_v26 }
 0xccd   : > { %2725 = vmatprep.subr.bf16.mxu0 %v3016_v27  ;;  %2747 = vmatprep.subr.bf16.mxu1 %v3017_v29 }
 0xcd0   : > { %2726 = vmatpush3.bf16.msra.mxu0 %v3018_v9  ;;  %2748 = vmatpush3.bf16.msra.mxu1 %v3019_v30 }
 0xcd1   : > { %2727 = vmatprep.subr.bf16.mxu0 %v3020_v31  ;;  %2749 = vmatprep.subr.bf16.mxu1 %v3021_v32 }
 0xcd4   : > { %2728 = vmatpush3.bf16.msra.mxu0 %v3022_v33  ;;  %2750 = vmatpush3.bf16.msra.mxu1 %v3023_v34 }
 0xcd5   : > { %2729 = vmatprep.subr.bf16.mxu0 %v3024_v6  ;;  %2751 = vmatprep.subr.bf16.mxu1 %v3025_v35  ;;  %v2640_v35 = vld [vmem:[%s641_s21] ss:$0 sm:$0xff] }
 0xcd8   : > { %2730 = vmatpush3.bf16.msra.mxu0 %v3026_v36  ;;  %2752 = vmatpush3.bf16.msra.mxu1 %v3027_v37 }
 0xd8e   : > { %v1920_v44 = vpop.f32.mrb[28].mxu0  ;;  %v1961_v47 = vpop.f32.mrb[28].mxu1 }
 0xd8f   : > { %v1921_v50 = vadd.f32 %v1920_v44, %v1709_v40  ;;  %v1962_v51 = vadd.f32 %v1961_v47, %v1717_v41  ;;  %v1922_v52 = vpop.f32.mrb[29].mxu0  ;;  %v1963_v53 = vpop.f32.mrb[29].mxu1 }
 0xd90   : > { %v1923_v54 = vadd.f32 %v1922_v52, %v1713_v42  ;;  %v1964_v55 = vadd.f32 %v1963_v53, %v1721_v43  ;;  %v1924_v56 = vpop.f32.mrb[30].mxu0  ;;  %v1965_v57 = vpop.f32.mrb[30].mxu1 }
 0xd91   : > { %v1968_v58 = vmul.f32 %v1921_v50, %v1921_v50  ;;  %v1970_v0 = vmul.f32 %v1962_v51, %v1962_v51  ;;  %v1925_v49 = vpop.f32.mrb[31].mxu0  ;;  %v1966_v59 = vpop.f32.mrb[31].mxu1 }
 0xd92   : > { %v1969_v60 = vmul.f32 %v1923_v54, %v1923_v54  ;;  %v1971_v46 = vmul.f32 %v1964_v55, %v1964_v55 }
 0xd93   : > { %v1972_v61 = vmul.f32 %v1968_v58, %v1921_v50  ;;  %v1974_v45 = vmul.f32 %v1970_v0, %v1962_v51 }
 0xd94   : > { %v1973_v48 = vmul.f32 %v1969_v60, %v1923_v54  ;;  %v1975_v62 = vmul.f32 %v1971_v46, %v1964_v55 }
 0xd95   : > { %v1976_v2 = vmul.f32 0.044715, %v1972_v61  ;;  %v1978_v63 = vmul.f32 0.044715, %v1974_v45 }
 0xd96   : > { %v1977_v3 = vmul.f32 0.044715, %v1973_v48  ;;  %v1979_v4 = vmul.f32 0.044715, %v1975_v62 }
 0xd97   : > { %v1980_v7 = vadd.f32 %v1976_v2, %v1921_v50  ;;  %v1982_v5 = vadd.f32 %v1978_v63, %v1962_v51 }
 0xd98   : > { %v1981_v8 = vadd.f32 %v1977_v3, %v1923_v54  ;;  %v1983_v10 = vadd.f32 %v1979_v4, %v1964_v55 }
 0xd99   : > { %v1984_v11 = vmul.f32 0.7978846, %v1980_v7  ;;  %v1986_v12 = vmul.f32 0.7978846, %v1982_v5 }
 0xd9a   : > { %v1985_v13 = vmul.f32 0.7978846, %v1981_v8  ;;  %v1987_v14 = vmul.f32 0.7978846, %v1983_v10 }
 0xd9b   : > { %3048 = vtanh.f32 %v1984_v11 }
 0xd9c   : > { %3050 = vtanh.f32 %v1986_v12 }
 0xd9d   : > { %3052 = vtanh.f32 %v1985_v13 }
 0xd9e   : > { %3054 = vtanh.f32 %v1987_v14 }
 0xda5   : > { %v3049_v15 = vpop.eup %3048 }
 0xda6   : > { %v3051_v16 = vpop.eup %3050  ;;  %v1992_v17 = vadd.f32 1.0, %v3049_v15 }
 0xda7   : > { %v3053_v18 = vpop.eup %3052  ;;  %v1994_v28 = vadd.f32 1.0, %v3051_v16 }
 0xda8   : > { %v3055_v20 = vpop.eup %3054  ;;  %v1993_v21 = vadd.f32 1.0, %v3053_v18  ;;  %v1996_v22 = vmul.f32 0.5, %v1992_v17 }
 0xda9   : > { %v1995_v23 = vadd.f32 1.0, %v3055_v20  ;;  %v1998_v24 = vmul.f32 0.5, %v1994_v28 }
 0xdaa   : > { %v1997_v25 = vmul.f32 0.5, %v1993_v21  ;;  %v2000_v26 = vmul.f32 %v1996_v22, %v1921_v50 }
 0xdab   : > { %v1999_v1 = vmul.f32 0.5, %v1995_v23  ;;  %v2002_v29 = vmul.f32 %v1998_v24, %v1962_v51 }
 0xdac   : > { %v2001_v27 = vmul.f32 %v1997_v25, %v1923_v54  ;;  %v2004_v32 = vpack.c.bf16 %v2000_v26, %v2000_v26 }
 0xdad   : > { %v2003_v9 = vmul.f32 %v1999_v1, %v1964_v55  ;;  %v2006_v33 = vpack.c.bf16 %v2002_v29, %v2002_v29 }
 0xdae   : > { %v2005_v30 = vpack.c.bf16 %v2001_v27, %v2001_v27 }
 0xdaf   : > { %v2007_v31 = vpack.c.bf16 %v2003_v9, %v2003_v9 }
 0xdb0   : > { %2303 = vmatprep.mubr.bf16.mxu0 %v2005_v30 }
 0xdb1   : > { %2343 = vmatprep.mubr.bf16.mxu1 %v2007_v31  ;;  %2304 = vmatmul.mubr.bf16.vlgmr.msra.gmra.mrb[32].mxu0 %v2004_v32 }
 0xdb2   : > { %2344 = vmatmul.mubr.bf16.vlgmr.msra.gmra.mrb[32].mxu1 %v2006_v33 }
 0xe84   : > { %v2731_v34 = vpop.f32.mrb[32].mxu0 }
 0xe85   : > { %v2753_v6 = vpop.f32.mrb[32].mxu1  ;;  %v2732_v36 = vpop.f32.mrb[33].mxu0 }
 0xe86   : > { %v2733_v37 = vadd.f32 %v2732_v36, %v2731_v34  ;;  %v2754_v38 = vpop.f32.mrb[33].mxu1  ;;  %v2734_v39 = vpop.f32.mrb[34].mxu0 }
 0xe87   : > { %v2755_v40 = vadd.f32 %v2754_v38, %v2753_v6  ;;  %v2756_v41 = vpop.f32.mrb[34].mxu1  ;;  %v2735_v42 = vpop.f32.mrb[35].mxu0 }
 0xe88   : > { %v2306_v43 = vadd.f32 %v2733_v37, %v2640_v35  ;;  %v2757_v44 = vpop.f32.mrb[35].mxu1 }
 0xe8a   : > { %v2346_v47 = vadd.f32 %v2755_v40, %v2306_v43 }
 0xe8c   : > { %v2351_v50 = vadd.f32 %v2346_v47, %v3458_v19 }
 0xe8e   : > { %2352 = vst [vmem:[%s3274_s17] sm:$0x1f] %v2351_v50 }
 0xe8f PF: > { %s3614_s2 = sld [smem:[#allocation5_spill]]  ;;  %s3615_s25 = sld [smem:[#allocation3_spill]] }
 0xe90   : > { %s3616_s26 = sld [smem:[#allocation4_spill]]  ;;  %s3617_s27 = sld [smem:[#allocation6_spill]] }
 0xe91   : > { %s3618_s28 = sld [smem:[#allocation7_spill]] }
 0xe95   : > { %s23_s29 = sadd.s32 1, %s3614_s2  }
 0xe96   : > { %p20_p8 = scmp.ge.s32.totalorder %s23_s29, 6  }
 0xe98   :  { %22 = sbr.rel (!%p20_p8) target bundleno = 8 (0x8), region = 142 }

// kernel: clip_forward.6
= control target key start
LH: loop header
LB: loop body
LE: loop exit
PB: predicated region body
PF: predicated region fallthrough
CT: control target
= control target key end

     0   :  { %s3226_s29 = smov 0   ;;  %s3228_s30 = smov 0   ;;  %s3634_s0 = inlined_call_operand.vmem [shape: f32[2,8,128], index: 0, kind: input, shape index: {}]   ;;  %s3635_s1 = inlined_call_operand.vmem [shape: f32[2,1,8], index: 1, kind: input, shape index: {}]   ;;  %s3636_s2 = inlined_call_operand.vmem [shape: bf16[2,128,384], index: 2, kind: input, shape index: {}]   ;;  %s3637_s3 = inlined_call_operand.vmem [shape: f32[2,1,384], index: 3, kind: input, shape index: {}]   ;;  %s3638_s4 = inlined_call_operand.vmem [shape: bf16[2,4,32,128], index: 4, kind: input, shape index: {}]   ;;  %s3639_s5 = inlined_call_operand.vmem [shape: f32[2,1,128], index: 5, kind: input, shape index: {}]   ;;  %s3640_s6 = inlined_call_operand.vmem [shape: f32[2,1,128], index: 6, kind: input, shape index: {}]   ;;  %s3641_s7 = inlined_call_operand.vmem [shape: f32[2,1,128], index: 7, kind: input, shape index: {}]   ;;  %s3642_s8 = inlined_call_operand.vmem [shape: f32[2,1,128], index: 8, kind: input, shape index: {}]   ;;  %s3643_s9 = inlined_call_operand.vmem [shape: f32[2,1,128], index: 9, kind: input, shape index: {}]   ;;  %s3644_s10 = inlined_call_operand.vmem [shape: bf16[2,128,512], index: 10, kind: input, shape index: {}]   ;;  %s3645_s11 = inlined_call_operand.vmem [shape: f32[2,1,512], index: 11, kind: input, shape index: {}]   ;;  %s3646_s12 = inlined_call_operand.vmem [shape: bf16[2,512,128], index: 12, kind: input, shape index: {}]   ;;  %s3647_s13 = inlined_call_operand.vmem [shape: f32[2,1,128], index: 13, kind: input, shape index: {}]   ;;  %s3648_s14 = inlined_call_operand.vmem [shape: f32[2,8,128], index: 14, kind: output, shape index: {}]  }
   0x1   :  { %3654 = sst [smem:[#allocation9_spill]] %s3634_s0  ;;  %s3230_s15 = smov 0  }
   0x2   :  { %3655 = sst [smem:[#allocation10_spill]] %s3635_s1  ;;  %s3232_s16 = smov 0  }
   0x3   :  { %3656 = sst [smem:[#allocation11_spill]] %s3636_s2  ;;  %s3234_s17 = smov 0  }
   0x4   :  { %3657 = sst [smem:[#allocation12_spill]] %s3637_s3 }
   0x5   :  { %3658 = sst [smem:[#allocation13_spill]] %s3638_s4 }
   0x6   :  { %3659 = sst [smem:[#allocation14_spill]] %s3643_s9 }
   0x7   :  { %3660 = sst [smem:[#allocation15_spill]] %s3647_s13 }
   0x8   :  { %3661 = sst [smem:[#allocation16_spill]] %s3648_s14 }
   0x9 LB: > { %3662 = sst [smem:[#allocation2_spill]] %s3127_s29  ;;  %s33_s18 = sadd.s32 1, %s3135_s15  ;;  %s3143_s17 = sphi %s3234_s17, %s24_s17   ;;  %s3139_s16 = sphi %s3232_s16, %s3692_s16   ;;  %s3135_s15 = sphi %s3230_s15, %s3691_s15   ;;  %s3131_s30 = sphi %s3228_s30, %s3690_s30   ;;  %s3127_s29 = sphi %s3226_s29, %s3689_s29  }
   0xa   : > { %3663 = sst [smem:[#allocation3_spill]] %s3135_s15  ;;  %s36_s19 = sadd.s32 1, %s3139_s16 }
   0xb   : > { %3664 = sst [smem:[#allocation4_spill]] %s3139_s16  ;;  %p34_p0 = scmp.ge.s32.totalorder %s33_s18, 2 }
   0xc   : > { %3665 = sst [smem:[#allocation5_spill]] %s3143_s17  ;;  %p2597_p1 = scmp.ge.s32.totalorder %s3143_s17, 1 }
   0xd   : > { %p537_p2 = scmp.lt.s32.totalorder %s3143_s17, 5  ;;  %s3694_s18 = smov (%p34_p0, %s33_s18), 0 }
   0xe   : > { %3666 = sst [smem:[#allocation6_spill]] %s3694_s18  ;;  %s3696_s19 = smov (!%p34_p0, %s36_s19), %s3139_s16 }
   0xf   : > { %p538_p3 = pnand %p2597_p1, %p537_p2  ;;  %p38_p4 = scmp.ge.s32.totalorder %s3696_s19, 2 }
  0x11   : > { %s3698_s19 = smov (%p38_p4, %s3696_s19), 0  ;;  %541 = sbr.rel (%p538_p3) target bundleno = 3739 (0xe9b), region = 76 }
  0x12   : > { %3667 = sst [smem:[#allocation7_spill]] %s3698_s19 }
  0x18   : > { %p630_p5 = scmp.lt.s32.totalorder %s3131_s30, 1  ;;  %p637_p6 = scmp.lt.s32.totalorder %s3127_s29, 1 }
  0x19   : > { %s3670_s0 = sld [smem:[#allocation9_spill]]  ;;  %s3671_s2 = sld [smem:[#allocation11_spill]] }
  0x1a   : > { %s3700_s30 = smov (!%p630_p5, %s3131_s30), 1  ;;  %s3672_s4 = sld [smem:[#allocation13_spill]] }
  0x1b   : > { %3668 = sst [smem:[#allocation8_spill]] %s3700_s30  ;;  %s2598_s21 = sshll.u32 %s3700_s30, 3 }
  0x1c   : > { %s3262_s20 = scalar_select %p637_p6, %s3127_s29, 1 }
  0x1d   : > { %s3673_s3 = sld [smem:[#allocation12_spill]]  ;;  %s3675_s22 = sld [smem:[#allocation15_spill]] }
  0x1e   : > { %s2909_s28 = smul.u32 192, %s3262_s20  ;;  %s2725_s18 = sshll.u32 %s3262_s20, 6 }
  0x1f   : > { %s633_s27 = scalar_lea.vmem %s3670_s0, %s2598_s21  ;;  %s2910_s19 = smul.u32 3, %s3262_s20 }
  0x20   : > { %s3278_s17 = scalar_lea.vmem %s3671_s2, %s2909_s28  ;;  %s3283_s13 = scalar_lea.vmem %s3672_s4, %s2725_s18 }
  0x21   : > { %s2726_s23 = sshll.u32 %s3262_s20, 8  ;;  %s3676_s9 = sld [smem:[#allocation16_spill]] }
  0x22   : > { %s3315_s0 = scalar_lea.vmem %s3644_s10, %s2726_s23  ;;  %s3325_s14 = scalar_lea.vmem %s3646_s12, %s2726_s23 }
  0x23   : > { %s3288_s24 = scalar_lea.vmem %s3673_s3, %s2910_s19  ;;  %s2604_s3 = sshll.u32 %s3262_s20, 2 }
  0x24   : > { %s3320_s16 = scalar_lea.vmem %s3645_s11, %s2604_s3  ;;  %s682_s19 = scalar_lea.vmem %s3675_s22, %s3262_s20 }
  0x25   : > { %s3677_s26 = sld [smem:[#allocation2_spill]] }
  0x27   : > { %s3334_s25 = scalar_lea.vmem %s3676_s9, %s2598_s21 }
  0x2b   : > { %p2608_p7 = scmp.ne.s32.totalorder %s3677_s26, 0 }
  0x2c   : > { %v692_v0 = vld [vmem:[%s633_s27] sm:$0xff] (!%p2608_p7) }
  0x2d   : > { %691 = sbr.rel (%p2608_p7) target bundleno = 52 (0x34), region = 80  ;;  %693 = vst [vmem:[%s3334_s25] sm:$0xff] (!%p2608_p7), %v692_v0 }
  0x34 PF: > { %v3339_v1 = vld [vmem:[%s3334_s25] sm:$0xff]  ;;  %v3145_v4 = vmov 0.0   ;;  %v2960_v5 = vld [vmem:[%s3278_s17 + $0x8] ss:$12 sps:$4 sm:$0xff]   ;;  %v2967_v14 = vld [vmem:[%s3278_s17 + $0x30] ss:$12 sps:$4 sm:$0xff]   ;;  %s3678_s9 = scalar_lea.vmem %s3640_s6, %s3262_s20  ;;  %s3679_s27 = scalar_lea.vmem %s3641_s7, %s3262_s20  ;;  %v758_v42 = vlaneseq }
  0x35   : > { %697 = vadd.xlane.f32.xlu0 %v3339_v1  ;;  %v2957_v2 = vld [vmem:[%s3278_s17 + $0x4] ss:$12 sps:$4 sm:$0xff]   ;;  %v2959_v3 = vld [vmem:[%s3278_s17] ss:$12 sps:$4 sm:$0xff]   ;;  %2809 = vmatprep.subr.bf16.mxu1 %v3145_v4  ;;  %v2961_v6 = vld [vmem:[%s3278_s17 + $0x1c] ss:$12 sps:$4 sm:$0xff]   ;;  %s3683_s22 = scalar_lea.vmem %s3639_s5, %s3262_s20  ;;  %s3684_s3 = scalar_lea.vmem %s3642_s8, %s3262_s20 }
  0x36   : > { %v2963_v7 = vld [vmem:[%s3278_s17 + $0x18] ss:$12 sps:$4 sm:$0xff]   ;;  %901 = vmatprep.subr.bf16.mxu0 %v2957_v2  ;;  %v2964_v8 = vld [vmem:[%s3278_s17 + $0x20] ss:$12 sps:$4 sm:$0xff]   ;;  %2810 = vmatpush3.bf16.msra.mxu1 %v2960_v5  ;;  %v2971_v17 = vld [vmem:[%s3278_s17 + $0x48] ss:$12 sps:$4 sm:$0xff]  }
  0x37   : > { %v2965_v9 = vld [vmem:[%s3278_s17 + $0x34] ss:$12 sps:$4 sm:$0xff]   ;;  %902 = vmatpush1.bf16.msra.mxu0 %v2959_v3  ;;  %2811 = vmatprep.subr.bf16.mxu1 %v3145_v4  ;;  %v2968_v15 = vld [vmem:[%s3278_s17 + $0x38] ss:$12 sps:$4 sm:$0xff]   ;;  %v2972_v18 = vld [vmem:[%s3278_s17 + $0x50] ss:$12 sps:$4 sm:$0xff]  }
  0x38   : > { %903 = vmatprep.subr.bf16.mxu0 %v2961_v6  ;;  %v2969_v16 = vld [vmem:[%s3278_s17 + $0x4c] ss:$12 sps:$4 sm:$0xff]   ;;  %v2973_v19 = vld [vmem:[%s3278_s17 + $0x64] ss:$12 sps:$4 sm:$0xff]   ;;  %v2976_v21 = vld [vmem:[%s3278_s17 + $0x68] ss:$12 sps:$4 sm:$0xff]  }
  0x39   : > { %v2975_v20 = vld [vmem:[%s3278_s17 + $0x60] ss:$12 sps:$4 sm:$0xff]   ;;  %v2977_v22 = vld [vmem:[%s3278_s17 + $0x7c] ss:$12 sps:$4 sm:$0xff]   ;;  %v2979_v23 = vld [vmem:[%s3278_s17 + $0x78] ss:$12 sps:$4 sm:$0xff]  }
  0x3a   : > { %2812 = vmatpush3.bf16.msra.mxu1 %v2964_v8  ;;  %v2980_v24 = vld [vmem:[%s3278_s17 + $0x80] ss:$12 sps:$4 sm:$0xff]   ;;  %v3146_v26 = vmov 0   ;;  %vm3147_vm0 = vmmov 0   ;;  %v2983_v27 = vld [vmem:[%s3278_s17 + $0x90] ss:$12 sps:$4 sm:$0xff]  }
  0x3b   : > { %904 = vmatpush1.bf16.msra.mxu0 %v2963_v7  ;;  %2813 = vmatprep.subr.bf16.mxu1 %v3145_v4  ;;  %v2981_v25 = vld [vmem:[%s3278_s17 + $0x94] ss:$12 sps:$4 sm:$0xff]   ;;  %v2984_v28 = vld [vmem:[%s3278_s17 + $0x98] ss:$12 sps:$4 sm:$0xff]   ;;  %v2988_v31 = vld [vmem:[%s3278_s17 + $0xb0] ss:$12 sps:$4 sm:$0xff]  }
  0x3c   : > { %905 = vmatprep.subr.bf16.mxu0 %v2965_v9  ;;  %933 = vmatprep.mubr.bf16.mxu0 %v3146_v26  ;;  %v2985_v29 = vld [vmem:[%s3278_s17 + $0xac] ss:$12 sps:$4 sm:$0xff]   ;;  %v2987_v30 = vld [vmem:[%s3278_s17 + $0xa8] ss:$12 sps:$4 sm:$0xff]   ;;  %v2609_v36 = vld [vmem:[%s3678_s9] ss:$0 sm:$0xff] }
  0x3d   : > { %2825 = vmatprep.mubr.msk.bf16.mxu1 %vm3147_vm0, %v3145_v4  ;;  %v2610_v38 = vld [vmem:[%s3679_s27] ss:$0 sm:$0xff]  ;;  %v3394_v43 = vshrl.u32 %v758_v42, 7  ;;  %vm1073_vm1 = vcmask 1043456   ;;  %vm1010_vm2 = vcmask 261120   ;;  %s3680_s15 = sld [smem:[#allocation8_spill]] }
  0x3e   : > { %2814 = vmatpush3.bf16.msra.mxu1 %v2968_v15  ;;  %v756_v45 = vld [vmem:[%s3288_s24] sm:$0x7]  ;;  %s3148_s24 = smov 96   ;;  %s3681_s1 = sld [smem:[#allocation10_spill]]  ;;  %vm1057_vm3 = vcmask 64512  }
  0x3f   : > { %906 = vmatpush1.bf16.msra.mxu0 %v2967_v14  ;;  %2815 = vmatprep.subr.bf16.mxu1 %v3145_v4  ;;  %v768_v44 = vsub.s32 2, %v3394_v43  ;;  %v764_v46 = vsub.s32 1, %v3394_v43  ;;  %v3400_v47 = vsub.s32 0, %v3394_v43  ;;  %s3149_s28 = smov 64   ;;  %s3150_s29 = smov 32  }
  0x40   : > { %907 = vmatprep.subr.bf16.mxu0 %v2969_v16  ;;  %s3685_s17 = sld [smem:[#allocation14_spill]] }
  0x41   : > { %v769_v48 = vrot.slane %v756_v45, %v768_v44  ;;  %v765_v49 = vrot.slane %v756_v45, %v764_v46  ;;  %v761_v50 = vrot.slane %v756_v45, %v3400_v47 }
  0x42   : > { %2816 = vmatpush3.bf16.msra.mxu1 %v2972_v18 }
  0x43   : > { %908 = vmatpush1.bf16.msra.mxu0 %v2971_v17  ;;  %2817 = vmatprep.subr.bf16.mxu1 %v3145_v4 }
  0x44   : > { %909 = vmatprep.subr.bf16.mxu0 %v2973_v19  ;;  %s3682_s30 = scalar_lea.vmem %s3681_s1, %s3680_s15 }
  0x45   : > { %v985_v8 = vld [vmem:[%s3682_s30] sm:$0x1] }
  0x46   : > { %2818 = vmatpush3.bf16.msra.mxu1 %v2976_v21  ;;  %v986_v9 = vsub.f32 1.0, %v985_v8  ;;  %s3686_s21 = scalar_lea.vmem %s3685_s17, %s3262_s20 }
  0x47   : > { %910 = vmatpush1.bf16.msra.mxu0 %v2975_v20  ;;  %2819 = vmatprep.subr.bf16.mxu1 %v3145_v4 }
  0x48   : > { %911 = vmatprep.subr.bf16.mxu0 %v2977_v22 }
  0x4a   : > { %2820 = vmatpush3.bf16.msra.mxu1 %v2980_v24 }
  0x4b   : > { %912 = vmatpush1.bf16.msra.mxu0 %v2979_v23  ;;  %2821 = vmatprep.subr.bf16.mxu1 %v3145_v4 }
  0x4c   : > { %913 = vmatprep.subr.bf16.mxu0 %v2981_v25 }
  0x4e   : > { %2822 = vmatpush3.bf16.msra.mxu1 %v2984_v28 }
  0x4f   : > { %914 = vmatpush1.bf16.msra.mxu0 %v2983_v27  ;;  %2823 = vmatprep.subr.bf16.mxu1 %v3145_v4 }
  0x50   : > { %915 = vmatprep.subr.bf16.mxu0 %v2985_v29 }
  0x52   : > { %2824 = vmatpush3.bf16.msra.mxu1 %v2988_v31 }
  0x53   : > { %916 = vmatpush1.bf16.msra.mxu0 %v2987_v30  ;;  %2835 = vmatprep.subr.bf16.mxu1 %v3145_v4 }
  0x54   : > { %2829 = vmatprep.subr.bf16.mxu0 %v3145_v4 }
  0xc2   : > { %v698_v10 = vpop.xlane.xlu0 %697 }
  0xc3   : > { %v700_v11 = vmul.f32 0.0078125, %v698_v10  ;;  %v987_v10 = vmul.f32 -1e+09, %v986_v9 }
  0xc5   : > { %v701_v12 = vsub.f32 %v3339_v1, %v700_v11  ;;  %v3438_v11 = vrot.slane %v987_v10, %v3400_v47 }
  0xc7   : > { %v702_v13 = vmul.f32 %v701_v12, %v701_v12 }
  0xc9   : > { %703 = vadd.xlane.f32.xlu0 %v702_v13 }
 0x156   : > { %v704_v32 = vpop.xlane.xlu0 %703 }
 0x157   : > { %v705_v33 = vmul.f32 0.0078125, %v704_v32 }
 0x159   : > { %v706_v34 = vadd.f32 1e-05, %v705_v33 }
 0x15b   : > { %3077 = vrsqrt.f32 %v706_v34 }
 0x165   : > { %v3078_v35 = vpop.eup %3077 }
 0x166   : > { %v708_v37 = vmul.f32 %v3078_v35, %v701_v12 }
 0x168   : > { %v715_v39 = vmul.f32 %v2609_v36, %v708_v37 }
 0x16a   : > { %v722_v40 = vadd.f32 %v2610_v38, %v715_v39  ;;  %v2991_v39 = vld [vmem:[%s3283_s13 + $0x10] sm:$0xff]  }
 0x16c   : > { %v723_v41 = vpack.c.bf16 %v722_v40, %v722_v40  ;;  %v2992_v40 = vld [vmem:[%s3283_s13 + $0x18] sm:$0xff]  }
 0x16e   : > { %934 = vmatmul.mubr.bf16.vlgmr.msra.gmra.mrb[0].mxu0 %v723_v41  ;;  %2826 = vmatmul.mubr.bf16.vlgmr.msra.gmra.mrb[0].mxu1 %v723_v41 }
 0x16f   : > { %2831 = vmatprep.mubr.msk.bf16.mxu0 %vm3147_vm0, %v3145_v4  ;;  %2837 = vmatprep.mubr.msk.bf16.mxu1 %vm3147_vm0, %v3145_v4 }
 0x241   : > { %v935_v51 = vpop.f32.mrb[0].mxu0  ;;  %v976_v52 = vpop.f32.mrb[0].mxu1 }
 0x242   : > { %v977_v53 = vadd.f32 %v976_v52, %v769_v48  ;;  %v937_v54 = vpop.f32.mrb[1].mxu0  ;;  %v2827_v55 = vpop.f32.mrb[1].mxu1  ;;  %v936_v62 = vadd.f32 %v935_v51, %v761_v50  ;;  %v2989_v50 = vld [vmem:[%s3283_s13] sm:$0xff]   ;;  %v2990_v52 = vld [vmem:[%s3283_s13 + $0x8] sm:$0xff]  }
 0x243   : > { %v938_v56 = vadd.f32 %v937_v54, %v765_v49  ;;  %v939_v57 = vpop.f32.mrb[2].mxu0  ;;  %v979_v58 = vpop.f32.mrb[2].mxu1 }
 0x244   : > { %v3407_v59 = vpack.c.bf16 %v977_v53, %v977_v53  ;;  %v940_v60 = vpop.f32.mrb[3].mxu0  ;;  %v2828_v61 = vpop.f32.mrb[3].mxu1  ;;  %v3418_v3 = vpack.c.bf16 %v936_v62, %v936_v62 }
 0x245   : > { %v3409_v63 = vpack.c.bf16 %v938_v56, %v938_v56 }
 0x246   : > { %v1075_v0 = vsel %vm1073_vm1, %v3407_v59, 0 }
 0x247   : > { %2836 = vmatpush3.bf16.msra.mxu1 %v1075_v0  ;;  %1122 = vrot.lane.b32.xlu1 %v3409_v63, %s3148_s24  ;;  %v1015_v2 = vsel %vm1010_vm2, %v3409_v63, 0 }
 0x248   : > { %2830 = vmatpush3.bf16.xpose.msra.mxu0 %v1015_v2  ;;  %2847 = vmatprep.subr.bf16.mxu1 %v3145_v4 }
 0x249   : > { %2841 = vmatprep.subr.bf16.mxu0 %v3145_v4 }
 0x24b   : > { %1119 = vrot.lane.b32.xlu1 %v3418_v3, %s3148_s24 }
 0x24f   : > { %2832 = vmatmul.mubr.msk.bf16.vlgmr.msra.gmra.mrb[4].mxu0 %vm1010_vm2, %v3418_v3 }
 0x250   : > { %2843 = vmatprep.mubr.msk.bf16.mxu0 %vm3147_vm0, %v3145_v4 }
 0x2b9   : > { %v1123_v5 = vpop.permute.xlu1 %1122 }
 0x2ba   : > { %v1128_v6 = vsel %vm1010_vm2, %v1123_v5, 0 }
 0x2bb   : > { %2842 = vmatpush3.bf16.xpose.msra.mxu0 %v1128_v6 }
 0x2bc   : > { %2853 = vmatprep.subr.bf16.mxu0 %v3145_v4 }
 0x2bd   : > { %v1120_v7 = vpop.permute.xlu1 %1119 }
 0x2c2   : > { %2844 = vmatmul.mubr.msk.bf16.vlgmr.msra.gmra.mrb[8].mxu0 %vm1010_vm2, %v1120_v7 }
 0x2c3   : > { %2857 = vmatprep.mubr.msk.bf16.mxu0 %vm3147_vm0, %v3145_v4  ;;  %2854 = vmatpush3.bf16.msra.mxu0 %v2991_v39 }
 0x2c4   : > { %2855 = vmatprep.subr.bf16.mxu0 %v3145_v4 }
 0x2c7   : > { %2856 = vmatpush3.bf16.msra.mxu0 %v2992_v40 }
 0x2c8   : > { %2869 = vmatprep.subr.bf16.mxu0 %v3145_v4 }
 0x322   : > { %v1051_v12 = vpop.f32.mrb[4].mxu0 }
 0x323   : > { %v1052_v13 = vadd.f32 %v1051_v12, %v3438_v11  ;;  %v2833_v14 = vpop.f32.mrb[5].mxu0 }
 0x324   : > { %v1054_v15 = vpop.f32.mrb[6].mxu0 }
 0x325   : > { %v2834_v16 = vpop.f32.mrb[7].mxu0  ;;  %v1058_v17 = vsel %vm1057_vm3, %v1052_v13, -inf }
 0x326   : > { %1059 = vmax.xlane.f32.xlu0 %v1058_v17 }
 0x395   : > { %v1164_v18 = vpop.f32.mrb[8].mxu0 }
 0x396   : > { %v1165_v19 = vadd.f32 %v1164_v18, %v3438_v11  ;;  %v2845_v20 = vpop.f32.mrb[9].mxu0 }
 0x397   : > { %v1167_v21 = vpop.f32.mrb[10].mxu0 }
 0x398   : > { %v2846_v22 = vpop.f32.mrb[11].mxu0  ;;  %v1170_v23 = vsel %vm1057_vm3, %v1165_v19, -inf }
 0x399   : > { %1171 = vmax.xlane.f32.xlu1 %v1170_v23 }
 0x3aa   : > { %1342 = vrot.lane.b32.xlu1 %v3418_v3, %s3149_s28 }
 0x3b3   : > { %v1060_v24 = vpop.xlane.xlu0 %1059 }
 0x3b4   : > { %v1061_v25 = vsub.f32 %v1052_v13, %v1060_v24 }
 0x3b6   : > { %v1062_v27 = vmul.f32 1.442695, %v1061_v25 }
 0x3b8   : > { %3079 = vpow2.f32 %v1062_v27 }
 0x3c2   : > { %v3080_v28 = vpop.eup %3079 }
 0x3c3   : > { %v1064_v29 = vsel %vm1057_vm3, %v3080_v28, 0.0 }
 0x3c4   : > { %1065 = vadd.xlane.f32.xlu0 %v1064_v29 }
 0x426   : > { %v1172_v30 = vpop.xlane.xlu1 %1171 }
 0x427   : > { %v1173_v31 = vsub.f32 %v1165_v19, %v1172_v30 }
 0x429   : > { %v1174_v32 = vmul.f32 1.442695, %v1173_v31  ;;  %v2993_v31 = vld [vmem:[%s3283_s13 + $0x20] sm:$0xff]  }
 0x42a   : > { %v1343_v6 = vpop.permute.xlu1 %1342 }
 0x42b   : > { %3081 = vpow2.f32 %v1174_v32 }
 0x435   : > { %v3082_v33 = vpop.eup %3081 }
 0x436   : > { %v1176_v34 = vsel %vm1057_vm3, %v3082_v33, 0.0 }
 0x437   : > { %1177 = vadd.xlane.f32.xlu0 %v1176_v34 }
 0x44d   : > { %1183 = vrot.lane.b32.xlu0 %v3407_v59, %s3148_s24 }
 0x451   : > { %v1066_v35 = vpop.xlane.xlu0 %1065  ;;  %1344 = vrot.lane.b32.xlu0 %v3409_v63, %s3149_s28 }
 0x452   : > { %3083 = vrcp.f32 %v1066_v35 }
 0x45c   : > { %v3084_v36 = vpop.eup %3083 }
 0x45d   : > { %v1068_v37 = vmul.f32 %v3084_v36, %v3080_v28 }
 0x45f   : > { %v1069_v38 = vpack.c.bf16 %v1068_v37, %v1068_v37  ;;  %v2994_v37 = vld [vmem:[%s3283_s13 + $0x28] sm:$0xff]  }
 0x461   : > { %2838 = vmatmul.mubr.msk.bf16.vlgmr.msra.gmra.mrb[4].mxu1 %vm1057_vm3, %v1069_v38 }
 0x462   : > { %2849 = vmatprep.mubr.msk.bf16.mxu1 %vm3147_vm0, %v3145_v4 }
 0x4c4   : > { %v1178_v41 = vpop.xlane.xlu0 %1177 }
 0x4c5   : > { %3085 = vrcp.f32 %v1178_v41 }
 0x4c8   : > { %v1184_v42 = vpop.permute.xlu0 %1183 }
 0x4c9   : > { %v1189_v45 = vsel %vm1073_vm1, %v1184_v42, 0 }
 0x4ca   : > { %2848 = vmatpush3.bf16.msra.mxu1 %v1189_v45 }
 0x4cb   : > { %2861 = vmatprep.subr.bf16.mxu1 %v3145_v4 }
 0x4cc   : > { %v1345_v58 = vpop.permute.xlu0 %1344 }
 0x4cd   : > { %v1350_v2 = vsel %vm1010_vm2, %v1345_v58, 0 }
 0x4cf   : > { %v3086_v48 = vpop.eup %3085 }
 0x4d0   : > { %v1180_v49 = vmul.f32 %v3086_v48, %v3082_v33 }
 0x4d2   : > { %v1181_v51 = vpack.c.bf16 %v1180_v49, %v1180_v49 }
 0x4d4   : > { %2850 = vmatmul.mubr.msk.bf16.vlgmr.msra.gmra.mrb[8].mxu1 %vm1057_vm3, %v1181_v51 }
 0x4d5   : > { %2862 = vmatpush3.bf16.msra.mxu1 %v2989_v50  ;;  %2865 = vmatprep.mubr.msk.bf16.mxu1 %vm3147_vm0, %v3145_v4 }
 0x4d6   : > { %2863 = vmatprep.subr.bf16.mxu1 %v3145_v4 }
 0x4d9   : > { %2864 = vmatpush3.bf16.msra.mxu1 %v2990_v52 }
 0x4da   : > { %2875 = vmatprep.subr.bf16.mxu1 %v3145_v4 }
 0x534   : > { %v1111_v53 = vpop.f32.mrb[4].mxu1 }
 0x535   : > { %v1117_v54 = vpack.c.bf16 %v1111_v53, %v1111_v53  ;;  %v2839_v55 = vpop.f32.mrb[5].mxu1 }
 0x536   : > { %v1114_v56 = vpop.f32.mrb[6].mxu1 }
 0x537   : > { %v2840_v57 = vpop.f32.mrb[7].mxu1  ;;  %2866 = vmatmul.mubr.msk.bf16.vlgmr.msra.gmra.mrb[12].mxu1 %vm1010_vm2, %v1117_v54 }
 0x538   : > { %2877 = vmatprep.mubr.msk.bf16.mxu1 %vm3147_vm0, %v3145_v4 }
 0x5a7   : > { %v1225_v60 = vpop.f32.mrb[8].mxu1 }
 0x5a8   : > { %v1231_v61 = vpack.c.bf16 %v1225_v60, %v1225_v60  ;;  %v2851_v62 = vpop.f32.mrb[9].mxu1  ;;  %v2995_v60 = vld [vmem:[%s3283_s13 + $0x30] sm:$0xff]  }
 0x5a9   : > { %v1228_v0 = vpop.f32.mrb[10].mxu1 }
 0x5aa   : > { %v2852_v5 = vpop.f32.mrb[11].mxu1  ;;  %2858 = vmatmul.mubr.msk.bf16.vlgmr.msra.gmra.mrb[12].mxu0 %vm1010_vm2, %v1231_v61 }
 0x5ab   : > { %2870 = vmatpush3.bf16.xpose.msra.mxu0 %v1350_v2  ;;  %2871 = vmatprep.mubr.msk.bf16.mxu0 %vm3147_vm0, %v3145_v4 }
 0x5ac   : > { %2881 = vmatprep.subr.bf16.mxu0 %v3145_v4 }
 0x5b2   : > { %2872 = vmatmul.mubr.msk.bf16.vlgmr.msra.gmra.mrb[16].mxu0 %vm1010_vm2, %v1343_v6 }
 0x5b3   : > { %2885 = vmatprep.mubr.msk.bf16.mxu0 %vm3147_vm0, %v3145_v4  ;;  %2882 = vmatpush3.bf16.msra.mxu0 %v2993_v31  ;;  %v3014_v31 = vld [vmem:[%s3315_s0 + $0x4c] ss:$16 sps:$4 sm:$0xff]  }
 0x5b4   : > { %2883 = vmatprep.subr.bf16.mxu0 %v3145_v4 }
 0x5b7   : > { %2884 = vmatpush3.bf16.msra.mxu0 %v2994_v37  ;;  %v3020_v37 = vld [vmem:[%s3315_s0 + $0x6c] ss:$16 sps:$4 sm:$0xff]  }
 0x5b8   : > { %2895 = vmatprep.subr.bf16.mxu0 %v3145_v4 }
 0x60a   : > { %v1336_v7 = vpop.f32.mrb[12].mxu1 }
 0x60b   : > { %v2867_v8 = vpop.f32.mrb[13].mxu1 }
 0x60c   : > { %v1339_v9 = vpop.f32.mrb[14].mxu1 }
 0x60d   : > { %v2868_v10 = vpop.f32.mrb[15].mxu1  ;;  %v2996_v9 = vld [vmem:[%s3283_s13 + $0x38] sm:$0xff]  }
 0x67d   : > { %v1281_v12 = vpop.f32.mrb[12].mxu0 }
 0x67e   : > { %v3479_v13 = vadd.f32 %v1336_v7, %v1281_v12  ;;  %v2859_v14 = vpop.f32.mrb[13].mxu0 }
 0x67f   : > { %v1284_v15 = vpop.f32.mrb[14].mxu0 }
 0x680   : > { %v2860_v16 = vpop.f32.mrb[15].mxu0 }
 0x685   : > { %v1386_v17 = vpop.f32.mrb[16].mxu0 }
 0x686   : > { %v1387_v18 = vadd.f32 %v1386_v17, %v3438_v11  ;;  %v2873_v19 = vpop.f32.mrb[17].mxu0 }
 0x687   : > { %v1389_v20 = vpop.f32.mrb[18].mxu0  ;;  %v2655_v19 = vld [vmem:[%s3683_s22] ss:$0 sm:$0xff] }
 0x688   : > { %v2874_v21 = vpop.f32.mrb[19].mxu0  ;;  %v1392_v22 = vsel %vm1057_vm3, %v1387_v18, -inf }
 0x689   : > { %1393 = vmax.xlane.f32.xlu0 %v1392_v22 }
 0x69f   : > { %1404 = vrot.lane.b32.xlu0 %v3407_v59, %s3149_s28 }
 0x6a3   : > { %1509 = vrot.lane.b32.xlu0 %v3418_v3, %s3150_s29 }
 0x716   : > { %v1394_v23 = vpop.xlane.xlu0 %1393 }
 0x717   : > { %v1395_v24 = vsub.f32 %v1387_v18, %v1394_v23  ;;  %v2999_v23 = vld [vmem:[%s3315_s0 + $0x4] ss:$16 sps:$4 sm:$0xff]  }
 0x719   : > { %v1396_v25 = vmul.f32 1.442695, %v1395_v24  ;;  %v3000_v24 = vld [vmem:[%s3315_s0 + $0x8] ss:$16 sps:$4 sm:$0xff]  }
 0x71a   : > { %v1405_v27 = vpop.permute.xlu0 %1404 }
 0x71b   : > { %3087 = vpow2.f32 %v1396_v25  ;;  %v1410_v28 = vsel %vm1073_vm1, %v1405_v27, 0  ;;  %v3002_v25 = vld [vmem:[%s3315_s0 + $0xc] ss:$16 sps:$4 sm:$0xff]   ;;  %v3005_v27 = vld [vmem:[%s3315_s0 + $0x24] ss:$16 sps:$4 sm:$0xff]  }
 0x71c   : > { %2876 = vmatpush3.bf16.msra.mxu1 %v1410_v28  ;;  %v3008_v28 = vld [vmem:[%s3315_s0 + $0x2c] ss:$16 sps:$4 sm:$0xff]  }
 0x71d   : > { %2889 = vmatprep.subr.bf16.mxu1 %v3145_v4 }
 0x725   : > { %v3088_v29 = vpop.eup %3087 }
 0x726   : > { %v1398_v30 = vsel %vm1057_vm3, %v3088_v29, 0.0 }
 0x727   : > { %1399 = vadd.xlane.f32.xlu1 %v1398_v30  ;;  %v3011_v30 = vld [vmem:[%s3315_s0 + $0x44] ss:$16 sps:$4 sm:$0xff]  }
 0x738   : > { %1511 = vrot.lane.b32.xlu1 %v3409_v63, %s3150_s29  ;;  %v1510_v63 = vpop.permute.xlu0 %1509 }
 0x7b4   : > { %v1400_v3 = vpop.xlane.xlu1 %1399 }
 0x7b5   : > { %3089 = vrcp.f32 %v1400_v3  ;;  %v3009_v3 = vld [vmem:[%s3315_s0 + $0x40] ss:$16 sps:$4 sm:$0xff]  }
 0x7b8   : > { %v1512_v34 = vpop.permute.xlu1 %1511 }
 0x7b9   : > { %v1517_v36 = vsel %vm1010_vm2, %v1512_v34, 0 }
 0x7bf   : > { %v3090_v32 = vpop.eup %3089 }
 0x7c0   : > { %v1402_v33 = vmul.f32 %v3090_v32, %v3088_v29  ;;  %v3006_v29 = vld [vmem:[%s3315_s0 + $0x28] ss:$16 sps:$4 sm:$0xff]  }
 0x7c1   : > { %v3012_v32 = vld [vmem:[%s3315_s0 + $0x48] ss:$16 sps:$4 sm:$0xff]  }
 0x7c2   : > { %v1403_v35 = vpack.c.bf16 %v1402_v33, %v1402_v33 }
 0x7c4   : > { %2878 = vmatmul.mubr.msk.bf16.vlgmr.msra.gmra.mrb[16].mxu1 %vm1057_vm3, %v1403_v35 }
 0x7c5   : > { %2890 = vmatpush3.bf16.xpose.msra.mxu1 %v1517_v36  ;;  %2891 = vmatprep.mubr.msk.bf16.mxu1 %vm3147_vm0, %v3145_v4 }
 0x7c6   : > { %2901 = vmatprep.subr.bf16.mxu1 %v3145_v4 }
 0x7cc   : > { %2892 = vmatmul.mubr.msk.bf16.vlgmr.msra.gmra.mrb[20].mxu1 %vm1010_vm2, %v1510_v63  ;;  %v3017_v63 = vld [vmem:[%s3315_s0 + $0x64] ss:$16 sps:$4 sm:$0xff]  }
 0x7cd   : > { %2905 = vmatprep.mubr.msk.bf16.mxu1 %vm3147_vm0, %v3145_v4  ;;  %2902 = vmatpush3.bf16.msra.mxu1 %v2995_v60 }
 0x7ce   : > { %2903 = vmatprep.subr.bf16.mxu1 %v3145_v4 }
 0x7d1   : > { %2904 = vmatpush3.bf16.msra.mxu1 %v2996_v9  ;;  %v3045_v9 = vld [vmem:[%s3325_s14 + $0x40] sm:$0xff]  }
 0x7d2   : > { %1968 = vmatprep.subr.bf16.mxu1 %v3002_v25  ;;  %v3061_v25 = vld [vmem:[%s3325_s14 + $0x60] sm:$0xff]  }
 0x897   : > { %v1446_v38 = vpop.f32.mrb[16].mxu1 }
 0x898   : > { %v1452_v39 = vpack.c.bf16 %v1446_v38, %v1446_v38  ;;  %v2879_v40 = vpop.f32.mrb[17].mxu1  ;;  %v3015_v38 = vld [vmem:[%s3315_s0 + $0x60] ss:$16 sps:$4 sm:$0xff]  }
 0x899   : > { %v1449_v41 = vpop.f32.mrb[18].mxu1  ;;  %v3023_v40 = vld [vmem:[%s3315_s0 + $0x84] ss:$16 sps:$4 sm:$0xff]  }
 0x89a   : > { %v2880_v42 = vpop.f32.mrb[19].mxu1  ;;  %2886 = vmatmul.mubr.msk.bf16.vlgmr.msra.gmra.mrb[20].mxu0 %vm1010_vm2, %v1452_v39  ;;  %v3018_v39 = vld [vmem:[%s3315_s0 + $0x68] ss:$16 sps:$4 sm:$0xff]   ;;  %v3026_v41 = vld [vmem:[%s3315_s0 + $0x8c] ss:$16 sps:$4 sm:$0xff]  }
 0x89b   : > { %2897 = vmatprep.mubr.msk.bf16.mxu0 %vm3147_vm0, %v3145_v4  ;;  %v3021_v42 = vld [vmem:[%s3315_s0 + $0x80] ss:$16 sps:$4 sm:$0xff]  }
 0x89f   : > { %v1553_v45 = vpop.f32.mrb[20].mxu1 }
 0x8a0   : > { %v1554_v48 = vadd.f32 %v1553_v45, %v3438_v11  ;;  %v2893_v49 = vpop.f32.mrb[21].mxu1  ;;  %v3024_v45 = vld [vmem:[%s3315_s0 + $0x88] ss:$16 sps:$4 sm:$0xff]  }
 0x8a1   : > { %v1556_v50 = vpop.f32.mrb[22].mxu1  ;;  %v3032_v49 = vld [vmem:[%s3315_s0 + $0xac] ss:$16 sps:$4 sm:$0xff]  }
 0x8a2   : > { %v2894_v51 = vpop.f32.mrb[23].mxu1  ;;  %v1559_v52 = vsel %vm1057_vm3, %v1554_v48, -inf  ;;  %v3027_v50 = vld [vmem:[%s3315_s0 + $0xa0] ss:$16 sps:$4 sm:$0xff]  }
 0x8a3   : > { %1560 = vmax.xlane.f32.xlu0 %v1559_v52  ;;  %v3030_v51 = vld [vmem:[%s3315_s0 + $0xa8] ss:$16 sps:$4 sm:$0xff]   ;;  %v3035_v52 = vld [vmem:[%s3315_s0 + $0xc4] ss:$16 sps:$4 sm:$0xff]  }
 0x8b9   : > { %1571 = vrot.lane.b32.xlu0 %v3407_v59, %s3150_s29 }
 0x930   : > { %v1561_v53 = vpop.xlane.xlu0 %1560 }
 0x931   : > { %v1562_v54 = vsub.f32 %v1554_v48, %v1561_v53  ;;  %v3029_v48 = vld [vmem:[%s3315_s0 + $0xa4] ss:$16 sps:$4 sm:$0xff]   ;;  %v3038_v53 = vld [vmem:[%s3315_s0 + $0xcc] ss:$16 sps:$4 sm:$0xff]  }
 0x933   : > { %v1563_v55 = vmul.f32 1.442695, %v1562_v54  ;;  %v3033_v54 = vld [vmem:[%s3315_s0 + $0xc0] ss:$16 sps:$4 sm:$0xff]  }
 0x934   : > { %v1572_v56 = vpop.permute.xlu0 %1571 }
 0x935   : > { %3091 = vpow2.f32 %v1563_v55  ;;  %v1577_v57 = vsel %vm1073_vm1, %v1572_v56, 0  ;;  %v3036_v55 = vld [vmem:[%s3315_s0 + $0xc8] ss:$16 sps:$4 sm:$0xff]   ;;  %v3041_v56 = vld [vmem:[%s3315_s0 + $0xe4] ss:$16 sps:$4 sm:$0xff]  }
 0x936   : > { %2896 = vmatpush3.bf16.msra.mxu0 %v1577_v57  ;;  %v3044_v57 = vld [vmem:[%s3315_s0 + $0xec] ss:$16 sps:$4 sm:$0xff]  }
 0x937   : > { %1927 = vmatprep.subr.bf16.mxu0 %v2999_v23  ;;  %v3059_v23 = vld [vmem:[%s3325_s14 + $0x18] sm:$0xff]  }
 0x93f   : > { %v3092_v58 = vpop.eup %3091 }
 0x940   : > { %v1565_v11 = vsel %vm1057_vm3, %v3092_v58, 0.0 }
 0x941   : > { %1566 = vadd.xlane.f32.xlu1 %v1565_v11  ;;  %v3042_v11 = vld [vmem:[%s3315_s0 + $0xe8] ss:$16 sps:$4 sm:$0xff]  }
 0x96d   : > { %v1502_v61 = vpop.f32.mrb[20].mxu0 }
 0x96e   : > { %v1508_v59 = vadd.f32 %v1502_v61, %v3479_v13  ;;  %v2887_v62 = vpop.f32.mrb[21].mxu0 }
 0x96f   : > { %v1505_v0 = vpop.f32.mrb[22].mxu0 }
 0x970   : > { %v2888_v2 = vpop.f32.mrb[23].mxu0  ;;  %v2656_v0 = vld [vmem:[%s3684_s3] ss:$0 sm:$0xff] }
 0x9ce   : > { %v1567_v5 = vpop.xlane.xlu1 %1566 }
 0x9cf   : > { %3093 = vrcp.f32 %v1567_v5  ;;  %v2657_v5 = vld [vmem:[%s3686_s21] ss:$0 sm:$0xff] }
 0x9d9   : > { %v3094_v6 = vpop.eup %3093 }
 0x9da   : > { %v1569_v7 = vmul.f32 %v3094_v6, %v3092_v58  ;;  %v3039_v58 = vld [vmem:[%s3315_s0 + $0xe0] ss:$16 sps:$4 sm:$0xff]  }
 0x9dc   : > { %v1570_v8 = vpack.c.bf16 %v1569_v7, %v1569_v7 }
 0x9de   : > { %2898 = vmatmul.mubr.msk.bf16.vlgmr.msra.gmra.mrb[24].mxu0 %vm1057_vm3, %v1570_v8 }
 0x9df   : > { %1959 = vmatprep.mubr.bf16.mxu0 %v3146_v26 }
 0xab1   : > { %v1613_v10 = vpop.f32.mrb[24].mxu0 }
 0xab2   : > { %v1619_v4 = vpack.c.bf16 %v1613_v10, %v1613_v10  ;;  %v2899_v12 = vpop.f32.mrb[25].mxu0  ;;  %v3046_v10 = vld [vmem:[%s3325_s14 + $0xc0] sm:$0xff]  }
 0xab3   : > { %v1616_v13 = vpop.f32.mrb[26].mxu0  ;;  %v3048_v12 = vld [vmem:[%s3325_s14 + $0x80] sm:$0xff]  }
 0xab4   : > { %v2900_v14 = vpop.f32.mrb[27].mxu0  ;;  %2906 = vmatmul.mubr.msk.bf16.vlgmr.msra.gmra.mrb[24].mxu1 %vm1010_vm2, %v1619_v4  ;;  %v3047_v4 = vld [vmem:[%s3325_s14] sm:$0xff]   ;;  %v3049_v13 = vld [vmem:[%s3325_s14 + $0x48] sm:$0xff]  }
 0xab5   : > { %2000 = vmatprep.mubr.bf16.mxu1 %v3146_v26  ;;  %v2997_v26 = vld [vmem:[%s3315_s0] ss:$16 sps:$4 sm:$0xff]   ;;  %1969 = vmatpush1.bf16.msra.mxu1 %v3000_v24  ;;  %v3050_v14 = vld [vmem:[%s3325_s14 + $0xc8] sm:$0xff]   ;;  %v3060_v24 = vld [vmem:[%s3325_s14 + $0x98] sm:$0xff]  }
 0xab6   : > { %1928 = vmatpush1.bf16.msra.mxu0 %v2997_v26  ;;  %1970 = vmatprep.subr.bf16.mxu1 %v3008_v28  ;;  %v3058_v26 = vld [vmem:[%s3325_s14 + $0xd8] sm:$0xff]   ;;  %v3063_v28 = vld [vmem:[%s3325_s14 + $0x20] sm:$0xff]  }
 0xab7   : > { %1929 = vmatprep.subr.bf16.mxu0 %v3005_v27  ;;  %v3062_v27 = vld [vmem:[%s3325_s14 + $0xe0] sm:$0xff]  }
 0xab9   : > { %1971 = vmatpush1.bf16.msra.mxu1 %v3006_v29  ;;  %v3065_v29 = vld [vmem:[%s3325_s14 + $0x68] sm:$0xff]  }
 0xaba   : > { %1972 = vmatprep.subr.bf16.mxu1 %v3014_v31  ;;  %v3067_v31 = vld [vmem:[%s3325_s14 + $0x28] sm:$0xff]  }
 0xabd   : > { %1973 = vmatpush1.bf16.msra.mxu1 %v3012_v32  ;;  %v3069_v32 = vld [vmem:[%s3325_s14 + $0x70] sm:$0xff]  }
 0xabe   : > { %1974 = vmatprep.subr.bf16.mxu1 %v3020_v37  ;;  %v3075_v37 = vld [vmem:[%s3325_s14 + $0x38] sm:$0xff]  }
 0xac1   : > { %1975 = vmatpush1.bf16.msra.mxu1 %v3018_v39  ;;  %v1745_v39 = vld [vmem:[%s3320_s16] sm:$0xf] }
 0xac2   : > { %1976 = vmatprep.subr.bf16.mxu1 %v3026_v41  ;;  %v1750_v41 = vrot.slane %v1745_v39, %v3400_v47 }
 0xac5   : > { %1977 = vmatpush1.bf16.msra.mxu1 %v3024_v45  ;;  %v1754_v45 = vrot.slane %v1745_v39, %v764_v46 }
 0xac6   : > { %1978 = vmatprep.subr.bf16.mxu1 %v3032_v49 }
 0xac9   : > { %1979 = vmatpush1.bf16.msra.mxu1 %v3030_v51 }
 0xaca   : > { %1980 = vmatprep.subr.bf16.mxu1 %v3038_v53 }
 0xacd   : > { %1981 = vmatpush1.bf16.msra.mxu1 %v3036_v55 }
 0xace   : > { %1982 = vmatprep.subr.bf16.mxu1 %v3044_v57 }
 0xad1   : > { %1983 = vmatpush1.bf16.msra.mxu1 %v3042_v11 }
 0xad2   : > { %2787 = vmatprep.subr.bf16.mxu1 %v3046_v10 }
 0xb87   : > { %v1669_v15 = vpop.f32.mrb[24].mxu1 }
 0xb88   : > { %v1675_v16 = vadd.f32 %v1669_v15, %v1508_v59  ;;  %v2907_v17 = vpop.f32.mrb[25].mxu1  ;;  %v3051_v15 = vld [vmem:[%s3325_s14 + $0x8] sm:$0xff]  }
 0xb89   : > { %v1672_v18 = vpop.f32.mrb[26].mxu1  ;;  %v3053_v17 = vld [vmem:[%s3325_s14 + $0x50] sm:$0xff]  }
 0xb8a   : > { %v1676_v20 = vadd.f32 %v1675_v16, %v3339_v1  ;;  %v2908_v21 = vpop.f32.mrb[27].mxu1  ;;  %v3003_v1 = vld [vmem:[%s3315_s0 + $0x20] ss:$16 sps:$4 sm:$0xff]   ;;  %v3052_v16 = vld [vmem:[%s3325_s14 + $0x88] sm:$0xff]  }
 0xb8b   : > { %1930 = vmatpush1.bf16.msra.mxu0 %v3003_v1  ;;  %v3054_v18 = vld [vmem:[%s3325_s14 + $0xd0] sm:$0xff]   ;;  %v3057_v21 = vld [vmem:[%s3325_s14 + $0x58] sm:$0xff]   ;;  %v3064_v1 = vld [vmem:[%s3325_s14 + $0xa0] sm:$0xff]  }
 0xb8c   : > { %v3527_v22 = vadd.f32 %v2655_v19, %v1676_v20  ;;  %1931 = vmatprep.subr.bf16.mxu0 %v3011_v30  ;;  %v3055_v19 = vld [vmem:[%s3325_s14 + $0x10] sm:$0xff]   ;;  %v3066_v30 = vld [vmem:[%s3325_s14 + $0xe8] sm:$0xff]  }
 0xb8d   : > { %v3056_v20 = vld [vmem:[%s3325_s14 + $0x90] sm:$0xff]  }
 0xb8e   : > { %1687 = vadd.xlane.f32.xlu1 %v3527_v22 }
 0xb8f   : > { %1932 = vmatpush1.bf16.msra.mxu0 %v3009_v3  ;;  %v3068_v3 = vld [vmem:[%s3325_s14 + $0xa8] sm:$0xff]  }
 0xb90   : > { %1933 = vmatprep.subr.bf16.mxu0 %v3017_v63  ;;  %v3074_v63 = vld [vmem:[%s3325_s14 + $0xf8] sm:$0xff]  }
 0xb93   : > { %1934 = vmatpush1.bf16.msra.mxu0 %v3015_v38  ;;  %v3076_v38 = vld [vmem:[%s3325_s14 + $0xb8] sm:$0xff]  }
 0xb94   : > { %1935 = vmatprep.subr.bf16.mxu0 %v3023_v40  ;;  %v1761_v40 = vsub.s32 3, %v3394_v43 }
 0xb97   : > { %1936 = vmatpush1.bf16.msra.mxu0 %v3021_v42  ;;  %v1758_v42 = vrot.slane %v1745_v39, %v768_v44 }
 0xb98   : > { %1937 = vmatprep.subr.bf16.mxu0 %v3029_v48  ;;  %v1762_v48 = vrot.slane %v1745_v39, %v1761_v40 }
 0xb9b   : > { %1938 = vmatpush1.bf16.msra.mxu0 %v3027_v50 }
 0xb9c   : > { %1939 = vmatprep.subr.bf16.mxu0 %v3035_v52 }
 0xb9f   : > { %1940 = vmatpush1.bf16.msra.mxu0 %v3033_v54 }
 0xba0   : > { %1941 = vmatprep.subr.bf16.mxu0 %v3041_v56 }
 0xba3   : > { %1942 = vmatpush1.bf16.msra.mxu0 %v3039_v58 }
 0xba4   : > { %2765 = vmatprep.subr.bf16.mxu0 %v3045_v9 }
 0xc1b   : > { %v1688_v33 = vpop.xlane.xlu1 %1687 }
 0xc1c   : > { %v1689_v34 = vmul.f32 0.0078125, %v1688_v33  ;;  %v3070_v33 = vld [vmem:[%s3325_s14 + $0xf0] sm:$0xff]  }
 0xc1e   : > { %v1690_v35 = vsub.f32 %v3527_v22, %v1689_v34  ;;  %v3071_v34 = vld [vmem:[%s3325_s14 + $0x30] sm:$0xff]  }
 0xc20   : > { %v1691_v36 = vmul.f32 %v1690_v35, %v1690_v35 }
 0xc22   : > { %1692 = vadd.xlane.f32.xlu1 %v1691_v36  ;;  %v3073_v36 = vld [vmem:[%s3325_s14 + $0x78] sm:$0xff]  }
 0xcaf   : > { %v1693_v60 = vpop.xlane.xlu1 %1692 }
 0xcb0   : > { %v1694_v61 = vmul.f32 0.0078125, %v1693_v60 }
 0xcb2   : > { %v1695_v59 = vadd.f32 1e-05, %v1694_v61 }
 0xcb4   : > { %3095 = vrsqrt.f32 %v1695_v59 }
 0xcbe   : > { %v3096_v62 = vpop.eup %3095 }
 0xcbf   : > { %v1697_v2 = vmul.f32 %v3096_v62, %v1690_v35  ;;  %v3072_v35 = vld [vmem:[%s3325_s14 + $0xb0] sm:$0xff]  }
 0xcc1   : > { %v1704_v6 = vmul.f32 %v2656_v0, %v1697_v2 }
 0xcc3   : > { %v1711_v7 = vadd.f32 %v2657_v5, %v1704_v6 }
 0xcc5   : > { %v1712_v8 = vpack.c.bf16 %v1711_v7, %v1711_v7 }
 0xcc7   : > { %1960 = vmatmul.mubr.bf16.vlgmr.msra.gmra.mrb[28].mxu0 %v1712_v8  ;;  %2001 = vmatmul.mubr.bf16.vlgmr.msra.gmra.mrb[28].mxu1 %v1712_v8 }
 0xcc8   : > { %2766 = vmatpush3.bf16.msra.mxu0 %v3047_v4  ;;  %2788 = vmatpush3.bf16.msra.mxu1 %v3048_v12 }
 0xcc9   : > { %2767 = vmatprep.subr.bf16.mxu0 %v3049_v13  ;;  %2789 = vmatprep.subr.bf16.mxu1 %v3050_v14 }
 0xccc   : > { %2768 = vmatpush3.bf16.msra.mxu0 %v3051_v15  ;;  %2790 = vmatpush3.bf16.msra.mxu1 %v3052_v16 }
 0xccd   : > { %2769 = vmatprep.subr.bf16.mxu0 %v3053_v17  ;;  %2791 = vmatprep.subr.bf16.mxu1 %v3054_v18 }
 0xcd0   : > { %2770 = vmatpush3.bf16.msra.mxu0 %v3055_v19  ;;  %2792 = vmatpush3.bf16.msra.mxu1 %v3056_v20 }
 0xcd1   : > { %2771 = vmatprep.subr.bf16.mxu0 %v3057_v21  ;;  %2793 = vmatprep.subr.bf16.mxu1 %v3058_v26 }
 0xcd4   : > { %2772 = vmatpush3.bf16.msra.mxu0 %v3059_v23  ;;  %2794 = vmatpush3.bf16.msra.mxu1 %v3060_v24 }
 0xcd5   : > { %2773 = vmatprep.subr.bf16.mxu0 %v3061_v25  ;;  %2795 = vmatprep.subr.bf16.mxu1 %v3062_v27 }
 0xcd8   : > { %2774 = vmatpush3.bf16.msra.mxu0 %v3063_v28  ;;  %2796 = vmatpush3.bf16.msra.mxu1 %v3064_v1 }
 0xcd9   : > { %2775 = vmatprep.subr.bf16.mxu0 %v3065_v29  ;;  %2797 = vmatprep.subr.bf16.mxu1 %v3066_v30 }
 0xcdc   : > { %2776 = vmatpush3.bf16.msra.mxu0 %v3067_v31  ;;  %2798 = vmatpush3.bf16.msra.mxu1 %v3068_v3 }
 0xcdd   : > { %2777 = vmatprep.subr.bf16.mxu0 %v3069_v32  ;;  %2799 = vmatprep.subr.bf16.mxu1 %v3070_v33 }
 0xce0   : > { %2778 = vmatpush3.bf16.msra.mxu0 %v3071_v34  ;;  %2800 = vmatpush3.bf16.msra.mxu1 %v3072_v35 }
 0xce1   : > { %2779 = vmatprep.subr.bf16.mxu0 %v3073_v36  ;;  %2801 = vmatprep.subr.bf16.mxu1 %v3074_v63  ;;  %v2690_v63 = vld [vmem:[%s682_s19] ss:$0 sm:$0xff] }
 0xce4   : > { %2780 = vmatpush3.bf16.msra.mxu0 %v3075_v37  ;;  %2802 = vmatpush3.bf16.msra.mxu1 %v3076_v38 }
 0xd9a   : > { %v1961_v49 = vpop.f32.mrb[28].mxu0  ;;  %v2002_v50 = vpop.f32.mrb[28].mxu1 }
 0xd9b   : > { %v1962_v51 = vadd.f32 %v1961_v49, %v1750_v41  ;;  %v2003_v52 = vadd.f32 %v2002_v50, %v1758_v42  ;;  %v1963_v53 = vpop.f32.mrb[29].mxu0  ;;  %v2004_v54 = vpop.f32.mrb[29].mxu1 }
 0xd9c   : > { %v1964_v55 = vadd.f32 %v1963_v53, %v1754_v45  ;;  %v2005_v56 = vadd.f32 %v2004_v54, %v1762_v48  ;;  %v1965_v57 = vpop.f32.mrb[30].mxu0  ;;  %v2006_v58 = vpop.f32.mrb[30].mxu1 }
 0xd9d   : > { %v2009_v11 = vmul.f32 %v1962_v51, %v1962_v51  ;;  %v2011_v60 = vmul.f32 %v2003_v52, %v2003_v52  ;;  %v1966_v47 = vpop.f32.mrb[31].mxu0  ;;  %v2007_v61 = vpop.f32.mrb[31].mxu1 }
 0xd9e   : > { %v2010_v59 = vmul.f32 %v1964_v55, %v1964_v55  ;;  %v2012_v44 = vmul.f32 %v2005_v56, %v2005_v56 }
 0xd9f   : > { %v2013_v62 = vmul.f32 %v2009_v11, %v1962_v51  ;;  %v2015_v43 = vmul.f32 %v2011_v60, %v2003_v52 }
 0xda0   : > { %v2014_v46 = vmul.f32 %v2010_v59, %v1964_v55  ;;  %v2016_v0 = vmul.f32 %v2012_v44, %v2005_v56 }
 0xda1   : > { %v2017_v2 = vmul.f32 0.044715, %v2013_v62  ;;  %v2019_v5 = vmul.f32 0.044715, %v2015_v43 }
 0xda2   : > { %v2018_v6 = vmul.f32 0.044715, %v2014_v46  ;;  %v2020_v7 = vmul.f32 0.044715, %v2016_v0 }
 0xda3   : > { %v2021_v8 = vadd.f32 %v2017_v2, %v1962_v51  ;;  %v2023_v9 = vadd.f32 %v2019_v5, %v2003_v52 }
 0xda4   : > { %v2022_v10 = vadd.f32 %v2018_v6, %v1964_v55  ;;  %v2024_v4 = vadd.f32 %v2020_v7, %v2005_v56 }
 0xda5   : > { %v2025_v12 = vmul.f32 0.7978846, %v2021_v8  ;;  %v2027_v13 = vmul.f32 0.7978846, %v2023_v9 }
 0xda6   : > { %v2026_v14 = vmul.f32 0.7978846, %v2022_v10  ;;  %v2028_v15 = vmul.f32 0.7978846, %v2024_v4 }
 0xda7   : > { %3097 = vtanh.f32 %v2025_v12 }
 0xda8   : > { %3099 = vtanh.f32 %v2027_v13 }
 0xda9   : > { %3101 = vtanh.f32 %v2026_v14 }
 0xdaa   : > { %3103 = vtanh.f32 %v2028_v15 }
 0xdb1   : > { %v3098_v16 = vpop.eup %3097 }
 0xdb2   : > { %v3100_v17 = vpop.eup %3099  ;;  %v2033_v18 = vadd.f32 1.0, %v3098_v16 }
 0xdb3   : > { %v3102_v19 = vpop.eup %3101  ;;  %v2035_v20 = vadd.f32 1.0, %v3100_v17 }
 0xdb4   : > { %v3104_v21 = vpop.eup %3103  ;;  %v2034_v26 = vadd.f32 1.0, %v3102_v19  ;;  %v2037_v23 = vmul.f32 0.5, %v2033_v18 }
 0xdb5   : > { %v2036_v24 = vadd.f32 1.0, %v3104_v21  ;;  %v2039_v25 = vmul.f32 0.5, %v2035_v20 }
 0xdb6   : > { %v2038_v27 = vmul.f32 0.5, %v2034_v26  ;;  %v2041_v1 = vmul.f32 %v2037_v23, %v1962_v51 }
 0xdb7   : > { %v2040_v28 = vmul.f32 0.5, %v2036_v24  ;;  %v2043_v30 = vmul.f32 %v2039_v25, %v2003_v52 }
 0xdb8   : > { %v2042_v29 = vmul.f32 %v2038_v27, %v1964_v55  ;;  %v2045_v33 = vpack.c.bf16 %v2041_v1, %v2041_v1 }
 0xdb9   : > { %v2044_v31 = vmul.f32 %v2040_v28, %v2005_v56  ;;  %v2047_v34 = vpack.c.bf16 %v2043_v30, %v2043_v30 }
 0xdba   : > { %v2046_v3 = vpack.c.bf16 %v2042_v29, %v2042_v29 }
 0xdbb   : > { %v2048_v32 = vpack.c.bf16 %v2044_v31, %v2044_v31 }
 0xdbc   : > { %2344 = vmatprep.mubr.bf16.mxu0 %v2046_v3 }
 0xdbd   : > { %2384 = vmatprep.mubr.bf16.mxu1 %v2048_v32  ;;  %2345 = vmatmul.mubr.bf16.vlgmr.msra.gmra.mrb[32].mxu0 %v2045_v33 }
 0xdbe   : > { %2385 = vmatmul.mubr.bf16.vlgmr.msra.gmra.mrb[32].mxu1 %v2047_v34 }
 0xe90   : > { %v2781_v35 = vpop.f32.mrb[32].mxu0 }
 0xe91   : > { %v2803_v36 = vpop.f32.mrb[32].mxu1  ;;  %v2782_v37 = vpop.f32.mrb[33].mxu0 }
 0xe92   : > { %v2783_v38 = vadd.f32 %v2782_v37, %v2781_v35  ;;  %v2804_v39 = vpop.f32.mrb[33].mxu1  ;;  %v2784_v40 = vpop.f32.mrb[34].mxu0 }
 0xe93   : > { %v2805_v41 = vadd.f32 %v2804_v39, %v2803_v36  ;;  %v2806_v42 = vpop.f32.mrb[34].mxu1  ;;  %v2785_v45 = vpop.f32.mrb[35].mxu0 }
 0xe94   : > { %v2347_v48 = vadd.f32 %v2783_v38, %v2690_v63  ;;  %v2807_v49 = vpop.f32.mrb[35].mxu1 }
 0xe96   : > { %v2387_v50 = vadd.f32 %v2805_v41, %v2347_v48 }
 0xe98   : > { %v2392_v51 = vadd.f32 %v2387_v50, %v3527_v22 }
 0xe9a   : > { %2393 = vst [vmem:[%s3334_s25] sm:$0xff] %v2392_v51 }
 0xe9b PF: > { %s3688_s24 = sld [smem:[#allocation5_spill]]  ;;  %s3689_s29 = sld [smem:[#allocation3_spill]] }
 0xe9c   : > { %s3690_s30 = sld [smem:[#allocation4_spill]]  ;;  %s3691_s15 = sld [smem:[#allocation6_spill]] }
 0xe9d   : > { %s3692_s16 = sld [smem:[#allocation7_spill]] }
 0xea1   : > { %s24_s17 = sadd.s32 1, %s3688_s24  }
 0xea2   : > { %p21_p8 = scmp.ge.s32.totalorder %s24_s17, 6  }
 0xea4   :  { %23 = sbr.rel (!%p21_p8) target bundleno = 9 (0x9), region = 149 }

</bundles_post_ra>
